<compile_context>
chip_gen: v5e
topology: v5e:2x2
jax: 0.10.0
libtpu: 0.0.40
codegen_flags: <defaults>
</compile_context>

<pallas_src>
import functools

import numpy as np
import jax
import jax.numpy as jnp
from jax import lax
from jax.experimental import pallas as pl
from jax.experimental.pallas import tpu as pltpu

# Hyperparameters (defaults of the PyTorch module, small batch/seq for demo)
VOCAB = 50       # vocab_size
VP = 64          # vocab padded to a sublane multiple for the one-hot matmul
E = 64           # embedding_dim
H = 128          # hidden_dim
B = 2            # real batch
T = 8            # sequence length
BP = 8           # batch padded to the f32 sublane tile (8)


def code_embed_kernel(fuse_dirs,
                      ids_ref,      # (T*BP, 1) int32  time-major, batch-padded ids
                      tbl_ref,      # (VP, 8H) bf16    emb@[W_ih_f|W_ih_b] + biases
                      whh_ref,      # (2H, 8H) bf16 block-diag (fused) or (2H, 4H) stacked
                      fc1w_ref,     # (2H, H)  bf16
                      fc1b_ref,     # (1, H)   f32
                      fcow_ref,     # (H, H)   bf16
                      fcob_ref,     # (1, H)   f32
                      out_ref,      # (BP, H)  f32
                      xg_ref):      # VMEM scratch (T*BP, 8H) f32 gate preactivations
    # ---- In-kernel embedding/input-projection gather: exact one-hot matmul ----
    ids = ids_ref[...]                                              # (T*BP, 1)
    vocab_iota = lax.broadcasted_iota(jnp.int32, (T * BP, VP), 1)
    onehot = (vocab_iota == ids).astype(jnp.bfloat16)               # exact 0/1
    xg_ref[...] = jnp.dot(onehot, tbl_ref[...],
                          preferred_element_type=jnp.float32)       # (T*BP, 8H)

    whh = whh_ref[...]

    def sigm(x):                      # 1 EUP push per gate (vs exp + reciprocal)
        return 0.5 * jnp.tanh(0.5 * x) + 0.5

    def gates_to_hc(gates, c):
        # PyTorch LSTM gate order i, f, g, o.
        i = sigm(gates[:, 0:H])
        f = sigm(gates[:, H:2 * H])
        g = jnp.tanh(gates[:, 2 * H:3 * H])
        o = sigm(gates[:, 3 * H:4 * H])
        c_new = f * c + i * g
        h_new = o * jnp.tanh(c_new)
        return h_new, c_new

    def body(t, carry):
        # One iteration advances BOTH directions (independent chains interleave).
        hf, cf, hb, cb = carry
        rf = pl.multiple_of(t * BP, BP)                  # fwd consumes time t
        rb = pl.multiple_of((T - 1 - t) * BP, BP)        # bwd consumes time T-1-t
        gf = xg_ref[pl.ds(rf, BP), 0:4 * H]
        gb = xg_ref[pl.ds(rb, BP), 4 * H:8 * H]
        if fuse_dirs:
            # One K=2H block-diagonal dot per step (fills 256-deep MXU).
            hcat = jnp.concatenate([hf, hb], axis=-1).astype(jnp.bfloat16)
            rec = jnp.dot(hcat, whh, preferred_element_type=jnp.float32)  # (BP, 8H)
            gates_f = gf + rec[:, 0:4 * H]
            gates_b = gb + rec[:, 4 * H:8 * H]
        else:
            gates_f = gf + jnp.dot(hf.astype(jnp.bfloat16), whh[0:H, :],
                                   preferred_element_type=jnp.float32)
            gates_b = gb + jnp.dot(hb.astype(jnp.bfloat16), whh[H:2 * H, :],
                                   preferred_element_type=jnp.float32)
        hf, cf = gates_to_hc(gates_f, cf)
        hb, cb = gates_to_hc(gates_b, cb)
        return hf, cf, hb, cb

    z = jnp.zeros((BP, H), jnp.float32)
    # Live state is ~4 vregs + transient gates -> unroll=True stays well inside
    # the 64-vreg file while giving the scheduler both chains to interleave.
    hf, _, hb, _ = lax.fori_loop(0, T, body, (z, z, z, z), unroll=True)

    # fc1(concat(h_fwd, h_bwd)) as a single K=2H matmul, ReLU, fc_out.
    hcat = jnp.concatenate([hf, hb], axis=-1).astype(jnp.bfloat16)   # (BP, 2H)
    fc1 = (jnp.dot(hcat, fc1w_ref[...], preferred_element_type=jnp.float32)
           + fc1b_ref[...])
    fc1 = jnp.maximum(fc1, 0.0).astype(jnp.bfloat16)
    out_ref[...] = (jnp.dot(fc1, fcow_ref[...], preferred_element_type=jnp.float32)
                    + fcob_ref[...])


def _should_fuse_directions():
    """Block-diag direction fusion only pays on the 256-deep MXU (v6e/v7x)."""
    try:
        kind = jax.devices()[0].device_kind.lower()
    except Exception:
        return False
    return ("v6" in kind) or ("v7" in kind)


@functools.partial(jax.jit, static_argnames=("fuse_dirs",))
def code_embedding_forward(token_ids, p, *, fuse_dirs):
    # Only glue left: relayout the (B, T) int32 ids to a time-major,
    # batch-padded (T*BP, 1) column (256 bytes; fused away under jit).
    ids = jnp.transpose(token_ids)                       # (T, B)
    ids = jnp.pad(ids, ((0, 0), (0, BP - B)))            # pad rows use token 0
    ids = ids.reshape(T * BP, 1).astype(jnp.int32)

    whh = p["w_hh_blkdiag"] if fuse_dirs else p["w_hh_stack"]
    vmem = pl.BlockSpec(memory_space=pltpu.MemorySpace.VMEM)
    args = (ids, p["table"], whh,
            p["fc1_w"], p["fc1_b"], p["fc_out_w"], p["fc_out_b"])

    out = pl.pallas_call(
        functools.partial(code_embed_kernel, fuse_dirs),
        out_shape=jax.ShapeDtypeStruct((BP, H), jnp.float32),
        in_specs=[vmem] * len(args),
        out_specs=vmem,
        scratch_shapes=[pltpu.VMEM((T * BP, 8 * H), jnp.float32)],
    )(*args)
    return out[:B]                                       # drop padded batch rows


def init_params(key):
    """Deterministic synthetic parameters matching the module's shapes.
    Notes for importing real PyTorch checkpoints: weights must be transposed to
    (in_dim, out_dim), and b_ih + b_hh of each direction must be SUMMED before
    being folded into the preactivation table."""
    ks = jax.random.split(key, 12)

    def u(k, shape, scale):
        return jax.random.uniform(k, shape, jnp.float32, -scale, scale)

    emb = jax.random.normal(ks[0], (VOCAB, E), jnp.float32)
    emb = emb.at[0].set(0.0)                             # padding_idx=0

    s_lstm = 1.0 / np.sqrt(H)
    s_fc1 = 1.0 / np.sqrt(2 * H)
    s_out = 1.0 / np.sqrt(H)

    w_ih_f = u(ks[1], (E, 4 * H), s_lstm)
    w_hh_f = u(ks[2], (H, 4 * H), s_lstm)
    b_f = u(ks[3], (1, 4 * H), s_lstm)                   # b_ih + b_hh combined
    w_ih_b = u(ks[4], (E, 4 * H), s_lstm)
    w_hh_b = u(ks[5], (H, 4 * H), s_lstm)
    b_b = u(ks[6], (1, 4 * H), s_lstm)

    # Precomputed gate-preactivation table: row v = emb[v] @ W_ih + b for both
    # directions.  Stored bf16; the in-kernel one-hot gather of it is exact.
    table = jnp.concatenate([emb @ w_ih_f + b_f, emb @ w_ih_b + b_b], axis=1)
    table = jnp.pad(table, ((0, VP - VOCAB), (0, 0))).astype(jnp.bfloat16)

    w_hh_f_bf = w_hh_f.astype(jnp.bfloat16)
    w_hh_b_bf = w_hh_b.astype(jnp.bfloat16)
    w_hh_stack = jnp.concatenate([w_hh_f_bf, w_hh_b_bf], axis=0)       # (2H, 4H)
    w_hh_blkdiag = jnp.zeros((2 * H, 8 * H), jnp.bfloat16)
    w_hh_blkdiag = w_hh_blkdiag.at[:H, :4 * H].set(w_hh_f_bf)
    w_hh_blkdiag = w_hh_blkdiag.at[H:, 4 * H:].set(w_hh_b_bf)

    return dict(
        table=table,
        w_hh_f=w_hh_f_bf, w_hh_b=w_hh_b_bf,
        w_hh_stack=w_hh_stack, w_hh_blkdiag=w_hh_blkdiag,
        fc1_w=jnp.concatenate([u(ks[7], (H, H), s_fc1),
                               u(ks[8], (H, H), s_fc1)], axis=0).astype(jnp.bfloat16),
        fc1_b=u(ks[9], (1, H), s_fc1),
        fc_out_w=u(ks[10], (H, H), s_out).astype(jnp.bfloat16),
        fc_out_b=u(ks[11], (1, H), s_out),
    )


def reference_forward(token_ids, p):
    """Pure-JAX reference mirroring torch semantics (and the kernel's bf16
    weight / bf16-cast-activation numerics) — used only to verify."""
    tbl = p["table"].astype(jnp.float32)
    g = tbl[token_ids]                                   # (B, T, 8H)
    g = jnp.transpose(g, (1, 0, 2))                      # (T, B, 8H)

    def sigm(x):
        return 0.5 * jnp.tanh(0.5 * x) + 0.5

    def run(gate_seq, w_hh):
        def step(carry, g_t):
            h, c = carry
            gates = g_t + jnp.dot(h.astype(jnp.bfloat16), w_hh,
                                  preferred_element_type=jnp.float32)
            i = sigm(gates[:, :H])
            f = sigm(gates[:, H:2 * H])
            gg = jnp.tanh(gates[:, 2 * H:3 * H])
            o = sigm(gates[:, 3 * H:])
            c = f * c + i * gg
            h = o * jnp.tanh(c)
            return (h, c), None
        (h, _), _ = lax.scan(step, (jnp.zeros((B, H)), jnp.zeros((B, H))), gate_seq)
        return h

    h_f = run(g[:, :, :4 * H], p["w_hh_f"])              # hidden[-2] in torch
    h_b = run(g[::-1, :, 4 * H:], p["w_hh_b"])           # hidden[-1] in torch
    hcat = jnp.concatenate([h_f, h_b], axis=1).astype(jnp.bfloat16)
    fc1 = jnp.maximum(jnp.dot(hcat, p["fc1_w"], preferred_element_type=jnp.float32)
                      + p["fc1_b"][0], 0.0).astype(jnp.bfloat16)
    return (jnp.dot(fc1, p["fc_out_w"], preferred_element_type=jnp.float32)
            + p["fc_out_b"][0])


if __name__ == "__main__":
    fuse_dirs = _should_fuse_directions()
    key = jax.random.PRNGKey(0)
    k_par, k_tok = jax.random.split(key)
    params = init_params(k_par)
    token_ids = jax.random.randint(k_tok, (B, T), 0, VOCAB, dtype=jnp.int32)

    out = code_embedding_forward(token_ids, params, fuse_dirs=fuse_dirs)
    out = jax.block_until_ready(out)

    ref = jax.block_until_ready(reference_forward(token_ids, params))
    np.testing.assert_allclose(np.asarray(out), np.asarray(ref),
                               rtol=1e-2, atol=1e-2)
    assert out.shape == (B, H)
    print("KERNEL_OK")
</pallas_src>

<mosaic_0001>
module attributes {stable_mosaic.version = 11 : i64} {
  func.func @code_embed_kernel(%arg0: memref<64x1xi32, #tpu.memory_space<vmem>>, %arg1: memref<64x1024xbf16, #tpu.memory_space<vmem>>, %arg2: memref<256x512xbf16, #tpu.memory_space<vmem>>, %arg3: memref<256x128xbf16, #tpu.memory_space<vmem>>, %arg4: memref<1x128xf32, #tpu.memory_space<vmem>>, %arg5: memref<128x128xbf16, #tpu.memory_space<vmem>>, %arg6: memref<1x128xf32, #tpu.memory_space<vmem>>, %arg7: memref<8x128xf32, #tpu.memory_space<vmem>>, %arg8: memref<64x1024xf32, #tpu.memory_space<vmem>>) attributes {dimension_semantics = [], scalar_prefetch = 0 : i64, scratch_operands = 1 : i64, tpu.core_type = #tpu.core_type<tc>} {
    %c0 = arith.constant 0 : index
    %c0_0 = arith.constant 0 : index
    %0 = vector.load %arg0[%c0, %c0_0] : memref<64x1xi32, #tpu.memory_space<vmem>>, vector<64x1xi32>
    %1 = tpu.iota {dimensions = array<i32: 1>} : vector<64x64xi32>
    %2 = vector.broadcast %0 : vector<64x1xi32> to vector<64x64xi32>
    %3 = arith.cmpi eq, %1, %2 : vector<64x64xi32>
    %4 = arith.extui %3 : vector<64x64xi1> to vector<64x64xi32>
    %5 = arith.sitofp %4 : vector<64x64xi32> to vector<64x64xf32>
    %6 = arith.truncf %5 : vector<64x64xf32> to vector<64x64xbf16>
    %c0_1 = arith.constant 0 : index
    %c0_2 = arith.constant 0 : index
    %7 = vector.load %arg1[%c0_1, %c0_2] : memref<64x1024xbf16, #tpu.memory_space<vmem>>, vector<64x1024xbf16>
    %cst = arith.constant dense<0.000000e+00> : vector<64x1024xf32>
    %8 = tpu.matmul %6, %7, %cst {dimension_numbers = #tpu.dot_dimension_numbers<[1], [0], [0], [1], [0, 0, 1, 1], [], []>} : vector<64x64xbf16>, vector<64x1024xbf16>, vector<64x1024xf32> -> vector<64x1024xf32>
    %c0_3 = arith.constant 0 : index
    %c0_4 = arith.constant 0 : index
    %9 = vector.load %arg8[%c0_3, %c0_4] : memref<64x1024xf32, #tpu.memory_space<vmem>>, vector<64x1024xf32>
    tpu.vector_store %arg8[%c0_3, %c0_4], %8 {strides = array<i32>} : memref<64x1024xf32, #tpu.memory_space<vmem>>, vector<64x1024xf32>,
    %c0_5 = arith.constant 0 : index
    %c0_6 = arith.constant 0 : index
    %10 = vector.load %arg2[%c0_5, %c0_6] : memref<256x512xbf16, #tpu.memory_space<vmem>>, vector<256x512xbf16>
    %cst_7 = arith.constant 0.000000e+00 : f32
    %11 = vector.broadcast %cst_7 : f32 to vector<8x128xf32>
    %c0_i32 = arith.constant 0 : i32
    %c8_i32 = arith.constant 8 : i32
    %12 = arith.muli %c0_i32, %c8_i32 : i32
    %13 = tpu.assume_multiple %12, 8 : i32
    %c7_i32 = arith.constant 7 : i32
    %14 = arith.subi %c7_i32, %c0_i32 : i32
    %c8_i32_8 = arith.constant 8 : i32
    %15 = arith.muli %14, %c8_i32_8 : i32
    %16 = tpu.assume_multiple %15, 8 : i32
    %17 = arith.index_cast %13 : i32 to index
    %c0_9 = arith.constant 0 : index
    %18 = vector.load %arg8[%17, %c0_9] : memref<64x1024xf32, #tpu.memory_space<vmem>>, vector<8x512xf32>
    %19 = arith.index_cast %16 : i32 to index
    %c512 = arith.constant 512 : index
    %20 = vector.load %arg8[%19, %c512] : memref<64x1024xf32, #tpu.memory_space<vmem>>, vector<8x512xf32>
    %21 = arith.truncf %11 : vector<8x128xf32> to vector<8x128xbf16>
    %22 = vector.extract_strided_slice %10 {offsets = [0, 0], sizes = [128, 512], strides = [1, 1]} : vector<256x512xbf16> to vector<128x512xbf16>
    %cst_10 = arith.constant dense<0.000000e+00> : vector<8x512xf32>
    %23 = tpu.matmul %21, %22, %cst_10 {dimension_numbers = #tpu.dot_dimension_numbers<[1], [0], [0], [1], [0, 0, 1, 1], [], []>} : vector<8x128xbf16>, vector<128x512xbf16>, vector<8x512xf32> -> vector<8x512xf32>
    %24 = arith.addf %18, %23 : vector<8x512xf32>
    %25 = arith.truncf %11 : vector<8x128xf32> to vector<8x128xbf16>
    %26 = vector.extract_strided_slice %10 {offsets = [128, 0], sizes = [128, 512], strides = [1, 1]} : vector<256x512xbf16> to vector<128x512xbf16>
    %cst_11 = arith.constant dense<0.000000e+00> : vector<8x512xf32>
    %27 = tpu.matmul %25, %26, %cst_11 {dimension_numbers = #tpu.dot_dimension_numbers<[1], [0], [0], [1], [0, 0, 1, 1], [], []>} : vector<8x128xbf16>, vector<128x512xbf16>, vector<8x512xf32> -> vector<8x512xf32>
    %28 = arith.addf %20, %27 : vector<8x512xf32>
    %29 = vector.extract_strided_slice %24 {offsets = [0, 0], sizes = [8, 128], strides = [1, 1]} : vector<8x512xf32> to vector<8x128xf32>
    %cst_12 = arith.constant 5.000000e-01 : f32
    %30 = vector.broadcast %cst_12 : f32 to vector<8x128xf32>
    %31 = arith.mulf %30, %29 : vector<8x128xf32>
    %32 = math.tanh %31 : vector<8x128xf32>
    %cst_13 = arith.constant 5.000000e-01 : f32
    %33 = vector.broadcast %cst_13 : f32 to vector<8x128xf32>
    %34 = arith.mulf %33, %32 : vector<8x128xf32>
    %cst_14 = arith.constant 5.000000e-01 : f32
    %35 = vector.broadcast %cst_14 : f32 to vector<8x128xf32>
    %36 = arith.addf %34, %35 : vector<8x128xf32>
    %37 = vector.extract_strided_slice %24 {offsets = [0, 128], sizes = [8, 128], strides = [1, 1]} : vector<8x512xf32> to vector<8x128xf32>
    %cst_15 = arith.constant 5.000000e-01 : f32
    %38 = vector.broadcast %cst_15 : f32 to vector<8x128xf32>
    %39 = arith.mulf %38, %37 : vector<8x128xf32>
    %40 = math.tanh %39 : vector<8x128xf32>
    %cst_16 = arith.constant 5.000000e-01 : f32
    %41 = vector.broadcast %cst_16 : f32 to vector<8x128xf32>
    %42 = arith.mulf %41, %40 : vector<8x128xf32>
    %cst_17 = arith.constant 5.000000e-01 : f32
    %43 = vector.broadcast %cst_17 : f32 to vector<8x128xf32>
    %44 = arith.addf %42, %43 : vector<8x128xf32>
    %45 = vector.extract_strided_slice %24 {offsets = [0, 256], sizes = [8, 128], strides = [1, 1]} : vector<8x512xf32> to vector<8x128xf32>
    %46 = math.tanh %45 : vector<8x128xf32>
    %47 = vector.extract_strided_slice %24 {offsets = [0, 384], sizes = [8, 128], strides = [1, 1]} : vector<8x512xf32> to vector<8x128xf32>
    %cst_18 = arith.constant 5.000000e-01 : f32
    %48 = vector.broadcast %cst_18 : f32 to vector<8x128xf32>
    %49 = arith.mulf %48, %47 : vector<8x128xf32>
    %50 = math.tanh %49 : vector<8x128xf32>
    %cst_19 = arith.constant 5.000000e-01 : f32
    %51 = vector.broadcast %cst_19 : f32 to vector<8x128xf32>
    %52 = arith.mulf %51, %50 : vector<8x128xf32>
    %cst_20 = arith.constant 5.000000e-01 : f32
    %53 = vector.broadcast %cst_20 : f32 to vector<8x128xf32>
    %54 = arith.addf %52, %53 : vector<8x128xf32>
    %55 = arith.mulf %44, %11 : vector<8x128xf32>
    %56 = arith.mulf %36, %46 : vector<8x128xf32>
    %57 = arith.addf %55, %56 : vector<8x128xf32>
    %58 = math.tanh %57 : vector<8x128xf32>
    %59 = arith.mulf %54, %58 : vector<8x128xf32>
    %60 = vector.extract_strided_slice %28 {offsets = [0, 0], sizes = [8, 128], strides = [1, 1]} : vector<8x512xf32> to vector<8x128xf32>
    %cst_21 = arith.constant 5.000000e-01 : f32
    %61 = vector.broadcast %cst_21 : f32 to vector<8x128xf32>
    %62 = arith.mulf %61, %60 : vector<8x128xf32>
    %63 = math.tanh %62 : vector<8x128xf32>
    %cst_22 = arith.constant 5.000000e-01 : f32
    %64 = vector.broadcast %cst_22 : f32 to vector<8x128xf32>
    %65 = arith.mulf %64, %63 : vector<8x128xf32>
    %cst_23 = arith.constant 5.000000e-01 : f32
    %66 = vector.broadcast %cst_23 : f32 to vector<8x128xf32>
    %67 = arith.addf %65, %66 : vector<8x128xf32>
    %68 = vector.extract_strided_slice %28 {offsets = [0, 128], sizes = [8, 128], strides = [1, 1]} : vector<8x512xf32> to vector<8x128xf32>
    %cst_24 = arith.constant 5.000000e-01 : f32
    %69 = vector.broadcast %cst_24 : f32 to vector<8x128xf32>
    %70 = arith.mulf %69, %68 : vector<8x128xf32>
    %71 = math.tanh %70 : vector<8x128xf32>
    %cst_25 = arith.constant 5.000000e-01 : f32
    %72 = vector.broadcast %cst_25 : f32 to vector<8x128xf32>
    %73 = arith.mulf %72, %71 : vector<8x128xf32>
    %cst_26 = arith.constant 5.000000e-01 : f32
    %74 = vector.broadcast %cst_26 : f32 to vector<8x128xf32>
    %75 = arith.addf %73, %74 : vector<8x128xf32>
    %76 = vector.extract_strided_slice %28 {offsets = [0, 256], sizes = [8, 128], strides = [1, 1]} : vector<8x512xf32> to vector<8x128xf32>
    %77 = math.tanh %76 : vector<8x128xf32>
    %78 = vector.extract_strided_slice %28 {offsets = [0, 384], sizes = [8, 128], strides = [1, 1]} : vector<8x512xf32> to vector<8x128xf32>
    %cst_27 = arith.constant 5.000000e-01 : f32
    %79 = vector.broadcast %cst_27 : f32 to vector<8x128xf32>
    %80 = arith.mulf %79, %78 : vector<8x128xf32>
    %81 = math.tanh %80 : vector<8x128xf32>
    %cst_28 = arith.constant 5.000000e-01 : f32
    %82 = vector.broadcast %cst_28 : f32 to vector<8x128xf32>
    %83 = arith.mulf %82, %81 : vector<8x128xf32>
    %cst_29 = arith.constant 5.000000e-01 : f32
    %84 = vector.broadcast %cst_29 : f32 to vector<8x128xf32>
    %85 = arith.addf %83, %84 : vector<8x128xf32>
    %86 = arith.mulf %75, %11 : vector<8x128xf32>
    %87 = arith.mulf %67, %77 : vector<8x128xf32>
    %88 = arith.addf %86, %87 : vector<8x128xf32>
    %89 = math.tanh %88 : vector<8x128xf32>
    %90 = arith.mulf %85, %89 : vector<8x128xf32>
    %c1_i32 = arith.constant 1 : i32
    %c8_i32_30 = arith.constant 8 : i32
    %91 = arith.muli %c1_i32, %c8_i32_30 : i32
    %92 = tpu.assume_multiple %91, 8 : i32
    %c7_i32_31 = arith.constant 7 : i32
    %93 = arith.subi %c7_i32_31, %c1_i32 : i32
    %c8_i32_32 = arith.constant 8 : i32
    %94 = arith.muli %93, %c8_i32_32 : i32
    %95 = tpu.assume_multiple %94, 8 : i32
    %96 = arith.index_cast %92 : i32 to index
    %c0_33 = arith.constant 0 : index
    %97 = vector.load %arg8[%96, %c0_33] : memref<64x1024xf32, #tpu.memory_space<vmem>>, vector<8x512xf32>
    %98 = arith.index_cast %95 : i32 to index
    %c512_34 = arith.constant 512 : index
    %99 = vector.load %arg8[%98, %c512_34] : memref<64x1024xf32, #tpu.memory_space<vmem>>, vector<8x512xf32>
    %100 = arith.truncf %59 : vector<8x128xf32> to vector<8x128xbf16>
    %101 = vector.extract_strided_slice %10 {offsets = [0, 0], sizes = [128, 512], strides = [1, 1]} : vector<256x512xbf16> to vector<128x512xbf16>
    %cst_35 = arith.constant dense<0.000000e+00> : vector<8x512xf32>
    %102 = tpu.matmul %100, %101, %cst_35 {dimension_numbers = #tpu.dot_dimension_numbers<[1], [0], [0], [1], [0, 0, 1, 1], [], []>} : vector<8x128xbf16>, vector<128x512xbf16>, vector<8x512xf32> -> vector<8x512xf32>
    %103 = arith.addf %97, %102 : vector<8x512xf32>
    %104 = arith.truncf %90 : vector<8x128xf32> to vector<8x128xbf16>
    %105 = vector.extract_strided_slice %10 {offsets = [128, 0], sizes = [128, 512], strides = [1, 1]} : vector<256x512xbf16> to vector<128x512xbf16>
    %cst_36 = arith.constant dense<0.000000e+00> : vector<8x512xf32>
    %106 = tpu.matmul %104, %105, %cst_36 {dimension_numbers = #tpu.dot_dimension_numbers<[1], [0], [0], [1], [0, 0, 1, 1], [], []>} : vector<8x128xbf16>, vector<128x512xbf16>, vector<8x512xf32> -> vector<8x512xf32>
    %107 = arith.addf %99, %106 : vector<8x512xf32>
    %108 = vector.extract_strided_slice %103 {offsets = [0, 0], sizes = [8, 128], strides = [1, 1]} : vector<8x512xf32> to vector<8x128xf32>
    %cst_37 = arith.constant 5.000000e-01 : f32
    %109 = vector.broadcast %cst_37 : f32 to vector<8x128xf32>
    %110 = arith.mulf %109, %108 : vector<8x128xf32>
    %111 = math.tanh %110 : vector<8x128xf32>
    %cst_38 = arith.constant 5.000000e-01 : f32
    %112 = vector.broadcast %cst_38 : f32 to vector<8x128xf32>
    %113 = arith.mulf %112, %111 : vector<8x128xf32>
    %cst_39 = arith.constant 5.000000e-01 : f32
    %114 = vector.broadcast %cst_39 : f32 to vector<8x128xf32>
    %115 = arith.addf %113, %114 : vector<8x128xf32>
    %116 = vector.extract_strided_slice %103 {offsets = [0, 128], sizes = [8, 128], strides = [1, 1]} : vector<8x512xf32> to vector<8x128xf32>
    %cst_40 = arith.constant 5.000000e-01 : f32
    %117 = vector.broadcast %cst_40 : f32 to vector<8x128xf32>
    %118 = arith.mulf %117, %116 : vector<8x128xf32>
    %119 = math.tanh %118 : vector<8x128xf32>
    %cst_41 = arith.constant 5.000000e-01 : f32
    %120 = vector.broadcast %cst_41 : f32 to vector<8x128xf32>
    %121 = arith.mulf %120, %119 : vector<8x128xf32>
    %cst_42 = arith.constant 5.000000e-01 : f32
    %122 = vector.broadcast %cst_42 : f32 to vector<8x128xf32>
    %123 = arith.addf %121, %122 : vector<8x128xf32>
    %124 = vector.extract_strided_slice %103 {offsets = [0, 256], sizes = [8, 128], strides = [1, 1]} : vector<8x512xf32> to vector<8x128xf32>
    %125 = math.tanh %124 : vector<8x128xf32>
    %126 = vector.extract_strided_slice %103 {offsets = [0, 384], sizes = [8, 128], strides = [1, 1]} : vector<8x512xf32> to vector<8x128xf32>
    %cst_43 = arith.constant 5.000000e-01 : f32
    %127 = vector.broadcast %cst_43 : f32 to vector<8x128xf32>
    %128 = arith.mulf %127, %126 : vector<8x128xf32>
    %129 = math.tanh %128 : vector<8x128xf32>
    %cst_44 = arith.constant 5.000000e-01 : f32
    %130 = vector.broadcast %cst_44 : f32 to vector<8x128xf32>
    %131 = arith.mulf %130, %129 : vector<8x128xf32>
    %cst_45 = arith.constant 5.000000e-01 : f32
    %132 = vector.broadcast %cst_45 : f32 to vector<8x128xf32>
    %133 = arith.addf %131, %132 : vector<8x128xf32>
    %134 = arith.mulf %123, %57 : vector<8x128xf32>
    %135 = arith.mulf %115, %125 : vector<8x128xf32>
    %136 = arith.addf %134, %135 : vector<8x128xf32>
    %137 = math.tanh %136 : vector<8x128xf32>
    %138 = arith.mulf %133, %137 : vector<8x128xf32>
    %139 = vector.extract_strided_slice %107 {offsets = [0, 0], sizes = [8, 128], strides = [1, 1]} : vector<8x512xf32> to vector<8x128xf32>
    %cst_46 = arith.constant 5.000000e-01 : f32
    %140 = vector.broadcast %cst_46 : f32 to vector<8x128xf32>
    %141 = arith.mulf %140, %139 : vector<8x128xf32>
    %142 = math.tanh %141 : vector<8x128xf32>
    %cst_47 = arith.constant 5.000000e-01 : f32
    %143 = vector.broadcast %cst_47 : f32 to vector<8x128xf32>
    %144 = arith.mulf %143, %142 : vector<8x128xf32>
    %cst_48 = arith.constant 5.000000e-01 : f32
    %145 = vector.broadcast %cst_48 : f32 to vector<8x128xf32>
    %146 = arith.addf %144, %145 : vector<8x128xf32>
    %147 = vector.extract_strided_slice %107 {offsets = [0, 128], sizes = [8, 128], strides = [1, 1]} : vector<8x512xf32> to vector<8x128xf32>
    %cst_49 = arith.constant 5.000000e-01 : f32
    %148 = vector.broadcast %cst_49 : f32 to vector<8x128xf32>
    %149 = arith.mulf %148, %147 : vector<8x128xf32>
    %150 = math.tanh %149 : vector<8x128xf32>
    %cst_50 = arith.constant 5.000000e-01 : f32
    %151 = vector.broadcast %cst_50 : f32 to vector<8x128xf32>
    %152 = arith.mulf %151, %150 : vector<8x128xf32>
    %cst_51 = arith.constant 5.000000e-01 : f32
    %153 = vector.broadcast %cst_51 : f32 to vector<8x128xf32>
    %154 = arith.addf %152, %153 : vector<8x128xf32>
    %155 = vector.extract_strided_slice %107 {offsets = [0, 256], sizes = [8, 128], strides = [1, 1]} : vector<8x512xf32> to vector<8x128xf32>
    %156 = math.tanh %155 : vector<8x128xf32>
    %157 = vector.extract_strided_slice %107 {offsets = [0, 384], sizes = [8, 128], strides = [1, 1]} : vector<8x512xf32> to vector<8x128xf32>
    %cst_52 = arith.constant 5.000000e-01 : f32
    %158 = vector.broadcast %cst_52 : f32 to vector<8x128xf32>
    %159 = arith.mulf %158, %157 : vector<8x128xf32>
    %160 = math.tanh %159 : vector<8x128xf32>
    %cst_53 = arith.constant 5.000000e-01 : f32
    %161 = vector.broadcast %cst_53 : f32 to vector<8x128xf32>
    %162 = arith.mulf %161, %160 : vector<8x128xf32>
    %cst_54 = arith.constant 5.000000e-01 : f32
    %163 = vector.broadcast %cst_54 : f32 to vector<8x128xf32>
    %164 = arith.addf %162, %163 : vector<8x128xf32>
    %165 = arith.mulf %154, %88 : vector<8x128xf32>
    %166 = arith.mulf %146, %156 : vector<8x128xf32>
    %167 = arith.addf %165, %166 : vector<8x128xf32>
    %168 = math.tanh %167 : vector<8x128xf32>
    %169 = arith.mulf %164, %168 : vector<8x128xf32>
    %c2_i32 = arith.constant 2 : i32
    %c8_i32_55 = arith.constant 8 : i32
    %170 = arith.muli %c2_i32, %c8_i32_55 : i32
    %171 = tpu.assume_multiple %170, 8 : i32
    %c7_i32_56 = arith.constant 7 : i32
    %172 = arith.subi %c7_i32_56, %c2_i32 : i32
    %c8_i32_57 = arith.constant 8 : i32
    %173 = arith.muli %172, %c8_i32_57 : i32
    %174 = tpu.assume_multiple %173, 8 : i32
    %175 = arith.index_cast %171 : i32 to index
    %c0_58 = arith.constant 0 : index
    %176 = vector.load %arg8[%175, %c0_58] : memref<64x1024xf32, #tpu.memory_space<vmem>>, vector<8x512xf32>
    %177 = arith.index_cast %174 : i32 to index
    %c512_59 = arith.constant 512 : index
    %178 = vector.load %arg8[%177, %c512_59] : memref<64x1024xf32, #tpu.memory_space<vmem>>, vector<8x512xf32>
    %179 = arith.truncf %138 : vector<8x128xf32> to vector<8x128xbf16>
    %180 = vector.extract_strided_slice %10 {offsets = [0, 0], sizes = [128, 512], strides = [1, 1]} : vector<256x512xbf16> to vector<128x512xbf16>
    %cst_60 = arith.constant dense<0.000000e+00> : vector<8x512xf32>
    %181 = tpu.matmul %179, %180, %cst_60 {dimension_numbers = #tpu.dot_dimension_numbers<[1], [0], [0], [1], [0, 0, 1, 1], [], []>} : vector<8x128xbf16>, vector<128x512xbf16>, vector<8x512xf32> -> vector<8x512xf32>
    %182 = arith.addf %176, %181 : vector<8x512xf32>
    %183 = arith.truncf %169 : vector<8x128xf32> to vector<8x128xbf16>
    %184 = vector.extract_strided_slice %10 {offsets = [128, 0], sizes = [128, 512], strides = [1, 1]} : vector<256x512xbf16> to vector<128x512xbf16>
    %cst_61 = arith.constant dense<0.000000e+00> : vector<8x512xf32>
    %185 = tpu.matmul %183, %184, %cst_61 {dimension_numbers = #tpu.dot_dimension_numbers<[1], [0], [0], [1], [0, 0, 1, 1], [], []>} : vector<8x128xbf16>, vector<128x512xbf16>, vector<8x512xf32> -> vector<8x512xf32>
    %186 = arith.addf %178, %185 : vector<8x512xf32>
    %187 = vector.extract_strided_slice %182 {offsets = [0, 0], sizes = [8, 128], strides = [1, 1]} : vector<8x512xf32> to vector<8x128xf32>
    %cst_62 = arith.constant 5.000000e-01 : f32
    %188 = vector.broadcast %cst_62 : f32 to vector<8x128xf32>
    %189 = arith.mulf %188, %187 : vector<8x128xf32>
    %190 = math.tanh %189 : vector<8x128xf32>
    %cst_63 = arith.constant 5.000000e-01 : f32
    %191 = vector.broadcast %cst_63 : f32 to vector<8x128xf32>
    %192 = arith.mulf %191, %190 : vector<8x128xf32>
    %cst_64 = arith.constant 5.000000e-01 : f32
    %193 = vector.broadcast %cst_64 : f32 to vector<8x128xf32>
    %194 = arith.addf %192, %193 : vector<8x128xf32>
    %195 = vector.extract_strided_slice %182 {offsets = [0, 128], sizes = [8, 128], strides = [1, 1]} : vector<8x512xf32> to vector<8x128xf32>
    %cst_65 = arith.constant 5.000000e-01 : f32
    %196 = vector.broadcast %cst_65 : f32 to vector<8x128xf32>
    %197 = arith.mulf %196, %195 : vector<8x128xf32>
    %198 = math.tanh %197 : vector<8x128xf32>
    %cst_66 = arith.constant 5.000000e-01 : f32
    %199 = vector.broadcast %cst_66 : f32 to vector<8x128xf32>
    %200 = arith.mulf %199, %198 : vector<8x128xf32>
    %cst_67 = arith.constant 5.000000e-01 : f32
    %201 = vector.broadcast %cst_67 : f32 to vector<8x128xf32>
    %202 = arith.addf %200, %201 : vector<8x128xf32>
    %203 = vector.extract_strided_slice %182 {offsets = [0, 256], sizes = [8, 128], strides = [1, 1]} : vector<8x512xf32> to vector<8x128xf32>
    %204 = math.tanh %203 : vector<8x128xf32>
    %205 = vector.extract_strided_slice %182 {offsets = [0, 384], sizes = [8, 128], strides = [1, 1]} : vector<8x512xf32> to vector<8x128xf32>
    %cst_68 = arith.constant 5.000000e-01 : f32
    %206 = vector.broadcast %cst_68 : f32 to vector<8x128xf32>
    %207 = arith.mulf %206, %205 : vector<8x128xf32>
    %208 = math.tanh %207 : vector<8x128xf32>
    %cst_69 = arith.constant 5.000000e-01 : f32
    %209 = vector.broadcast %cst_69 : f32 to vector<8x128xf32>
    %210 = arith.mulf %209, %208 : vector<8x128xf32>
    %cst_70 = arith.constant 5.000000e-01 : f32
    %211 = vector.broadcast %cst_70 : f32 to vector<8x128xf32>
    %212 = arith.addf %210, %211 : vector<8x128xf32>
    %213 = arith.mulf %202, %136 : vector<8x128xf32>
    %214 = arith.mulf %194, %204 : vector<8x128xf32>
    %215 = arith.addf %213, %214 : vector<8x128xf32>
    %216 = math.tanh %215 : vector<8x128xf32>
    %217 = arith.mulf %212, %216 : vector<8x128xf32>
    %218 = vector.extract_strided_slice %186 {offsets = [0, 0], sizes = [8, 128], strides = [1, 1]} : vector<8x512xf32> to vector<8x128xf32>
    %cst_71 = arith.constant 5.000000e-01 : f32
    %219 = vector.broadcast %cst_71 : f32 to vector<8x128xf32>
    %220 = arith.mulf %219, %218 : vector<8x128xf32>
    %221 = math.tanh %220 : vector<8x128xf32>
    %cst_72 = arith.constant 5.000000e-01 : f32
    %222 = vector.broadcast %cst_72 : f32 to vector<8x128xf32>
    %223 = arith.mulf %222, %221 : vector<8x128xf32>
    %cst_73 = arith.constant 5.000000e-01 : f32
    %224 = vector.broadcast %cst_73 : f32 to vector<8x128xf32>
    %225 = arith.addf %223, %224 : vector<8x128xf32>
    %226 = vector.extract_strided_slice %186 {offsets = [0, 128], sizes = [8, 128], strides = [1, 1]} : vector<8x512xf32> to vector<8x128xf32>
    %cst_74 = arith.constant 5.000000e-01 : f32
    %227 = vector.broadcast %cst_74 : f32 to vector<8x128xf32>
    %228 = arith.mulf %227, %226 : vector<8x128xf32>
    %229 = math.tanh %228 : vector<8x128xf32>
    %cst_75 = arith.constant 5.000000e-01 : f32
    %230 = vector.broadcast %cst_75 : f32 to vector<8x128xf32>
    %231 = arith.mulf %230, %229 : vector<8x128xf32>
    %cst_76 = arith.constant 5.000000e-01 : f32
    %232 = vector.broadcast %cst_76 : f32 to vector<8x128xf32>
    %233 = arith.addf %231, %232 : vector<8x128xf32>
    %234 = vector.extract_strided_slice %186 {offsets = [0, 256], sizes = [8, 128], strides = [1, 1]} : vector<8x512xf32> to vector<8x128xf32>
    %235 = math.tanh %234 : vector<8x128xf32>
    %236 = vector.extract_strided_slice %186 {offsets = [0, 384], sizes = [8, 128], strides = [1, 1]} : vector<8x512xf32> to vector<8x128xf32>
    %cst_77 = arith.constant 5.000000e-01 : f32
    %237 = vector.broadcast %cst_77 : f32 to vector<8x128xf32>
    %238 = arith.mulf %237, %236 : vector<8x128xf32>
    %239 = math.tanh %238 : vector<8x128xf32>
    %cst_78 = arith.constant 5.000000e-01 : f32
    %240 = vector.broadcast %cst_78 : f32 to vector<8x128xf32>
    %241 = arith.mulf %240, %239 : vector<8x128xf32>
    %cst_79 = arith.constant 5.000000e-01 : f32
    %242 = vector.broadcast %cst_79 : f32 to vector<8x128xf32>
    %243 = arith.addf %241, %242 : vector<8x128xf32>
    %244 = arith.mulf %233, %167 : vector<8x128xf32>
    %245 = arith.mulf %225, %235 : vector<8x128xf32>
    %246 = arith.addf %244, %245 : vector<8x128xf32>
    %247 = math.tanh %246 : vector<8x128xf32>
    %248 = arith.mulf %243, %247 : vector<8x128xf32>
    %c3_i32 = arith.constant 3 : i32
    %c8_i32_80 = arith.constant 8 : i32
    %249 = arith.muli %c3_i32, %c8_i32_80 : i32
    %250 = tpu.assume_multiple %249, 8 : i32
    %c7_i32_81 = arith.constant 7 : i32
    %251 = arith.subi %c7_i32_81, %c3_i32 : i32
    %c8_i32_82 = arith.constant 8 : i32
    %252 = arith.muli %251, %c8_i32_82 : i32
    %253 = tpu.assume_multiple %252, 8 : i32
    %254 = arith.index_cast %250 : i32 to index
    %c0_83 = arith.constant 0 : index
    %255 = vector.load %arg8[%254, %c0_83] : memref<64x1024xf32, #tpu.memory_space<vmem>>, vector<8x512xf32>
    %256 = arith.index_cast %253 : i32 to index
    %c512_84 = arith.constant 512 : index
    %257 = vector.load %arg8[%256, %c512_84] : memref<64x1024xf32, #tpu.memory_space<vmem>>, vector<8x512xf32>
    %258 = arith.truncf %217 : vector<8x128xf32> to vector<8x128xbf16>
    %259 = vector.extract_strided_slice %10 {offsets = [0, 0], sizes = [128, 512], strides = [1, 1]} : vector<256x512xbf16> to vector<128x512xbf16>
    %cst_85 = arith.constant dense<0.000000e+00> : vector<8x512xf32>
    %260 = tpu.matmul %258, %259, %cst_85 {dimension_numbers = #tpu.dot_dimension_numbers<[1], [0], [0], [1], [0, 0, 1, 1], [], []>} : vector<8x128xbf16>, vector<128x512xbf16>, vector<8x512xf32> -> vector<8x512xf32>
    %261 = arith.addf %255, %260 : vector<8x512xf32>
    %262 = arith.truncf %248 : vector<8x128xf32> to vector<8x128xbf16>
    %263 = vector.extract_strided_slice %10 {offsets = [128, 0], sizes = [128, 512], strides = [1, 1]} : vector<256x512xbf16> to vector<128x512xbf16>
    %cst_86 = arith.constant dense<0.000000e+00> : vector<8x512xf32>
    %264 = tpu.matmul %262, %263, %cst_86 {dimension_numbers = #tpu.dot_dimension_numbers<[1], [0], [0], [1], [0, 0, 1, 1], [], []>} : vector<8x128xbf16>, vector<128x512xbf16>, vector<8x512xf32> -> vector<8x512xf32>
    %265 = arith.addf %257, %264 : vector<8x512xf32>
    %266 = vector.extract_strided_slice %261 {offsets = [0, 0], sizes = [8, 128], strides = [1, 1]} : vector<8x512xf32> to vector<8x128xf32>
    %cst_87 = arith.constant 5.000000e-01 : f32
    %267 = vector.broadcast %cst_87 : f32 to vector<8x128xf32>
    %268 = arith.mulf %267, %266 : vector<8x128xf32>
    %269 = math.tanh %268 : vector<8x128xf32>
    %cst_88 = arith.constant 5.000000e-01 : f32
    %270 = vector.broadcast %cst_88 : f32 to vector<8x128xf32>
    %271 = arith.mulf %270, %269 : vector<8x128xf32>
    %cst_89 = arith.constant 5.000000e-01 : f32
    %272 = vector.broadcast %cst_89 : f32 to vector<8x128xf32>
    %273 = arith.addf %271, %272 : vector<8x128xf32>
    %274 = vector.extract_strided_slice %261 {offsets = [0, 128], sizes = [8, 128], strides = [1, 1]} : vector<8x512xf32> to vector<8x128xf32>
    %cst_90 = arith.constant 5.000000e-01 : f32
    %275 = vector.broadcast %cst_90 : f32 to vector<8x128xf32>
    %276 = arith.mulf %275, %274 : vector<8x128xf32>
    %277 = math.tanh %276 : vector<8x128xf32>
    %cst_91 = arith.constant 5.000000e-01 : f32
    %278 = vector.broadcast %cst_91 : f32 to vector<8x128xf32>
    %279 = arith.mulf %278, %277 : vector<8x128xf32>
    %cst_92 = arith.constant 5.000000e-01 : f32
    %280 = vector.broadcast %cst_92 : f32 to vector<8x128xf32>
    %281 = arith.addf %279, %280 : vector<8x128xf32>
    %282 = vector.extract_strided_slice %261 {offsets = [0, 256], sizes = [8, 128], strides = [1, 1]} : vector<8x512xf32> to vector<8x128xf32>
    %283 = math.tanh %282 : vector<8x128xf32>
    %284 = vector.extract_strided_slice %261 {offsets = [0, 384], sizes = [8, 128], strides = [1, 1]} : vector<8x512xf32> to vector<8x128xf32>
    %cst_93 = arith.constant 5.000000e-01 : f32
    %285 = vector.broadcast %cst_93 : f32 to vector<8x128xf32>
    %286 = arith.mulf %285, %284 : vector<8x128xf32>
    %287 = math.tanh %286 : vector<8x128xf32>
    %cst_94 = arith.constant 5.000000e-01 : f32
    %288 = vector.broadcast %cst_94 : f32 to vector<8x128xf32>
    %289 = arith.mulf %288, %287 : vector<8x128xf32>
    %cst_95 = arith.constant 5.000000e-01 : f32
    %290 = vector.broadcast %cst_95 : f32 to vector<8x128xf32>
    %291 = arith.addf %289, %290 : vector<8x128xf32>
    %292 = arith.mulf %281, %215 : vector<8x128xf32>
    %293 = arith.mulf %273, %283 : vector<8x128xf32>
    %294 = arith.addf %292, %293 : vector<8x128xf32>
    %295 = math.tanh %294 : vector<8x128xf32>
    %296 = arith.mulf %291, %295 : vector<8x128xf32>
    %297 = vector.extract_strided_slice %265 {offsets = [0, 0], sizes = [8, 128], strides = [1, 1]} : vector<8x512xf32> to vector<8x128xf32>
    %cst_96 = arith.constant 5.000000e-01 : f32
    %298 = vector.broadcast %cst_96 : f32 to vector<8x128xf32>
    %299 = arith.mulf %298, %297 : vector<8x128xf32>
    %300 = math.tanh %299 : vector<8x128xf32>
    %cst_97 = arith.constant 5.000000e-01 : f32
    %301 = vector.broadcast %cst_97 : f32 to vector<8x128xf32>
    %302 = arith.mulf %301, %300 : vector<8x128xf32>
    %cst_98 = arith.constant 5.000000e-01 : f32
    %303 = vector.broadcast %cst_98 : f32 to vector<8x128xf32>
    %304 = arith.addf %302, %303 : vector<8x128xf32>
    %305 = vector.extract_strided_slice %265 {offsets = [0, 128], sizes = [8, 128], strides = [1, 1]} : vector<8x512xf32> to vector<8x128xf32>
    %cst_99 = arith.constant 5.000000e-01 : f32
    %306 = vector.broadcast %cst_99 : f32 to vector<8x128xf32>
    %307 = arith.mulf %306, %305 : vector<8x128xf32>
    %308 = math.tanh %307 : vector<8x128xf32>
    %cst_100 = arith.constant 5.000000e-01 : f32
    %309 = vector.broadcast %cst_100 : f32 to vector<8x128xf32>
    %310 = arith.mulf %309, %308 : vector<8x128xf32>
    %cst_101 = arith.constant 5.000000e-01 : f32
    %311 = vector.broadcast %cst_101 : f32 to vector<8x128xf32>
    %312 = arith.addf %310, %311 : vector<8x128xf32>
    %313 = vector.extract_strided_slice %265 {offsets = [0, 256], sizes = [8, 128], strides = [1, 1]} : vector<8x512xf32> to vector<8x128xf32>
    %314 = math.tanh %313 : vector<8x128xf32>
    %315 = vector.extract_strided_slice %265 {offsets = [0, 384], sizes = [8, 128], strides = [1, 1]} : vector<8x512xf32> to vector<8x128xf32>
    %cst_102 = arith.constant 5.000000e-01 : f32
    %316 = vector.broadcast %cst_102 : f32 to vector<8x128xf32>
    %317 = arith.mulf %316, %315 : vector<8x128xf32>
    %318 = math.tanh %317 : vector<8x128xf32>
    %cst_103 = arith.constant 5.000000e-01 : f32
    %319 = vector.broadcast %cst_103 : f32 to vector<8x128xf32>
    %320 = arith.mulf %319, %318 : vector<8x128xf32>
    %cst_104 = arith.constant 5.000000e-01 : f32
    %321 = vector.broadcast %cst_104 : f32 to vector<8x128xf32>
    %322 = arith.addf %320, %321 : vector<8x128xf32>
    %323 = arith.mulf %312, %246 : vector<8x128xf32>
    %324 = arith.mulf %304, %314 : vector<8x128xf32>
    %325 = arith.addf %323, %324 : vector<8x128xf32>
    %326 = math.tanh %325 : vector<8x128xf32>
    %327 = arith.mulf %322, %326 : vector<8x128xf32>
    %c4_i32 = arith.constant 4 : i32
    %c8_i32_105 = arith.constant 8 : i32
    %328 = arith.muli %c4_i32, %c8_i32_105 : i32
    %329 = tpu.assume_multiple %328, 8 : i32
    %c7_i32_106 = arith.constant 7 : i32
    %330 = arith.subi %c7_i32_106, %c4_i32 : i32
    %c8_i32_107 = arith.constant 8 : i32
    %331 = arith.muli %330, %c8_i32_107 : i32
    %332 = tpu.assume_multiple %331, 8 : i32
    %333 = arith.index_cast %329 : i32 to index
    %c0_108 = arith.constant 0 : index
    %334 = vector.load %arg8[%333, %c0_108] : memref<64x1024xf32, #tpu.memory_space<vmem>>, vector<8x512xf32>
    %335 = arith.index_cast %332 : i32 to index
    %c512_109 = arith.constant 512 : index
    %336 = vector.load %arg8[%335, %c512_109] : memref<64x1024xf32, #tpu.memory_space<vmem>>, vector<8x512xf32>
    %337 = arith.truncf %296 : vector<8x128xf32> to vector<8x128xbf16>
    %338 = vector.extract_strided_slice %10 {offsets = [0, 0], sizes = [128, 512], strides = [1, 1]} : vector<256x512xbf16> to vector<128x512xbf16>
    %cst_110 = arith.constant dense<0.000000e+00> : vector<8x512xf32>
    %339 = tpu.matmul %337, %338, %cst_110 {dimension_numbers = #tpu.dot_dimension_numbers<[1], [0], [0], [1], [0, 0, 1, 1], [], []>} : vector<8x128xbf16>, vector<128x512xbf16>, vector<8x512xf32> -> vector<8x512xf32>
    %340 = arith.addf %334, %339 : vector<8x512xf32>
    %341 = arith.truncf %327 : vector<8x128xf32> to vector<8x128xbf16>
    %342 = vector.extract_strided_slice %10 {offsets = [128, 0], sizes = [128, 512], strides = [1, 1]} : vector<256x512xbf16> to vector<128x512xbf16>
    %cst_111 = arith.constant dense<0.000000e+00> : vector<8x512xf32>
    %343 = tpu.matmul %341, %342, %cst_111 {dimension_numbers = #tpu.dot_dimension_numbers<[1], [0], [0], [1], [0, 0, 1, 1], [], []>} : vector<8x128xbf16>, vector<128x512xbf16>, vector<8x512xf32> -> vector<8x512xf32>
    %344 = arith.addf %336, %343 : vector<8x512xf32>
    %345 = vector.extract_strided_slice %340 {offsets = [0, 0], sizes = [8, 128], strides = [1, 1]} : vector<8x512xf32> to vector<8x128xf32>
    %cst_112 = arith.constant 5.000000e-01 : f32
    %346 = vector.broadcast %cst_112 : f32 to vector<8x128xf32>
    %347 = arith.mulf %346, %345 : vector<8x128xf32>
    %348 = math.tanh %347 : vector<8x128xf32>
    %cst_113 = arith.constant 5.000000e-01 : f32
    %349 = vector.broadcast %cst_113 : f32 to vector<8x128xf32>
    %350 = arith.mulf %349, %348 : vector<8x128xf32>
    %cst_114 = arith.constant 5.000000e-01 : f32
    %351 = vector.broadcast %cst_114 : f32 to vector<8x128xf32>
    %352 = arith.addf %350, %351 : vector<8x128xf32>
    %353 = vector.extract_strided_slice %340 {offsets = [0, 128], sizes = [8, 128], strides = [1, 1]} : vector<8x512xf32> to vector<8x128xf32>
    %cst_115 = arith.constant 5.000000e-01 : f32
    %354 = vector.broadcast %cst_115 : f32 to vector<8x128xf32>
    %355 = arith.mulf %354, %353 : vector<8x128xf32>
    %356 = math.tanh %355 : vector<8x128xf32>
    %cst_116 = arith.constant 5.000000e-01 : f32
    %357 = vector.broadcast %cst_116 : f32 to vector<8x128xf32>
    %358 = arith.mulf %357, %356 : vector<8x128xf32>
    %cst_117 = arith.constant 5.000000e-01 : f32
    %359 = vector.broadcast %cst_117 : f32 to vector<8x128xf32>
    %360 = arith.addf %358, %359 : vector<8x128xf32>
    %361 = vector.extract_strided_slice %340 {offsets = [0, 256], sizes = [8, 128], strides = [1, 1]} : vector<8x512xf32> to vector<8x128xf32>
    %362 = math.tanh %361 : vector<8x128xf32>
    %363 = vector.extract_strided_slice %340 {offsets = [0, 384], sizes = [8, 128], strides = [1, 1]} : vector<8x512xf32> to vector<8x128xf32>
    %cst_118 = arith.constant 5.000000e-01 : f32
    %364 = vector.broadcast %cst_118 : f32 to vector<8x128xf32>
    %365 = arith.mulf %364, %363 : vector<8x128xf32>
    %366 = math.tanh %365 : vector<8x128xf32>
    %cst_119 = arith.constant 5.000000e-01 : f32
    %367 = vector.broadcast %cst_119 : f32 to vector<8x128xf32>
    %368 = arith.mulf %367, %366 : vector<8x128xf32>
    %cst_120 = arith.constant 5.000000e-01 : f32
    %369 = vector.broadcast %cst_120 : f32 to vector<8x128xf32>
    %370 = arith.addf %368, %369 : vector<8x128xf32>
    %371 = arith.mulf %360, %294 : vector<8x128xf32>
    %372 = arith.mulf %352, %362 : vector<8x128xf32>
    %373 = arith.addf %371, %372 : vector<8x128xf32>
    %374 = math.tanh %373 : vector<8x128xf32>
    %375 = arith.mulf %370, %374 : vector<8x128xf32>
    %376 = vector.extract_strided_slice %344 {offsets = [0, 0], sizes = [8, 128], strides = [1, 1]} : vector<8x512xf32> to vector<8x128xf32>
    %cst_121 = arith.constant 5.000000e-01 : f32
    %377 = vector.broadcast %cst_121 : f32 to vector<8x128xf32>
    %378 = arith.mulf %377, %376 : vector<8x128xf32>
    %379 = math.tanh %378 : vector<8x128xf32>
    %cst_122 = arith.constant 5.000000e-01 : f32
    %380 = vector.broadcast %cst_122 : f32 to vector<8x128xf32>
    %381 = arith.mulf %380, %379 : vector<8x128xf32>
    %cst_123 = arith.constant 5.000000e-01 : f32
    %382 = vector.broadcast %cst_123 : f32 to vector<8x128xf32>
    %383 = arith.addf %381, %382 : vector<8x128xf32>
    %384 = vector.extract_strided_slice %344 {offsets = [0, 128], sizes = [8, 128], strides = [1, 1]} : vector<8x512xf32> to vector<8x128xf32>
    %cst_124 = arith.constant 5.000000e-01 : f32
    %385 = vector.broadcast %cst_124 : f32 to vector<8x128xf32>
    %386 = arith.mulf %385, %384 : vector<8x128xf32>
    %387 = math.tanh %386 : vector<8x128xf32>
    %cst_125 = arith.constant 5.000000e-01 : f32
    %388 = vector.broadcast %cst_125 : f32 to vector<8x128xf32>
    %389 = arith.mulf %388, %387 : vector<8x128xf32>
    %cst_126 = arith.constant 5.000000e-01 : f32
    %390 = vector.broadcast %cst_126 : f32 to vector<8x128xf32>
    %391 = arith.addf %389, %390 : vector<8x128xf32>
    %392 = vector.extract_strided_slice %344 {offsets = [0, 256], sizes = [8, 128], strides = [1, 1]} : vector<8x512xf32> to vector<8x128xf32>
    %393 = math.tanh %392 : vector<8x128xf32>
    %394 = vector.extract_strided_slice %344 {offsets = [0, 384], sizes = [8, 128], strides = [1, 1]} : vector<8x512xf32> to vector<8x128xf32>
    %cst_127 = arith.constant 5.000000e-01 : f32
    %395 = vector.broadcast %cst_127 : f32 to vector<8x128xf32>
    %396 = arith.mulf %395, %394 : vector<8x128xf32>
    %397 = math.tanh %396 : vector<8x128xf32>
    %cst_128 = arith.constant 5.000000e-01 : f32
    %398 = vector.broadcast %cst_128 : f32 to vector<8x128xf32>
    %399 = arith.mulf %398, %397 : vector<8x128xf32>
    %cst_129 = arith.constant 5.000000e-01 : f32
    %400 = vector.broadcast %cst_129 : f32 to vector<8x128xf32>
    %401 = arith.addf %399, %400 : vector<8x128xf32>
    %402 = arith.mulf %391, %325 : vector<8x128xf32>
    %403 = arith.mulf %383, %393 : vector<8x128xf32>
    %404 = arith.addf %402, %403 : vector<8x128xf32>
    %405 = math.tanh %404 : vector<8x128xf32>
    %406 = arith.mulf %401, %405 : vector<8x128xf32>
    %c5_i32 = arith.constant 5 : i32
    %c8_i32_130 = arith.constant 8 : i32
    %407 = arith.muli %c5_i32, %c8_i32_130 : i32
    %408 = tpu.assume_multiple %407, 8 : i32
    %c7_i32_131 = arith.constant 7 : i32
    %409 = arith.subi %c7_i32_131, %c5_i32 : i32
    %c8_i32_132 = arith.constant 8 : i32
    %410 = arith.muli %409, %c8_i32_132 : i32
    %411 = tpu.assume_multiple %410, 8 : i32
    %412 = arith.index_cast %408 : i32 to index
    %c0_133 = arith.constant 0 : index
    %413 = vector.load %arg8[%412, %c0_133] : memref<64x1024xf32, #tpu.memory_space<vmem>>, vector<8x512xf32>
    %414 = arith.index_cast %411 : i32 to index
    %c512_134 = arith.constant 512 : index
    %415 = vector.load %arg8[%414, %c512_134] : memref<64x1024xf32, #tpu.memory_space<vmem>>, vector<8x512xf32>
    %416 = arith.truncf %375 : vector<8x128xf32> to vector<8x128xbf16>
    %417 = vector.extract_strided_slice %10 {offsets = [0, 0], sizes = [128, 512], strides = [1, 1]} : vector<256x512xbf16> to vector<128x512xbf16>
    %cst_135 = arith.constant dense<0.000000e+00> : vector<8x512xf32>
    %418 = tpu.matmul %416, %417, %cst_135 {dimension_numbers = #tpu.dot_dimension_numbers<[1], [0], [0], [1], [0, 0, 1, 1], [], []>} : vector<8x128xbf16>, vector<128x512xbf16>, vector<8x512xf32> -> vector<8x512xf32>
    %419 = arith.addf %413, %418 : vector<8x512xf32>
    %420 = arith.truncf %406 : vector<8x128xf32> to vector<8x128xbf16>
    %421 = vector.extract_strided_slice %10 {offsets = [128, 0], sizes = [128, 512], strides = [1, 1]} : vector<256x512xbf16> to vector<128x512xbf16>
    %cst_136 = arith.constant dense<0.000000e+00> : vector<8x512xf32>
    %422 = tpu.matmul %420, %421, %cst_136 {dimension_numbers = #tpu.dot_dimension_numbers<[1], [0], [0], [1], [0, 0, 1, 1], [], []>} : vector<8x128xbf16>, vector<128x512xbf16>, vector<8x512xf32> -> vector<8x512xf32>
    %423 = arith.addf %415, %422 : vector<8x512xf32>
    %424 = vector.extract_strided_slice %419 {offsets = [0, 0], sizes = [8, 128], strides = [1, 1]} : vector<8x512xf32> to vector<8x128xf32>
    %cst_137 = arith.constant 5.000000e-01 : f32
    %425 = vector.broadcast %cst_137 : f32 to vector<8x128xf32>
    %426 = arith.mulf %425, %424 : vector<8x128xf32>
    %427 = math.tanh %426 : vector<8x128xf32>
    %cst_138 = arith.constant 5.000000e-01 : f32
    %428 = vector.broadcast %cst_138 : f32 to vector<8x128xf32>
    %429 = arith.mulf %428, %427 : vector<8x128xf32>
    %cst_139 = arith.constant 5.000000e-01 : f32
    %430 = vector.broadcast %cst_139 : f32 to vector<8x128xf32>
    %431 = arith.addf %429, %430 : vector<8x128xf32>
    %432 = vector.extract_strided_slice %419 {offsets = [0, 128], sizes = [8, 128], strides = [1, 1]} : vector<8x512xf32> to vector<8x128xf32>
    %cst_140 = arith.constant 5.000000e-01 : f32
    %433 = vector.broadcast %cst_140 : f32 to vector<8x128xf32>
    %434 = arith.mulf %433, %432 : vector<8x128xf32>
    %435 = math.tanh %434 : vector<8x128xf32>
    %cst_141 = arith.constant 5.000000e-01 : f32
    %436 = vector.broadcast %cst_141 : f32 to vector<8x128xf32>
    %437 = arith.mulf %436, %435 : vector<8x128xf32>
    %cst_142 = arith.constant 5.000000e-01 : f32
    %438 = vector.broadcast %cst_142 : f32 to vector<8x128xf32>
    %439 = arith.addf %437, %438 : vector<8x128xf32>
    %440 = vector.extract_strided_slice %419 {offsets = [0, 256], sizes = [8, 128], strides = [1, 1]} : vector<8x512xf32> to vector<8x128xf32>
    %441 = math.tanh %440 : vector<8x128xf32>
    %442 = vector.extract_strided_slice %419 {offsets = [0, 384], sizes = [8, 128], strides = [1, 1]} : vector<8x512xf32> to vector<8x128xf32>
    %cst_143 = arith.constant 5.000000e-01 : f32
    %443 = vector.broadcast %cst_143 : f32 to vector<8x128xf32>
    %444 = arith.mulf %443, %442 : vector<8x128xf32>
    %445 = math.tanh %444 : vector<8x128xf32>
    %cst_144 = arith.constant 5.000000e-01 : f32
    %446 = vector.broadcast %cst_144 : f32 to vector<8x128xf32>
    %447 = arith.mulf %446, %445 : vector<8x128xf32>
    %cst_145 = arith.constant 5.000000e-01 : f32
    %448 = vector.broadcast %cst_145 : f32 to vector<8x128xf32>
    %449 = arith.addf %447, %448 : vector<8x128xf32>
    %450 = arith.mulf %439, %373 : vector<8x128xf32>
    %451 = arith.mulf %431, %441 : vector<8x128xf32>
    %452 = arith.addf %450, %451 : vector<8x128xf32>
    %453 = math.tanh %452 : vector<8x128xf32>
    %454 = arith.mulf %449, %453 : vector<8x128xf32>
    %455 = vector.extract_strided_slice %423 {offsets = [0, 0], sizes = [8, 128], strides = [1, 1]} : vector<8x512xf32> to vector<8x128xf32>
    %cst_146 = arith.constant 5.000000e-01 : f32
    %456 = vector.broadcast %cst_146 : f32 to vector<8x128xf32>
    %457 = arith.mulf %456, %455 : vector<8x128xf32>
    %458 = math.tanh %457 : vector<8x128xf32>
    %cst_147 = arith.constant 5.000000e-01 : f32
    %459 = vector.broadcast %cst_147 : f32 to vector<8x128xf32>
    %460 = arith.mulf %459, %458 : vector<8x128xf32>
    %cst_148 = arith.constant 5.000000e-01 : f32
    %461 = vector.broadcast %cst_148 : f32 to vector<8x128xf32>
    %462 = arith.addf %460, %461 : vector<8x128xf32>
    %463 = vector.extract_strided_slice %423 {offsets = [0, 128], sizes = [8, 128], strides = [1, 1]} : vector<8x512xf32> to vector<8x128xf32>
    %cst_149 = arith.constant 5.000000e-01 : f32
    %464 = vector.broadcast %cst_149 : f32 to vector<8x128xf32>
    %465 = arith.mulf %464, %463 : vector<8x128xf32>
    %466 = math.tanh %465 : vector<8x128xf32>
    %cst_150 = arith.constant 5.000000e-01 : f32
    %467 = vector.broadcast %cst_150 : f32 to vector<8x128xf32>
    %468 = arith.mulf %467, %466 : vector<8x128xf32>
    %cst_151 = arith.constant 5.000000e-01 : f32
    %469 = vector.broadcast %cst_151 : f32 to vector<8x128xf32>
    %470 = arith.addf %468, %469 : vector<8x128xf32>
    %471 = vector.extract_strided_slice %423 {offsets = [0, 256], sizes = [8, 128], strides = [1, 1]} : vector<8x512xf32> to vector<8x128xf32>
    %472 = math.tanh %471 : vector<8x128xf32>
    %473 = vector.extract_strided_slice %423 {offsets = [0, 384], sizes = [8, 128], strides = [1, 1]} : vector<8x512xf32> to vector<8x128xf32>
    %cst_152 = arith.constant 5.000000e-01 : f32
    %474 = vector.broadcast %cst_152 : f32 to vector<8x128xf32>
    %475 = arith.mulf %474, %473 : vector<8x128xf32>
    %476 = math.tanh %475 : vector<8x128xf32>
    %cst_153 = arith.constant 5.000000e-01 : f32
    %477 = vector.broadcast %cst_153 : f32 to vector<8x128xf32>
    %478 = arith.mulf %477, %476 : vector<8x128xf32>
    %cst_154 = arith.constant 5.000000e-01 : f32
    %479 = vector.broadcast %cst_154 : f32 to vector<8x128xf32>
    %480 = arith.addf %478, %479 : vector<8x128xf32>
    %481 = arith.mulf %470, %404 : vector<8x128xf32>
    %482 = arith.mulf %462, %472 : vector<8x128xf32>
    %483 = arith.addf %481, %482 : vector<8x128xf32>
    %484 = math.tanh %483 : vector<8x128xf32>
    %485 = arith.mulf %480, %484 : vector<8x128xf32>
    %c6_i32 = arith.constant 6 : i32
    %c8_i32_155 = arith.constant 8 : i32
    %486 = arith.muli %c6_i32, %c8_i32_155 : i32
    %487 = tpu.assume_multiple %486, 8 : i32
    %c7_i32_156 = arith.constant 7 : i32
    %488 = arith.subi %c7_i32_156, %c6_i32 : i32
    %c8_i32_157 = arith.constant 8 : i32
    %489 = arith.muli %488, %c8_i32_157 : i32
    %490 = tpu.assume_multiple %489, 8 : i32
    %491 = arith.index_cast %487 : i32 to index
    %c0_158 = arith.constant 0 : index
    %492 = vector.load %arg8[%491, %c0_158] : memref<64x1024xf32, #tpu.memory_space<vmem>>, vector<8x512xf32>
    %493 = arith.index_cast %490 : i32 to index
    %c512_159 = arith.constant 512 : index
    %494 = vector.load %arg8[%493, %c512_159] : memref<64x1024xf32, #tpu.memory_space<vmem>>, vector<8x512xf32>
    %495 = arith.truncf %454 : vector<8x128xf32> to vector<8x128xbf16>
    %496 = vector.extract_strided_slice %10 {offsets = [0, 0], sizes = [128, 512], strides = [1, 1]} : vector<256x512xbf16> to vector<128x512xbf16>
    %cst_160 = arith.constant dense<0.000000e+00> : vector<8x512xf32>
    %497 = tpu.matmul %495, %496, %cst_160 {dimension_numbers = #tpu.dot_dimension_numbers<[1], [0], [0], [1], [0, 0, 1, 1], [], []>} : vector<8x128xbf16>, vector<128x512xbf16>, vector<8x512xf32> -> vector<8x512xf32>
    %498 = arith.addf %492, %497 : vector<8x512xf32>
    %499 = arith.truncf %485 : vector<8x128xf32> to vector<8x128xbf16>
    %500 = vector.extract_strided_slice %10 {offsets = [128, 0], sizes = [128, 512], strides = [1, 1]} : vector<256x512xbf16> to vector<128x512xbf16>
    %cst_161 = arith.constant dense<0.000000e+00> : vector<8x512xf32>
    %501 = tpu.matmul %499, %500, %cst_161 {dimension_numbers = #tpu.dot_dimension_numbers<[1], [0], [0], [1], [0, 0, 1, 1], [], []>} : vector<8x128xbf16>, vector<128x512xbf16>, vector<8x512xf32> -> vector<8x512xf32>
    %502 = arith.addf %494, %501 : vector<8x512xf32>
    %503 = vector.extract_strided_slice %498 {offsets = [0, 0], sizes = [8, 128], strides = [1, 1]} : vector<8x512xf32> to vector<8x128xf32>
    %cst_162 = arith.constant 5.000000e-01 : f32
    %504 = vector.broadcast %cst_162 : f32 to vector<8x128xf32>
    %505 = arith.mulf %504, %503 : vector<8x128xf32>
    %506 = math.tanh %505 : vector<8x128xf32>
    %cst_163 = arith.constant 5.000000e-01 : f32
    %507 = vector.broadcast %cst_163 : f32 to vector<8x128xf32>
    %508 = arith.mulf %507, %506 : vector<8x128xf32>
    %cst_164 = arith.constant 5.000000e-01 : f32
    %509 = vector.broadcast %cst_164 : f32 to vector<8x128xf32>
    %510 = arith.addf %508, %509 : vector<8x128xf32>
    %511 = vector.extract_strided_slice %498 {offsets = [0, 128], sizes = [8, 128], strides = [1, 1]} : vector<8x512xf32> to vector<8x128xf32>
    %cst_165 = arith.constant 5.000000e-01 : f32
    %512 = vector.broadcast %cst_165 : f32 to vector<8x128xf32>
    %513 = arith.mulf %512, %511 : vector<8x128xf32>
    %514 = math.tanh %513 : vector<8x128xf32>
    %cst_166 = arith.constant 5.000000e-01 : f32
    %515 = vector.broadcast %cst_166 : f32 to vector<8x128xf32>
    %516 = arith.mulf %515, %514 : vector<8x128xf32>
    %cst_167 = arith.constant 5.000000e-01 : f32
    %517 = vector.broadcast %cst_167 : f32 to vector<8x128xf32>
    %518 = arith.addf %516, %517 : vector<8x128xf32>
    %519 = vector.extract_strided_slice %498 {offsets = [0, 256], sizes = [8, 128], strides = [1, 1]} : vector<8x512xf32> to vector<8x128xf32>
    %520 = math.tanh %519 : vector<8x128xf32>
    %521 = vector.extract_strided_slice %498 {offsets = [0, 384], sizes = [8, 128], strides = [1, 1]} : vector<8x512xf32> to vector<8x128xf32>
    %cst_168 = arith.constant 5.000000e-01 : f32
    %522 = vector.broadcast %cst_168 : f32 to vector<8x128xf32>
    %523 = arith.mulf %522, %521 : vector<8x128xf32>
    %524 = math.tanh %523 : vector<8x128xf32>
    %cst_169 = arith.constant 5.000000e-01 : f32
    %525 = vector.broadcast %cst_169 : f32 to vector<8x128xf32>
    %526 = arith.mulf %525, %524 : vector<8x128xf32>
    %cst_170 = arith.constant 5.000000e-01 : f32
    %527 = vector.broadcast %cst_170 : f32 to vector<8x128xf32>
    %528 = arith.addf %526, %527 : vector<8x128xf32>
    %529 = arith.mulf %518, %452 : vector<8x128xf32>
    %530 = arith.mulf %510, %520 : vector<8x128xf32>
    %531 = arith.addf %529, %530 : vector<8x128xf32>
    %532 = math.tanh %531 : vector<8x128xf32>
    %533 = arith.mulf %528, %532 : vector<8x128xf32>
    %534 = vector.extract_strided_slice %502 {offsets = [0, 0], sizes = [8, 128], strides = [1, 1]} : vector<8x512xf32> to vector<8x128xf32>
    %cst_171 = arith.constant 5.000000e-01 : f32
    %535 = vector.broadcast %cst_171 : f32 to vector<8x128xf32>
    %536 = arith.mulf %535, %534 : vector<8x128xf32>
    %537 = math.tanh %536 : vector<8x128xf32>
    %cst_172 = arith.constant 5.000000e-01 : f32
    %538 = vector.broadcast %cst_172 : f32 to vector<8x128xf32>
    %539 = arith.mulf %538, %537 : vector<8x128xf32>
    %cst_173 = arith.constant 5.000000e-01 : f32
    %540 = vector.broadcast %cst_173 : f32 to vector<8x128xf32>
    %541 = arith.addf %539, %540 : vector<8x128xf32>
    %542 = vector.extract_strided_slice %502 {offsets = [0, 128], sizes = [8, 128], strides = [1, 1]} : vector<8x512xf32> to vector<8x128xf32>
    %cst_174 = arith.constant 5.000000e-01 : f32
    %543 = vector.broadcast %cst_174 : f32 to vector<8x128xf32>
    %544 = arith.mulf %543, %542 : vector<8x128xf32>
    %545 = math.tanh %544 : vector<8x128xf32>
    %cst_175 = arith.constant 5.000000e-01 : f32
    %546 = vector.broadcast %cst_175 : f32 to vector<8x128xf32>
    %547 = arith.mulf %546, %545 : vector<8x128xf32>
    %cst_176 = arith.constant 5.000000e-01 : f32
    %548 = vector.broadcast %cst_176 : f32 to vector<8x128xf32>
    %549 = arith.addf %547, %548 : vector<8x128xf32>
    %550 = vector.extract_strided_slice %502 {offsets = [0, 256], sizes = [8, 128], strides = [1, 1]} : vector<8x512xf32> to vector<8x128xf32>
    %551 = math.tanh %550 : vector<8x128xf32>
    %552 = vector.extract_strided_slice %502 {offsets = [0, 384], sizes = [8, 128], strides = [1, 1]} : vector<8x512xf32> to vector<8x128xf32>
    %cst_177 = arith.constant 5.000000e-01 : f32
    %553 = vector.broadcast %cst_177 : f32 to vector<8x128xf32>
    %554 = arith.mulf %553, %552 : vector<8x128xf32>
    %555 = math.tanh %554 : vector<8x128xf32>
    %cst_178 = arith.constant 5.000000e-01 : f32
    %556 = vector.broadcast %cst_178 : f32 to vector<8x128xf32>
    %557 = arith.mulf %556, %555 : vector<8x128xf32>
    %cst_179 = arith.constant 5.000000e-01 : f32
    %558 = vector.broadcast %cst_179 : f32 to vector<8x128xf32>
    %559 = arith.addf %557, %558 : vector<8x128xf32>
    %560 = arith.mulf %549, %483 : vector<8x128xf32>
    %561 = arith.mulf %541, %551 : vector<8x128xf32>
    %562 = arith.addf %560, %561 : vector<8x128xf32>
    %563 = math.tanh %562 : vector<8x128xf32>
    %564 = arith.mulf %559, %563 : vector<8x128xf32>
    %c7_i32_180 = arith.constant 7 : i32
    %c8_i32_181 = arith.constant 8 : i32
    %565 = arith.muli %c7_i32_180, %c8_i32_181 : i32
    %566 = tpu.assume_multiple %565, 8 : i32
    %c7_i32_182 = arith.constant 7 : i32
    %567 = arith.subi %c7_i32_182, %c7_i32_180 : i32
    %c8_i32_183 = arith.constant 8 : i32
    %568 = arith.muli %567, %c8_i32_183 : i32
    %569 = tpu.assume_multiple %568, 8 : i32
    %570 = arith.index_cast %566 : i32 to index
    %c0_184 = arith.constant 0 : index
    %571 = vector.load %arg8[%570, %c0_184] : memref<64x1024xf32, #tpu.memory_space<vmem>>, vector<8x512xf32>
    %572 = arith.index_cast %569 : i32 to index
    %c512_185 = arith.constant 512 : index
    %573 = vector.load %arg8[%572, %c512_185] : memref<64x1024xf32, #tpu.memory_space<vmem>>, vector<8x512xf32>
    %574 = arith.truncf %533 : vector<8x128xf32> to vector<8x128xbf16>
    %575 = vector.extract_strided_slice %10 {offsets = [0, 0], sizes = [128, 512], strides = [1, 1]} : vector<256x512xbf16> to vector<128x512xbf16>
    %cst_186 = arith.constant dense<0.000000e+00> : vector<8x512xf32>
    %576 = tpu.matmul %574, %575, %cst_186 {dimension_numbers = #tpu.dot_dimension_numbers<[1], [0], [0], [1], [0, 0, 1, 1], [], []>} : vector<8x128xbf16>, vector<128x512xbf16>, vector<8x512xf32> -> vector<8x512xf32>
    %577 = arith.addf %571, %576 : vector<8x512xf32>
    %578 = arith.truncf %564 : vector<8x128xf32> to vector<8x128xbf16>
    %579 = vector.extract_strided_slice %10 {offsets = [128, 0], sizes = [128, 512], strides = [1, 1]} : vector<256x512xbf16> to vector<128x512xbf16>
    %cst_187 = arith.constant dense<0.000000e+00> : vector<8x512xf32>
    %580 = tpu.matmul %578, %579, %cst_187 {dimension_numbers = #tpu.dot_dimension_numbers<[1], [0], [0], [1], [0, 0, 1, 1], [], []>} : vector<8x128xbf16>, vector<128x512xbf16>, vector<8x512xf32> -> vector<8x512xf32>
    %581 = arith.addf %573, %580 : vector<8x512xf32>
    %582 = vector.extract_strided_slice %577 {offsets = [0, 0], sizes = [8, 128], strides = [1, 1]} : vector<8x512xf32> to vector<8x128xf32>
    %cst_188 = arith.constant 5.000000e-01 : f32
    %583 = vector.broadcast %cst_188 : f32 to vector<8x128xf32>
    %584 = arith.mulf %583, %582 : vector<8x128xf32>
    %585 = math.tanh %584 : vector<8x128xf32>
    %cst_189 = arith.constant 5.000000e-01 : f32
    %586 = vector.broadcast %cst_189 : f32 to vector<8x128xf32>
    %587 = arith.mulf %586, %585 : vector<8x128xf32>
    %cst_190 = arith.constant 5.000000e-01 : f32
    %588 = vector.broadcast %cst_190 : f32 to vector<8x128xf32>
    %589 = arith.addf %587, %588 : vector<8x128xf32>
    %590 = vector.extract_strided_slice %577 {offsets = [0, 128], sizes = [8, 128], strides = [1, 1]} : vector<8x512xf32> to vector<8x128xf32>
    %cst_191 = arith.constant 5.000000e-01 : f32
    %591 = vector.broadcast %cst_191 : f32 to vector<8x128xf32>
    %592 = arith.mulf %591, %590 : vector<8x128xf32>
    %593 = math.tanh %592 : vector<8x128xf32>
    %cst_192 = arith.constant 5.000000e-01 : f32
    %594 = vector.broadcast %cst_192 : f32 to vector<8x128xf32>
    %595 = arith.mulf %594, %593 : vector<8x128xf32>
    %cst_193 = arith.constant 5.000000e-01 : f32
    %596 = vector.broadcast %cst_193 : f32 to vector<8x128xf32>
    %597 = arith.addf %595, %596 : vector<8x128xf32>
    %598 = vector.extract_strided_slice %577 {offsets = [0, 256], sizes = [8, 128], strides = [1, 1]} : vector<8x512xf32> to vector<8x128xf32>
    %599 = math.tanh %598 : vector<8x128xf32>
    %600 = vector.extract_strided_slice %577 {offsets = [0, 384], sizes = [8, 128], strides = [1, 1]} : vector<8x512xf32> to vector<8x128xf32>
    %cst_194 = arith.constant 5.000000e-01 : f32
    %601 = vector.broadcast %cst_194 : f32 to vector<8x128xf32>
    %602 = arith.mulf %601, %600 : vector<8x128xf32>
    %603 = math.tanh %602 : vector<8x128xf32>
    %cst_195 = arith.constant 5.000000e-01 : f32
    %604 = vector.broadcast %cst_195 : f32 to vector<8x128xf32>
    %605 = arith.mulf %604, %603 : vector<8x128xf32>
    %cst_196 = arith.constant 5.000000e-01 : f32
    %606 = vector.broadcast %cst_196 : f32 to vector<8x128xf32>
    %607 = arith.addf %605, %606 : vector<8x128xf32>
    %608 = arith.mulf %597, %531 : vector<8x128xf32>
    %609 = arith.mulf %589, %599 : vector<8x128xf32>
    %610 = arith.addf %608, %609 : vector<8x128xf32>
    %611 = math.tanh %610 : vector<8x128xf32>
    %612 = arith.mulf %607, %611 : vector<8x128xf32>
    %613 = vector.extract_strided_slice %581 {offsets = [0, 0], sizes = [8, 128], strides = [1, 1]} : vector<8x512xf32> to vector<8x128xf32>
    %cst_197 = arith.constant 5.000000e-01 : f32
    %614 = vector.broadcast %cst_197 : f32 to vector<8x128xf32>
    %615 = arith.mulf %614, %613 : vector<8x128xf32>
    %616 = math.tanh %615 : vector<8x128xf32>
    %cst_198 = arith.constant 5.000000e-01 : f32
    %617 = vector.broadcast %cst_198 : f32 to vector<8x128xf32>
    %618 = arith.mulf %617, %616 : vector<8x128xf32>
    %cst_199 = arith.constant 5.000000e-01 : f32
    %619 = vector.broadcast %cst_199 : f32 to vector<8x128xf32>
    %620 = arith.addf %618, %619 : vector<8x128xf32>
    %621 = vector.extract_strided_slice %581 {offsets = [0, 128], sizes = [8, 128], strides = [1, 1]} : vector<8x512xf32> to vector<8x128xf32>
    %cst_200 = arith.constant 5.000000e-01 : f32
    %622 = vector.broadcast %cst_200 : f32 to vector<8x128xf32>
    %623 = arith.mulf %622, %621 : vector<8x128xf32>
    %624 = math.tanh %623 : vector<8x128xf32>
    %cst_201 = arith.constant 5.000000e-01 : f32
    %625 = vector.broadcast %cst_201 : f32 to vector<8x128xf32>
    %626 = arith.mulf %625, %624 : vector<8x128xf32>
    %cst_202 = arith.constant 5.000000e-01 : f32
    %627 = vector.broadcast %cst_202 : f32 to vector<8x128xf32>
    %628 = arith.addf %626, %627 : vector<8x128xf32>
    %629 = vector.extract_strided_slice %581 {offsets = [0, 256], sizes = [8, 128], strides = [1, 1]} : vector<8x512xf32> to vector<8x128xf32>
    %630 = math.tanh %629 : vector<8x128xf32>
    %631 = vector.extract_strided_slice %581 {offsets = [0, 384], sizes = [8, 128], strides = [1, 1]} : vector<8x512xf32> to vector<8x128xf32>
    %cst_203 = arith.constant 5.000000e-01 : f32
    %632 = vector.broadcast %cst_203 : f32 to vector<8x128xf32>
    %633 = arith.mulf %632, %631 : vector<8x128xf32>
    %634 = math.tanh %633 : vector<8x128xf32>
    %cst_204 = arith.constant 5.000000e-01 : f32
    %635 = vector.broadcast %cst_204 : f32 to vector<8x128xf32>
    %636 = arith.mulf %635, %634 : vector<8x128xf32>
    %cst_205 = arith.constant 5.000000e-01 : f32
    %637 = vector.broadcast %cst_205 : f32 to vector<8x128xf32>
    %638 = arith.addf %636, %637 : vector<8x128xf32>
    %639 = arith.mulf %628, %562 : vector<8x128xf32>
    %640 = arith.mulf %620, %630 : vector<8x128xf32>
    %641 = arith.addf %639, %640 : vector<8x128xf32>
    %642 = math.tanh %641 : vector<8x128xf32>
    %643 = arith.mulf %638, %642 : vector<8x128xf32>
    %c8_i32_206 = arith.constant 8 : i32
    %644 = tpu.concatenate %612, %643 in 1 : vector<8x128xf32>, vector<8x128xf32> -> vector<8x256xf32>
    %645 = arith.truncf %644 : vector<8x256xf32> to vector<8x256xbf16>
    %c0_207 = arith.constant 0 : index
    %c0_208 = arith.constant 0 : index
    %646 = vector.load %arg3[%c0_207, %c0_208] : memref<256x128xbf16, #tpu.memory_space<vmem>>, vector<256x128xbf16>
    %cst_209 = arith.constant dense<0.000000e+00> : vector<8x128xf32>
    %647 = tpu.matmul %645, %646, %cst_209 {dimension_numbers = #tpu.dot_dimension_numbers<[1], [0], [0], [1], [0, 0, 1, 1], [], []>} : vector<8x256xbf16>, vector<256x128xbf16>, vector<8x128xf32> -> vector<8x128xf32>
    %c0_210 = arith.constant 0 : index
    %c0_211 = arith.constant 0 : index
    %648 = vector.load %arg4[%c0_210, %c0_211] : memref<1x128xf32, #tpu.memory_space<vmem>>, vector<1x128xf32>
    %649 = vector.broadcast %648 : vector<1x128xf32> to vector<8x128xf32>
    %650 = arith.addf %647, %649 : vector<8x128xf32>
    %cst_212 = arith.constant 0.000000e+00 : f32
    %651 = vector.broadcast %cst_212 : f32 to vector<8x128xf32>
    %652 = arith.maximumf %650, %651 : vector<8x128xf32>
    %653 = arith.truncf %652 : vector<8x128xf32> to vector<8x128xbf16>
    %c0_213 = arith.constant 0 : index
    %c0_214 = arith.constant 0 : index
    %654 = vector.load %arg5[%c0_213, %c0_214] : memref<128x128xbf16, #tpu.memory_space<vmem>>, vector<128x128xbf16>
    %cst_215 = arith.constant dense<0.000000e+00> : vector<8x128xf32>
    %655 = tpu.matmul %653, %654, %cst_215 {dimension_numbers = #tpu.dot_dimension_numbers<[1], [0], [0], [1], [0, 0, 1, 1], [], []>} : vector<8x128xbf16>, vector<128x128xbf16>, vector<8x128xf32> -> vector<8x128xf32>
    %c0_216 = arith.constant 0 : index
    %c0_217 = arith.constant 0 : index
    %656 = vector.load %arg6[%c0_216, %c0_217] : memref<1x128xf32, #tpu.memory_space<vmem>>, vector<1x128xf32>
    %657 = vector.broadcast %656 : vector<1x128xf32> to vector<8x128xf32>
    %658 = arith.addf %655, %657 : vector<8x128xf32>
    %c0_218 = arith.constant 0 : index
    %c0_219 = arith.constant 0 : index
    %659 = vector.load %arg7[%c0_218, %c0_219] : memref<8x128xf32, #tpu.memory_space<vmem>>, vector<8x128xf32>
    tpu.vector_store %arg7[%c0_218, %c0_219], %658 {strides = array<i32>} : memref<8x128xf32, #tpu.memory_space<vmem>>, vector<8x128xf32>,
    return
  }
}

</mosaic_0001>

<bundles_post_ra>
// kernel: code_embedding_forward.1
= control target key start
LH: loop header
LB: loop body
LE: loop exit
PB: predicated region body
PF: predicated region fallthrough
CT: control target
= control target key end

     0   :  { %12 = vsyncpa [#allocation4], 0  ;;  %s4550_s0 = inlined_call_operand.vmem [shape: s32[64,1], index: 0, kind: input, shape index: {}]   ;;  %s4551_s1 = inlined_call_operand.hbm [shape: bf16[64,1024], index: 1, kind: input, shape index: {}]   ;;  %s4552_s2 = inlined_call_operand.hbm [shape: bf16[256,512], index: 2, kind: input, shape index: {}]   ;;  %s4553_s3 = inlined_call_operand.hbm [shape: bf16[256,128], index: 3, kind: input, shape index: {}]   ;;  %s4554_s4 = inlined_call_operand.vmem [shape: f32[1,128], index: 4, kind: input, shape index: {}]   ;;  %s4555_s5 = inlined_call_operand.vmem [shape: bf16[128,128], index: 5, kind: input, shape index: {}]   ;;  %s4556_s6 = inlined_call_operand.vmem [shape: f32[1,128], index: 6, kind: input, shape index: {}]   ;;  %s4557_s7 = inlined_call_operand.vmem [shape: f32[8,128], index: 7, kind: output, shape index: {}]  }
   0x1   :  { %13 = vsyncpa [#allocation6], 0  ;;  %s33_s26 = sshll.u32 %s4552_s2, 4  ;;  %s3456_s27 = smov [#allocation5]   ;;  %s34_s26 = int_to_ptr.hbm [resolvable:$true] %s33_s26 }
   0x2   :  { %s35_s28 = sshll.u32 %s3456_s27, 4  ;;  %s20_s8 = sshll.u32 %s4551_s1, 4  ;;  %s36_s28 = int_to_ptr.vmem [resolvable:$true] %s35_s28  ;;  %s21_s8 = int_to_ptr.hbm [resolvable:$true] %s20_s8 }
   0x3   :  { %s3457_s9 = smov 256   ;;  %s3458_s10 = smov 16  }
   0x4   :  { %41 = dma.hbm_to_vmem [thread:$0]  %s34_s26, 8192, %s36_s28, [#allocation6], %s3457_s9, %s3457_s9, %s3458_s10  }
   0x5   :  { %s3459_s11 = smov [#allocation3]   ;;  %s3460_s13 = smov 512  }
   0x6   :  { %s22_s12 = sshll.u32 %s3459_s11, 4  ;;  %s3461_s14 = smov 32   ;;  %s23_s12 = int_to_ptr.vmem [resolvable:$true] %s22_s12 }
   0x7   :  { %28 = dma.hbm_to_vmem [thread:$0]  %s21_s8, 4096, %s23_s12, [#allocation4], %s3460_s13, %s3460_s13, %s3461_s14  }
   0x8   :  { %s46_s16 = sshll.u32 %s4553_s3, 4  ;;  %s3462_s17 = smov [#allocation7]   ;;  %s47_s16 = int_to_ptr.hbm [resolvable:$true] %s46_s16 }
   0x9   :  { %s48_s18 = sshll.u32 %s3462_s17, 4  ;;  %s3463_s19 = smov 64   ;;  %s49_s18 = int_to_ptr.vmem [resolvable:$true] %s48_s18 }
   0xa   :  { %s3464_s1 = smov 4  }
   0xb   :  { %54 = dma.hbm_to_vmem [thread:$0]  %s47_s16, 2048, %s49_s18, [#allocation6], %s3463_s19, %s3463_s19, %s3464_s1  }
   0xc   :  { %3452 = dma.done.wait [#allocation4], 4096  }
   0xd   :  { %3453 = vsyncadd [#allocation4], 4294963200 }
   0xe   :  { %3454 = dma.done.wait [#allocation6], 10240  }
   0xf   :  { %3455 = vsyncadd [#allocation6], 4294957056  ;;  %v4558_v0 = vmov 0   ;;  %v76_v1 = vld [vmem:[%s4550_s0 + $0x10] sm:$0xff]  ;;  %v74_v2 = vld [vmem:[%s4550_s0] sm:$0xff]  ;;  %vm328_vm2 = vcmask 523264  }
  0x10   :  { %3216 = vset.pattern.permute.xlu1 %v4558_v0  ;;  %3215 = vset.pattern.permute.xlu0 %v4558_v0  ;;  %v78_v3 = vld [vmem:[%s4550_s0 + $0x20] sm:$0xff]  ;;  %v2678_v10 = vld [vmem:[#allocation3 + $0xc8] sm:$0xf]  ;;  %v3109_v12 = vld [vmem:[#allocation3 + $0xcc] sm:$0xf] }
  0x11   :  { %3217 = vset.pattern.permute.xlu2 %v4558_v0  ;;  %91 = vperm.xlu1 %3216, %v76_v1   ;;  %v2670_v4 = vld [vmem:[#allocation3 + $0xc0] sm:$0xf]  ;;  %v3108_v6 = vld [vmem:[#allocation3 + $0xc4] sm:$0xf]  ;;  %v3113_v11 = vld [vmem:[#allocation3 + $0xe4] sm:$0xf0] }
  0x12   :  { %85 = vperm.xlu0 %3215, %v74_v2   ;;  %97 = vperm.xlu2 %3217, %v78_v3   ;;  %v3112_v5 = vld [vmem:[#allocation3 + $0xdc] sm:$0xf0]  ;;  %v2672_v7 = vld [vmem:[#allocation3 + $0xe0] sm:$0xf0]  ;;  %v2679_v13 = vor.u32 %v3113_v11, %v2678_v10  ;;  %v2680_v14 = vld [vmem:[#allocation3 + $0xe8] sm:$0xf0] }
  0x13   :  { %v2671_v8 = vor.u32 %v3112_v5, %v2670_v4  ;;  %v2675_v9 = vor.u32 %v3108_v6, %v2672_v7  ;;  %v77_v15 = vld [vmem:[%s4550_s0 + $0x18] sm:$0xff]  ;;  %v75_v16 = vld [vmem:[%s4550_s0 + $0x8] sm:$0xff]  ;;  %v2683_v17 = vor.u32 %v3109_v12, %v2680_v14  ;;  %v80_v20 = vld [vmem:[%s4550_s0 + $0x30] sm:$0xff] }
  0x14   :  { %403 = vmatpush.bf16.msra.mxu2 %v2679_v13  ;;  %v79_v18 = vld [vmem:[%s4550_s0 + $0x28] sm:$0xff]  ;;  %v81_v19 = vld [vmem:[%s4550_s0 + $0x38] sm:$0xff]  ;;  %v2638_v21 = vld [vmem:[#allocation3 + $0x80] sm:$0xf] }
  0x15   :  { %345 = vmatpush.bf16.msra.mxu0 %v2671_v8  ;;  %374 = vmatpush.bf16.msra.mxu1 %v2675_v9  ;;  %v3104_v22 = vld [vmem:[#allocation3 + $0x9c] sm:$0xf0]  ;;  %v3100_v23 = vld [vmem:[#allocation3 + $0x84] sm:$0xf]  ;;  %v2646_v26 = vld [vmem:[#allocation3 + $0x88] sm:$0xf]  ;;  %v82_v9 = vlaneseq }
  0x16   :  { %432 = vmatpush.bf16.msra.mxu3 %v2683_v17  ;;  %v2639_v24 = vor.u32 %v3104_v22, %v2638_v21  ;;  %v2640_v25 = vld [vmem:[#allocation3 + $0xa0] sm:$0xf0]  ;;  %v3105_v27 = vld [vmem:[#allocation3 + $0xa4] sm:$0xf0]  ;;  %v3101_v30 = vld [vmem:[#allocation3 + $0x8c] sm:$0xf] }
  0x17   :  { %v2643_v28 = vor.u32 %v3100_v23, %v2640_v25  ;;  %v2647_v29 = vor.u32 %v3105_v27, %v2646_v26  ;;  %v2648_v31 = vld [vmem:[#allocation3 + $0xa8] sm:$0xf0]  ;;  %v2606_v33 = vld [vmem:[#allocation3 + $0x40] sm:$0xf]  ;;  %v3092_v35 = vld [vmem:[#allocation3 + $0x44] sm:$0xf] }
  0x18   :  { %v2651_v32 = vor.u32 %v3101_v30, %v2648_v31  ;;  %v3096_v34 = vld [vmem:[#allocation3 + $0x5c] sm:$0xf0]  ;;  %v2608_v37 = vld [vmem:[#allocation3 + $0x60] sm:$0xf0]  ;;  %v2614_v38 = vld [vmem:[#allocation3 + $0x48] sm:$0xf] }
  0x19   :  { %94 = vperm.xlu1 %3216, %v77_v15   ;;  %346 = vmatpush.bf16.msra.mxu0 %v2639_v24  ;;  %v2607_v36 = vor.u32 %v3096_v34, %v2606_v33  ;;  %v3097_v39 = vld [vmem:[#allocation3 + $0x64] sm:$0xf0]  ;;  %v2611_v40 = vor.u32 %v3092_v35, %v2608_v37  ;;  %v3093_v42 = vld [vmem:[#allocation3 + $0x4c] sm:$0xf]  ;;  %v2574_v45 = vld [vmem:[#allocation3] sm:$0xf] }
  0x1a   :  { %88 = vperm.xlu0 %3215, %v75_v16   ;;  %100 = vperm.xlu2 %3217, %v79_v18   ;;  %v2615_v41 = vor.u32 %v3097_v39, %v2614_v38  ;;  %v2616_v43 = vld [vmem:[#allocation3 + $0x68] sm:$0xf0]  ;;  %v3088_v46 = vld [vmem:[#allocation3 + $0x1c] sm:$0xf0]  ;;  %v3084_v47 = vld [vmem:[#allocation3 + $0x4] sm:$0xf] }
  0x1b   :  { %375 = vmatpush.bf16.msra.mxu1 %v2643_v28  ;;  %404 = vmatpush.bf16.msra.mxu2 %v2647_v29  ;;  %v2619_v44 = vor.u32 %v3093_v42, %v2616_v43  ;;  %v2575_v48 = vor.u32 %v3088_v46, %v2574_v45  ;;  %v2576_v49 = vld [vmem:[#allocation3 + $0x20] sm:$0xf0]  ;;  %v2582_v50 = vld [vmem:[#allocation3 + $0x8] sm:$0xf]  ;;  %v3085_v54 = vld [vmem:[#allocation3 + $0xc] sm:$0xf] }
  0x1c   :  { %433 = vmatpush.bf16.msra.mxu3 %v2651_v32  ;;  %v3089_v51 = vld [vmem:[#allocation3 + $0x24] sm:$0xf0]  ;;  %v2579_v52 = vor.u32 %v3084_v47, %v2576_v49  ;;  %v2584_v55 = vld [vmem:[#allocation3 + $0x28] sm:$0xf0]  ;;  %v2686_v57 = vld [vmem:[#allocation3 + $0xd0] sm:$0xf] }
  0x1d   :  { %347 = vmatpush.bf16.msra.mxu0 %v2607_v36  ;;  %v2583_v53 = vor.u32 %v3089_v51, %v2582_v50  ;;  %v2587_v56 = vor.u32 %v3085_v54, %v2584_v55  ;;  %v3114_v58 = vld [vmem:[#allocation3 + $0xec] sm:$0xf0]  ;;  %v3110_v59 = vld [vmem:[#allocation3 + $0xd4] sm:$0xf]  ;;  %v2694_v62 = vld [vmem:[#allocation3 + $0xd8] sm:$0xf] }
  0x1e   :  { %v2687_v60 = vor.u32 %v3114_v58, %v2686_v57  ;;  %v2688_v61 = vld [vmem:[#allocation3 + $0xf0] sm:$0xf0]  ;;  %v3115_v63 = vld [vmem:[#allocation3 + $0xf4] sm:$0xf0]  ;;  %v3111_v3 = vld [vmem:[#allocation3 + $0xdc] sm:$0xf] }
  0x1f   :  { %376 = vmatpush.bf16.msra.mxu1 %v2611_v40  ;;  %405 = vmatpush.bf16.msra.mxu2 %v2615_v41  ;;  %v2691_v1 = vor.u32 %v3110_v59, %v2688_v61  ;;  %v2695_v2 = vor.u32 %v3115_v63, %v2694_v62  ;;  %v2696_v4 = vld [vmem:[#allocation3 + $0xf8] sm:$0xf0]  ;;  %v2654_v6 = vld [vmem:[#allocation3 + $0x90] sm:$0xf]  ;;  %v3102_v8 = vld [vmem:[#allocation3 + $0x94] sm:$0xf] }
  0x20   :  { %434 = vmatpush.bf16.msra.mxu3 %v2619_v44  ;;  %v2699_v5 = vor.u32 %v3111_v3, %v2696_v4  ;;  %v3106_v7 = vld [vmem:[#allocation3 + $0xac] sm:$0xf0]  ;;  %v2656_v11 = vld [vmem:[#allocation3 + $0xb0] sm:$0xf0]  ;;  %v2662_v12 = vld [vmem:[#allocation3 + $0x98] sm:$0xf] }
  0x21   :  { %106 = vperm.xlu1 %3216, %v81_v19   ;;  %348 = vmatpush.bf16.msra.mxu0 %v2575_v48  ;;  %v2655_v10 = vor.u32 %v3106_v7, %v2654_v6  ;;  %v3107_v13 = vld [vmem:[#allocation3 + $0xb4] sm:$0xf0]  ;;  %v2659_v15 = vor.u32 %v3102_v8, %v2656_v11  ;;  %v3103_v17 = vld [vmem:[#allocation3 + $0x9c] sm:$0xf]  ;;  %v3466_v23 = vmov 0.0  }
  0x22   :  { %103 = vperm.xlu0 %3215, %v80_v20   ;;  %v2663_v16 = vor.u32 %v3107_v13, %v2662_v12  ;;  %v2664_v18 = vld [vmem:[#allocation3 + $0xb8] sm:$0xf0]  ;;  %v3543_v20 = vand.u32 127, %v82_v9  ;;  %v2622_v27 = vld [vmem:[#allocation3 + $0x50] sm:$0xf] }
  0x23   :  { %377 = vmatpush.bf16.msra.mxu1 %v2579_v52  ;;  %406 = vmatpush.bf16.msra.mxu2 %v2583_v53  ;;  %v2667_v19 = vor.u32 %v3103_v17, %v2664_v18  ;;  %v3098_v28 = vld [vmem:[#allocation3 + $0x6c] sm:$0xf0]  ;;  %v3094_v29 = vld [vmem:[#allocation3 + $0x54] sm:$0xf]  ;;  %v2630_v32 = vld [vmem:[#allocation3 + $0x58] sm:$0xf] }
  0x24   :  { %435 = vmatpush.bf16.msra.mxu3 %v2587_v56  ;;  %v2623_v30 = vor.u32 %v3098_v28, %v2622_v27  ;;  %v2624_v31 = vld [vmem:[#allocation3 + $0x70] sm:$0xf0]  ;;  %v3099_v33 = vld [vmem:[#allocation3 + $0x74] sm:$0xf0]  ;;  %v3095_v36 = vld [vmem:[#allocation3 + $0x5c] sm:$0xf] }
  0x25   :  { %461 = vmatpush.bf16.msrb.mxu0 %v2687_v60  ;;  %v2627_v34 = vor.u32 %v3094_v29, %v2624_v31  ;;  %v2631_v35 = vor.u32 %v3099_v33, %v2630_v32  ;;  %v2632_v37 = vld [vmem:[#allocation3 + $0x78] sm:$0xf0]  ;;  %v2590_v44 = vld [vmem:[#allocation3 + $0x10] sm:$0xf]  ;;  %v3086_v46 = vld [vmem:[#allocation3 + $0x14] sm:$0xf] }
  0x26   :  { %v2635_v38 = vor.u32 %v3095_v36, %v2632_v37  ;;  %v3090_v45 = vld [vmem:[#allocation3 + $0x2c] sm:$0xf0]  ;;  %v2592_v48 = vld [vmem:[#allocation3 + $0x30] sm:$0xf0]  ;;  %v2598_v49 = vld [vmem:[#allocation3 + $0x18] sm:$0xf] }
  0x27   :  { %490 = vmatpush.bf16.msrb.mxu1 %v2691_v1  ;;  %519 = vmatpush.bf16.msrb.mxu2 %v2695_v2  ;;  %v2591_v47 = vor.u32 %v3090_v45, %v2590_v44  ;;  %v3091_v50 = vld [vmem:[#allocation3 + $0x34] sm:$0xf0]  ;;  %v2595_v51 = vor.u32 %v3086_v46, %v2592_v48  ;;  %v3087_v53 = vld [vmem:[#allocation3 + $0x1c] sm:$0xf]  ;;  %v2846_v60 = vld [vmem:[#allocation5 + $0xe0] sm:$0xf] }
  0x28   :  { %548 = vmatpush.bf16.msrb.mxu3 %v2699_v5  ;;  %v2599_v52 = vor.u32 %v3091_v50, %v2598_v49  ;;  %v2600_v54 = vld [vmem:[#allocation3 + $0x38] sm:$0xf0]  ;;  %v3146_v61 = vld [vmem:[#allocation5 + $0xec] sm:$0xf0]  ;;  %v3144_v62 = vld [vmem:[#allocation5 + $0xe4] sm:$0xf] }
  0x29   :  { %462 = vmatpush.bf16.msrb.mxu0 %v2655_v10  ;;  %v2603_v55 = vor.u32 %v3087_v53, %v2600_v54  ;;  %v3587_v63 = vor.u32 %v3146_v61, %v2846_v60  ;;  %v2848_v1 = vld [vmem:[#allocation5 + $0xf0] sm:$0xf0]  ;;  %v2854_v2 = vld [vmem:[#allocation5 + $0xe8] sm:$0xf]  ;;  %v3147_v3 = vld [vmem:[#allocation5 + $0xf4] sm:$0xf0] }
  0x2a   :  { %v3589_v4 = vor.u32 %v3144_v62, %v2848_v1  ;;  %v3591_v5 = vor.u32 %v3147_v3, %v2854_v2  ;;  %v3145_v6 = vld [vmem:[#allocation5 + $0xec] sm:$0xf]  ;;  %v2856_v7 = vld [vmem:[#allocation5 + $0xf8] sm:$0xf0]  ;;  %v2830_v8 = vld [vmem:[#allocation5 + $0xc0] sm:$0xf] }
  0x2b   :  { %491 = vmatpush.bf16.msrb.mxu1 %v2659_v15  ;;  %520 = vmatpush.bf16.msrb.mxu2 %v2663_v16  ;;  %v3594_v9 = vor.u32 %v3145_v6, %v2856_v7  ;;  %v3142_v10 = vld [vmem:[#allocation5 + $0xcc] sm:$0xf0]  ;;  %v3140_v11 = vld [vmem:[#allocation5 + $0xc4] sm:$0xf]  ;;  %v2832_v12 = vld [vmem:[#allocation5 + $0xd0] sm:$0xf0] }
  0x2c   :  { %549 = vmatpush.bf16.msrb.mxu3 %v2667_v19  ;;  %v3598_v15 = vor.u32 %v3142_v10, %v2830_v8  ;;  %v3600_v16 = vor.u32 %v3140_v11, %v2832_v12  ;;  %v2838_v17 = vld [vmem:[#allocation5 + $0xc8] sm:$0xf]  ;;  %v3143_v18 = vld [vmem:[#allocation5 + $0xd4] sm:$0xf0]  ;;  %v3141_v19 = vld [vmem:[#allocation5 + $0xcc] sm:$0xf] }
  0x2d   :  { %463 = vmatpush.bf16.msrb.mxu0 %v2623_v30  ;;  %v3138_v29 = vld [vmem:[#allocation5 + $0xac] sm:$0xf0]  ;;  %v3136_v30 = vld [vmem:[#allocation5 + $0xa4] sm:$0xf]  ;;  %v2822_v32 = vld [vmem:[#allocation5 + $0xa8] sm:$0xf] }
  0x2e   :  { %v3139_v33 = vld [vmem:[#allocation5 + $0xb4] sm:$0xf0]  ;;  %v3137_v36 = vld [vmem:[#allocation5 + $0xac] sm:$0xf]  ;;  %v2824_v37 = vld [vmem:[#allocation5 + $0xb8] sm:$0xf0] }
  0x2f   :  { %492 = vmatpush.bf16.msrb.mxu1 %v2627_v34  ;;  %521 = vmatpush.bf16.msrb.mxu2 %v2631_v35  ;;  %v3629_v35 = vor.u32 %v3139_v33, %v2822_v32  ;;  %v2806_v46 = vld [vmem:[#allocation5 + $0x88] sm:$0xf]  ;;  %v3133_v48 = vld [vmem:[#allocation5 + $0x8c] sm:$0xf]  ;;  %v2808_v50 = vld [vmem:[#allocation5 + $0x98] sm:$0xf0] }
  0x30   :  { %550 = vmatpush.bf16.msrb.mxu3 %v2635_v38  ;;  %v2798_v38 = vld [vmem:[#allocation5 + $0x80] sm:$0xf]  ;;  %v3130_v53 = vld [vmem:[#allocation5 + $0x6c] sm:$0xf0]  ;;  %v3128_v54 = vld [vmem:[#allocation5 + $0x64] sm:$0xf] }
  0x31   :  { %464 = vmatpush.bf16.msrb.mxu0 %v2591_v47  ;;  %v3135_v47 = vld [vmem:[#allocation5 + $0x94] sm:$0xf0]  ;;  %v3129_v62 = vld [vmem:[#allocation5 + $0x6c] sm:$0xf]  ;;  %v2792_v1 = vld [vmem:[#allocation5 + $0x78] sm:$0xf0] }
  0x32   :  { %v3641_v49 = vor.u32 %v3135_v47, %v2806_v46  ;;  %v2766_v2 = vld [vmem:[#allocation5 + $0x40] sm:$0xf]  ;;  %v3664_v3 = vor.u32 %v3129_v62, %v2792_v1  ;;  %v3124_v6 = vld [vmem:[#allocation5 + $0x44] sm:$0xf]  ;;  %v2768_v7 = vld [vmem:[#allocation5 + $0x50] sm:$0xf0] }
  0x33   :  { %493 = vmatpush.bf16.msrb.mxu1 %v2595_v51  ;;  %522 = vmatpush.bf16.msrb.mxu2 %v2599_v52  ;;  %v3643_v51 = vor.u32 %v3133_v48, %v2808_v50  ;;  %v2782_v52 = vld [vmem:[#allocation5 + $0x60] sm:$0xf]  ;;  %v3670_v10 = vor.u32 %v3124_v6, %v2768_v7  ;;  %v2774_v11 = vld [vmem:[#allocation5 + $0x48] sm:$0xf]  ;;  %v3127_v12 = vld [vmem:[#allocation5 + $0x54] sm:$0xf0] }
  0x34   :  { %551 = vmatpush.bf16.msrb.mxu3 %v2603_v55  ;;  %v3657_v55 = vor.u32 %v3130_v53, %v2782_v52  ;;  %v2760_v32 = vld [vmem:[#allocation5 + $0x38] sm:$0xf0]  ;;  %v2736_v46 = vld [vmem:[#allocation5 + $0x10] sm:$0xf0]  ;;  %v2742_v47 = vld [vmem:[#allocation5 + $0x8] sm:$0xf] }
  0x35   :  { %v3119_v48 = vld [vmem:[#allocation5 + $0x14] sm:$0xf0]  ;;  %v3117_v53 = vld [vmem:[#allocation5 + $0xc] sm:$0xf]  ;;  %v3176_v62 = vld [vmem:[#allocation5 + $0x1e4] sm:$0xf] }
  0x36   :  { %v3701_v52 = vor.u32 %v3119_v48, %v2742_v47  ;;  %v2976_v1 = vld [vmem:[#allocation5 + $0x1f0] sm:$0xf0]  ;;  %v2982_v6 = vld [vmem:[#allocation5 + $0x1e8] sm:$0xf]  ;;  %v3179_v7 = vld [vmem:[#allocation5 + $0x1f4] sm:$0xf0] }
  0x37   :  { %v3170_v47 = vld [vmem:[#allocation5 + $0x1ac] sm:$0xf0]  ;;  %v3168_v48 = vld [vmem:[#allocation5 + $0x1a4] sm:$0xf]  ;;  %v3163_v0 = vld [vmem:[#allocation5 + $0x174] sm:$0xf0] }
  0x6c   :  { %v98_v42 = vpop.permute.xlu2 %97 }
  0x6d   :  { %vm112_vm5 = vcmp.eq.s32.totalorder %v3543_v20, %v98_v42  ;;  %v2800_v42 = vld [vmem:[#allocation5 + $0x90] sm:$0xf0] }
  0x6e   :  { %v2568_v57 = vsel %vm112_vm5, 1.0, %v3466_v23 }
  0x74   :  { %v101_v56 = vpop.permute.xlu2 %100 }
  0x75   :  { %vm113_vm6 = vcmp.eq.s32.totalorder %v3543_v20, %v101_v56  ;;  %v2784_v56 = vld [vmem:[#allocation5 + $0x70] sm:$0xf0] }
  0x76   :  { %v2569_v58 = vsel %vm113_vm6, 1.0, %v3466_v23  ;;  %v3659_v60 = vor.u32 %v3128_v54, %v2784_v56  ;;  %v2744_v54 = vld [vmem:[#allocation5 + $0x18] sm:$0xf0]  ;;  %v2974_v56 = vld [vmem:[#allocation5 + $0x1e0] sm:$0xf] }
  0x77   :  { %v3577_v59 = vpack.c.bf16 %v2569_v58, %v2568_v57  ;;  %v2790_v57 = vld [vmem:[#allocation5 + $0x68] sm:$0xf]  ;;  %v3131_v58 = vld [vmem:[#allocation5 + $0x74] sm:$0xf0] }
  0x78   :  { %v3661_v61 = vor.u32 %v3131_v58, %v2790_v57  ;;  %v3707_v57 = vor.u32 %v3117_v53, %v2744_v54  ;;  %v3178_v58 = vld [vmem:[#allocation5 + $0x1ec] sm:$0xf0]  ;;  %v2944_v53 = vld [vmem:[#allocation5 + $0x1b0] sm:$0xf0]  ;;  %v2950_v54 = vld [vmem:[#allocation5 + $0x1a8] sm:$0xf] }
  0x83   :  { %v92_v22 = vpop.permute.xlu1 %91 }
  0x84   :  { %v86_v14 = vpop.permute.xlu0 %85  ;;  %vm110_vm3 = vcmp.eq.s32.totalorder %v3543_v20, %v92_v22  ;;  %v2840_v22 = vld [vmem:[#allocation5 + $0xd8] sm:$0xf0] }
  0x85   :  { %vm108_vm0 = vcmp.eq.s32.totalorder %v3543_v20, %v86_v14  ;;  %v2566_v40 = vsel %vm110_vm3, 1.0, %v3466_v23 }
  0x86   :  { %v2564_v24 = vsel %vm108_vm0, 1.0, %v3466_v23 }
  0x8b   :  { %v95_v39 = vpop.permute.xlu1 %94 }
  0x8c   :  { %v89_v21 = vpop.permute.xlu0 %88  ;;  %vm111_vm4 = vcmp.eq.s32.totalorder %v3543_v20, %v95_v39  ;;  %v3632_v39 = vor.u32 %v3137_v36, %v2824_v37 }
  0x8d   :  { %vm109_vm1 = vcmp.eq.s32.totalorder %v3543_v20, %v89_v21  ;;  %v2567_v41 = vsel %vm111_vm4, 1.0, %v3466_v23  ;;  %v3603_v21 = vor.u32 %v3143_v18, %v2838_v17  ;;  %v2776_v17 = vld [vmem:[#allocation5 + $0x58] sm:$0xf0]  ;;  %v2750_v18 = vld [vmem:[#allocation5 + $0x20] sm:$0xf] }
  0x8e   :  { %v2565_v25 = vsel %vm109_vm1, 1.0, %v3466_v23  ;;  %v3563_v43 = vpack.c.bf16 %v2567_v41, %v2566_v40  ;;  %v3134_v40 = vld [vmem:[#allocation5 + $0x8c] sm:$0xf0]  ;;  %v3132_v41 = vld [vmem:[#allocation5 + $0x84] sm:$0xf] }
  0x8f   :  { %v3549_v26 = vpack.c.bf16 %v2565_v25, %v2564_v24  ;;  %v3605_v24 = vor.u32 %v3141_v19, %v2840_v22  ;;  %v3636_v44 = vor.u32 %v3134_v40, %v2798_v38  ;;  %v3638_v45 = vor.u32 %v3132_v41, %v2800_v42  ;;  %v3122_v19 = vld [vmem:[#allocation5 + $0x2c] sm:$0xf0]  ;;  %v2734_v38 = vld [vmem:[#allocation5] sm:$0xf]  ;;  %v3116_v41 = vld [vmem:[#allocation5 + $0x4] sm:$0xf] }
  0x90   :  { %v3118_v40 = vld [vmem:[#allocation5 + $0xc] sm:$0xf0]  ;;  %v3699_v50 = vor.u32 %v3116_v41, %v2736_v46  ;;  %v2942_v46 = vld [vmem:[#allocation5 + $0x1a0] sm:$0xf] }
  0x91   :  { %2700 = vmatmul.msk.bf16.vlgmr.msra.gmra.mxu0 %vm328_vm2, %v3549_v26  ;;  %2704 = vmatmul.msk.bf16.vlgmr.msra.gmra.mxu1 %vm328_vm2, %v3549_v26  ;;  %v3693_v42 = vor.u32 %v3118_v40, %v2734_v38  ;;  %v2968_v38 = vld [vmem:[#allocation5 + $0x1d8] sm:$0xf0] }
  0x92   :  { %2708 = vmatmul.msk.bf16.vlgmr.msra.gmra.mxu2 %vm328_vm2, %v3549_v26  ;;  %2712 = vmatmul.msk.bf16.vlgmr.msra.gmra.mxu3 %vm328_vm2, %v3549_v26 }
  0x93   :  { %875 = vmatpush.bf16.msra.mxu0 %v3587_v63  ;;  %v107_v13 = vpop.permute.xlu1 %106  ;;  %888 = vmatpush.bf16.msra.mxu1 %v3589_v4 }
  0x94   :  { %v104_v14 = vpop.permute.xlu0 %103  ;;  %901 = vmatpush.bf16.msra.mxu2 %v3591_v5  ;;  %914 = vmatpush.bf16.msra.mxu3 %v3594_v9  ;;  %vm115_vm7 = vcmp.eq.s32.totalorder %v3543_v20, %v107_v13  ;;  %v3125_v13 = vld [vmem:[#allocation5 + $0x4c] sm:$0xf] }
  0x95   :  { %vm114_vm8 = vcmp.eq.s32.totalorder %v3543_v20, %v104_v14  ;;  %v2571_v25 = vsel %vm115_vm7, 1.0, %v3466_v23  ;;  %v2814_v20 = vld [vmem:[#allocation5 + $0xa0] sm:$0xf]  ;;  %v3673_v14 = vor.u32 %v3127_v12, %v2774_v11  ;;  %v3675_v22 = vor.u32 %v3125_v13, %v2776_v17  ;;  %v3177_v11 = vld [vmem:[#allocation5 + $0x1ec] sm:$0xf] }
  0x96   :  { %v2570_v27 = vsel %vm114_vm8, 1.0, %v3466_v23  ;;  %v3625_v31 = vor.u32 %v3138_v29, %v2814_v20  ;;  %v2816_v23 = vld [vmem:[#allocation5 + $0xb0] sm:$0xf0]  ;;  %v2758_v20 = vld [vmem:[#allocation5 + $0x28] sm:$0xf]  ;;  %v3678_v29 = vor.u32 %v3122_v19, %v2750_v18 }
  0x97   :  { %876 = vmatpush.bf16.msra.mxu0 %v3598_v15  ;;  %889 = vmatpush.bf16.msra.mxu1 %v3600_v16  ;;  %v3615_v28 = vpack.c.bf16 %v2571_v25, %v2570_v27  ;;  %v3627_v34 = vor.u32 %v3136_v30, %v2816_v23  ;;  %v3120_v25 = vld [vmem:[#allocation5 + $0x24] sm:$0xf]  ;;  %v2752_v27 = vld [vmem:[#allocation5 + $0x30] sm:$0xf0]  ;;  %v3123_v30 = vld [vmem:[#allocation5 + $0x34] sm:$0xf0] }
  0x98   :  { %902 = vmatpush.bf16.msra.mxu2 %v3603_v21  ;;  %915 = vmatpush.bf16.msra.mxu3 %v3605_v24  ;;  %v3121_v23 = vld [vmem:[#allocation5 + $0x2c] sm:$0xf]  ;;  %v3682_v33 = vor.u32 %v3120_v25, %v2752_v27  ;;  %v3684_v36 = vor.u32 %v3123_v30, %v2758_v20  ;;  %v2984_v12 = vld [vmem:[#allocation5 + $0x1f8] sm:$0xf0]  ;;  %v2958_v13 = vld [vmem:[#allocation5 + $0x1c0] sm:$0xf] }
  0x99   :  { %v3687_v37 = vor.u32 %v3121_v23, %v2760_v32  ;;  %v3174_v17 = vld [vmem:[#allocation5 + $0x1cc] sm:$0xf0]  ;;  %v3721_v18 = vor.u32 %v3177_v11, %v2984_v12  ;;  %v3172_v25 = vld [vmem:[#allocation5 + $0x1c4] sm:$0xf]  ;;  %v2960_v27 = vld [vmem:[#allocation5 + $0x1d0] sm:$0xf0] }
  0x9a   :  { %v3723_v19 = vor.u32 %v3174_v17, %v2958_v13  ;;  %v2966_v20 = vld [vmem:[#allocation5 + $0x1c8] sm:$0xf]  ;;  %v3726_v30 = vor.u32 %v3172_v25, %v2960_v27  ;;  %v3175_v23 = vld [vmem:[#allocation5 + $0x1d4] sm:$0xf0]  ;;  %v3173_v32 = vld [vmem:[#allocation5 + $0x1cc] sm:$0xf] }
  0x9b   :  { %877 = vmatpush.bf16.msra.mxu0 %v3625_v31  ;;  %890 = vmatpush.bf16.msra.mxu1 %v3627_v34  ;;  %v3729_v40 = vor.u32 %v3175_v23, %v2966_v20  ;;  %v3731_v41 = vor.u32 %v3173_v32, %v2968_v38  ;;  %v2926_v12 = vld [vmem:[#allocation5 + $0x180] sm:$0xf]  ;;  %v3166_v13 = vld [vmem:[#allocation5 + $0x18c] sm:$0xf0]  ;;  %v3164_v17 = vld [vmem:[#allocation5 + $0x184] sm:$0xf] }
  0x9c   :  { %903 = vmatpush.bf16.msra.mxu2 %v3629_v35  ;;  %916 = vmatpush.bf16.msra.mxu3 %v3632_v39  ;;  %v2928_v25 = vld [vmem:[#allocation5 + $0x190] sm:$0xf0]  ;;  %v2934_v27 = vld [vmem:[#allocation5 + $0x188] sm:$0xf]  ;;  %v3167_v20 = vld [vmem:[#allocation5 + $0x194] sm:$0xf0]  ;;  %v3749_v38 = vor.u32 %v3166_v13, %v2926_v12 }
  0x9d   :  { %4615 = vst [vmem:[#allocation10_spill] sm:$0xff] %v3731_v41  ;;  %v3165_v23 = vld [vmem:[#allocation5 + $0x18c] sm:$0xf]  ;;  %v2936_v32 = vld [vmem:[#allocation5 + $0x198] sm:$0xf0] }
  0x9e   :  { %4620 = vst [vmem:[#allocation15_spill] sm:$0xff] %v3749_v38  ;;  %v3161_v12 = vld [vmem:[#allocation5 + $0x16c] sm:$0xf]  ;;  %v2920_v13 = vld [vmem:[#allocation5 + $0x178] sm:$0xf0] }
  0x9f   :  { %878 = vmatpush.bf16.msra.mxu0 %v3636_v44  ;;  %891 = vmatpush.bf16.msra.mxu1 %v3638_v45 }
  0xa0   :  { %904 = vmatpush.bf16.msra.mxu2 %v3641_v49  ;;  %917 = vmatpush.bf16.msra.mxu3 %v3643_v51 }
  0xa1   :  { %2701 = vmatmul.msk.bf16.gmra.mxu0 %vm328_vm2, %v3563_v43  ;;  %2705 = vmatmul.msk.bf16.gmra.mxu1 %vm328_vm2, %v3563_v43 }
  0xa2   :  { %2709 = vmatmul.msk.bf16.gmra.mxu2 %vm328_vm2, %v3563_v43  ;;  %2713 = vmatmul.msk.bf16.gmra.mxu3 %vm328_vm2, %v3563_v43 }
  0xa3   :  { %879 = vmatpush.bf16.msra.mxu0 %v3657_v55  ;;  %892 = vmatpush.bf16.msra.mxu1 %v3659_v60 }
  0xa4   :  { %905 = vmatpush.bf16.msra.mxu2 %v3661_v61  ;;  %918 = vmatpush.bf16.msra.mxu3 %v3664_v3 }
  0xa7   :  { %893 = vmatpush.bf16.msra.mxu1 %v3670_v10 }
  0xa8   :  { %906 = vmatpush.bf16.msra.mxu2 %v3673_v14  ;;  %919 = vmatpush.bf16.msra.mxu3 %v3675_v22 }
  0xab   :  { %894 = vmatpush.bf16.msra.mxu1 %v3682_v33 }
  0xac   :  { %907 = vmatpush.bf16.msra.mxu2 %v3684_v36  ;;  %920 = vmatpush.bf16.msra.mxu3 %v3687_v37 }
  0xaf   :  { %895 = vmatpush.bf16.msra.mxu1 %v3699_v50 }
  0xb0   :  { %908 = vmatpush.bf16.msra.mxu2 %v3701_v52  ;;  %921 = vmatpush.bf16.msra.mxu3 %v3707_v57 }
  0xb1   :  { %2702 = vmatmul.msk.bf16.gmra.mxu0 %vm328_vm2, %v3577_v59  ;;  %2706 = vmatmul.msk.bf16.gmra.mxu1 %vm328_vm2, %v3577_v59 }
  0xb2   :  { %2710 = vmatmul.msk.bf16.gmra.mxu2 %vm328_vm2, %v3577_v59  ;;  %2714 = vmatmul.msk.bf16.gmra.mxu3 %vm328_vm2, %v3577_v59 }
  0xc1   :  { %2703 = vmatmul.msk.bf16.gmra.mxu0 %vm328_vm2, %v3615_v28  ;;  %2707 = vmatmul.msk.bf16.gmra.mxu1 %vm328_vm2, %v3615_v28 }
  0xc2   :  { %2711 = vmatmul.msk.bf16.gmra.mxu2 %vm328_vm2, %v3615_v28  ;;  %2715 = vmatmul.msk.bf16.gmra.mxu3 %vm328_vm2, %v3615_v28 }
  0xd1   :  { %2716 = vmatmul.msk.bf16.vlgmr.msrb.gmra.mxu0 %vm328_vm2, %v3549_v26  ;;  %2720 = vmatmul.msk.bf16.vlgmr.msrb.gmra.mxu1 %vm328_vm2, %v3549_v26 }
  0xd2   :  { %2724 = vmatmul.msk.bf16.vlgmr.msrb.gmra.mxu2 %vm328_vm2, %v3549_v26  ;;  %2728 = vmatmul.msk.bf16.vlgmr.msrb.gmra.mxu3 %vm328_vm2, %v3549_v26  ;;  %v3126_v26 = vld [vmem:[#allocation5 + $0x4c] sm:$0xf0] }
  0xd3   :  { %v3668_v8 = vor.u32 %v3126_v26, %v2766_v2  ;;  %v3711_v2 = vor.u32 %v3178_v58, %v2974_v56  ;;  %v3713_v26 = vor.u32 %v3176_v62, %v2976_v1  ;;  %1130 = vmatpush.bf16.msrb.mxu3 %v3721_v18  ;;  %v3171_v56 = vld [vmem:[#allocation5 + $0x1b4] sm:$0xf0]  ;;  %v3735_v58 = vor.u32 %v3170_v47, %v2942_v46  ;;  %v3169_v1 = vld [vmem:[#allocation5 + $0x1ac] sm:$0xf] }
  0xd4   :  { %v3737_v62 = vor.u32 %v3168_v48, %v2944_v53  ;;  %v3751_v46 = vor.u32 %v3164_v17, %v2928_v25  ;;  %v3753_v47 = vor.u32 %v3167_v20, %v2934_v27  ;;  %v3755_v48 = vor.u32 %v3165_v23, %v2936_v32  ;;  %v2910_v53 = vld [vmem:[#allocation5 + $0x160] sm:$0xf]  ;;  %v3156_v32 = vld [vmem:[#allocation5 + $0x144] sm:$0xf] }
  0xd5   :  { %880 = vmatpush.bf16.msra.mxu0 %v3668_v8  ;;  %1104 = vmatpush.bf16.msrb.mxu1 %v3713_v26  ;;  %4616 = vst [vmem:[#allocation11_spill] sm:$0xff] %v3735_v58  ;;  %v3775_v20 = vor.u32 %v3161_v12, %v2920_v13  ;;  %v2894_v23 = vld [vmem:[#allocation5 + $0x140] sm:$0xf]  ;;  %v3152_v12 = vld [vmem:[#allocation5 + $0x124] sm:$0xf] }
  0xd6   :  { %4617 = vst [vmem:[#allocation12_spill] sm:$0xff] %v3737_v62  ;;  %v2880_v13 = vld [vmem:[#allocation5 + $0x130] sm:$0xf0] }
  0xd7   :  { %1131 = vmatpush.bf16.msrb.mxu3 %v3731_v41  ;;  %4621 = vst [vmem:[#allocation16_spill] sm:$0xff] %v3751_v46 }
  0xd8   :  { %4622 = vst [vmem:[#allocation17_spill] sm:$0xff] %v3753_v47 }
  0xd9   :  { %881 = vmatpush.bf16.msra.mxu0 %v3678_v29  ;;  %1105 = vmatpush.bf16.msrb.mxu1 %v3726_v30  ;;  %4623 = vst [vmem:[#allocation18_spill] sm:$0xff] %v3755_v48 }
  0xda   :  { %4627 = vst [vmem:[#allocation22_spill] sm:$0xff] %v3775_v20 }
  0xdd   :  { %882 = vmatpush.bf16.msra.mxu0 %v3693_v42  ;;  %1106 = vmatpush.bf16.msrb.mxu1 %v3737_v62  ;;  %v3157_v62 = vld [vmem:[#allocation5 + $0x14c] sm:$0xf] }
  0xe1   :  { %2717 = vmatmul.msk.bf16.gmra.mxu0 %vm328_vm2, %v3563_v43  ;;  %2721 = vmatmul.msk.bf16.gmra.mxu1 %vm328_vm2, %v3563_v43 }
  0xe2   :  { %2725 = vmatmul.msk.bf16.gmra.mxu2 %vm328_vm2, %v3563_v43  ;;  %2729 = vmatmul.msk.bf16.gmra.mxu3 %vm328_vm2, %v3563_v43  ;;  %v3717_v43 = vor.u32 %v3179_v7, %v2982_v6  ;;  %v2952_v6 = vld [vmem:[#allocation5 + $0x1b8] sm:$0xf0]  ;;  %v3740_v7 = vor.u32 %v3171_v56, %v2950_v54  ;;  %v3162_v54 = vld [vmem:[#allocation5 + $0x16c] sm:$0xf0]  ;;  %v3160_v56 = vld [vmem:[#allocation5 + $0x164] sm:$0xf] }
  0xe3   :  { %1091 = vmatpush.bf16.msrb.mxu0 %v3711_v2  ;;  %v3743_v11 = vor.u32 %v3169_v1, %v2952_v6  ;;  %v2912_v1 = vld [vmem:[#allocation5 + $0x170] sm:$0xf0]  ;;  %v2918_v6 = vld [vmem:[#allocation5 + $0x168] sm:$0xf]  ;;  %1107 = vmatpush.bf16.msrb.mxu1 %v3751_v46  ;;  %v3767_v17 = vor.u32 %v3162_v54, %v2910_v53  ;;  %v2904_v46 = vld [vmem:[#allocation5 + $0x158] sm:$0xf0] }
  0xe4   :  { %1117 = vmatpush.bf16.msrb.mxu2 %v3717_v43  ;;  %4618 = vst [vmem:[#allocation13_spill] sm:$0xff] %v3740_v7  ;;  %v3769_v25 = vor.u32 %v3160_v56, %v2912_v1  ;;  %v3773_v27 = vor.u32 %v3163_v0, %v2918_v6  ;;  %v2878_v0 = vld [vmem:[#allocation5 + $0x120] sm:$0xf]  ;;  %v3154_v56 = vld [vmem:[#allocation5 + $0x12c] sm:$0xf0]  ;;  %v3787_v6 = vor.u32 %v3157_v62, %v2904_v46 }
  0xe5   :  { %4619 = vst [vmem:[#allocation14_spill] sm:$0xff] %v3743_v11  ;;  %1132 = vmatpush.bf16.msrb.mxu3 %v3743_v11  ;;  %v2896_v11 = vld [vmem:[#allocation5 + $0x150] sm:$0xf0]  ;;  %v3150_v46 = vld [vmem:[#allocation5 + $0x10c] sm:$0xf0] }
  0xe6   :  { %4624 = vst [vmem:[#allocation19_spill] sm:$0xff] %v3767_v17  ;;  %v3781_v54 = vor.u32 %v3156_v32, %v2896_v11  ;;  %v3791_v11 = vor.u32 %v3154_v56, %v2878_v0  ;;  %v2864_v32 = vld [vmem:[#allocation5 + $0x110] sm:$0xf0] }
  0xe7   :  { %1092 = vmatpush.bf16.msrb.mxu0 %v3723_v19  ;;  %4625 = vst [vmem:[#allocation20_spill] sm:$0xff] %v3769_v25  ;;  %1108 = vmatpush.bf16.msrb.mxu1 %v3769_v25  ;;  %v2888_v25 = vld [vmem:[#allocation5 + $0x138] sm:$0xf0] }
  0xe8   :  { %1118 = vmatpush.bf16.msrb.mxu2 %v3729_v40  ;;  %4626 = vst [vmem:[#allocation21_spill] sm:$0xff] %v3773_v27 }
  0xe9   :  { %1133 = vmatpush.bf16.msrb.mxu3 %v3755_v48  ;;  %4629 = vst [vmem:[#allocation24_spill] sm:$0xff] %v3781_v54  ;;  %v2886_v48 = vld [vmem:[#allocation5 + $0x128] sm:$0xf] }
  0xea   :  { %4631 = vst [vmem:[#allocation26_spill] sm:$0xff] %v3787_v6 }
  0xeb   :  { %1093 = vmatpush.bf16.msrb.mxu0 %v3735_v58  ;;  %1109 = vmatpush.bf16.msrb.mxu1 %v3781_v54  ;;  %4632 = vst [vmem:[#allocation27_spill] sm:$0xff] %v3791_v11  ;;  %v2872_v54 = vld [vmem:[#allocation5 + $0x118] sm:$0xf0] }
  0xec   :  { %1119 = vmatpush.bf16.msrb.mxu2 %v3740_v7  ;;  %v2902_v7 = vld [vmem:[#allocation5 + $0x148] sm:$0xf] }
  0xed   :  { %1134 = vmatpush.bf16.msrb.mxu3 %v3775_v20  ;;  %v2870_v20 = vld [vmem:[#allocation5 + $0x108] sm:$0xf] }
  0xef   :  { %1094 = vmatpush.bf16.msrb.mxu0 %v3749_v38  ;;  %v3159_v38 = vld [vmem:[#allocation5 + $0x154] sm:$0xf0] }
  0xf0   :  { %1120 = vmatpush.bf16.msrb.mxu2 %v3753_v47  ;;  %v3785_v1 = vor.u32 %v3159_v38, %v2902_v7  ;;  %v3153_v47 = vld [vmem:[#allocation5 + $0x12c] sm:$0xf]  ;;  %v2862_v38 = vld [vmem:[#allocation5 + $0x100] sm:$0xf] }
  0xf1   :  { %2718 = vmatmul.msk.bf16.gmra.mxu0 %vm328_vm2, %v3577_v59  ;;  %2722 = vmatmul.msk.bf16.gmra.mxu1 %vm328_vm2, %v3577_v59  ;;  %v3799_v7 = vor.u32 %v3153_v47, %v2888_v25  ;;  %v3803_v0 = vor.u32 %v3150_v46, %v2862_v38 }
  0xf2   :  { %2726 = vmatmul.msk.bf16.gmra.mxu2 %vm328_vm2, %v3577_v59  ;;  %2730 = vmatmul.msk.bf16.gmra.mxu3 %vm328_vm2, %v3577_v59  ;;  %v3158_v59 = vld [vmem:[#allocation5 + $0x14c] sm:$0xf0]  ;;  %4630 = vst [vmem:[#allocation25_spill] sm:$0xff] %v3785_v1 }
  0xf3   :  { %1095 = vmatpush.bf16.msrb.mxu0 %v3767_v17  ;;  %v3779_v53 = vor.u32 %v3158_v59, %v2894_v23  ;;  %v3155_v17 = vld [vmem:[#allocation5 + $0x134] sm:$0xf0]  ;;  %v3793_v23 = vor.u32 %v3152_v12, %v2880_v13  ;;  %1135 = vmatpush.bf16.msrb.mxu3 %v3787_v6  ;;  %4635 = vst [vmem:[#allocation30_spill] sm:$0xff] %v3799_v7  ;;  %v3148_v59 = vld [vmem:[#allocation5 + $0x104] sm:$0xf] }
  0xf4   :  { %1121 = vmatpush.bf16.msrb.mxu2 %v3773_v27  ;;  %v3797_v62 = vor.u32 %v3155_v17, %v2886_v48  ;;  %v3149_v27 = vld [vmem:[#allocation5 + $0x10c] sm:$0xf]  ;;  %4636 = vst [vmem:[#allocation31_spill] sm:$0xff] %v3803_v0  ;;  %v3805_v56 = vor.u32 %v3148_v59, %v2864_v32 }
  0xf5   :  { %4628 = vst [vmem:[#allocation23_spill] sm:$0xff] %v3779_v53  ;;  %1110 = vmatpush.bf16.msrb.mxu1 %v3793_v23  ;;  %v3811_v48 = vor.u32 %v3149_v27, %v2872_v54  ;;  %v4640_v27 = vmov 0  }
  0xf6   :  { %4633 = vst [vmem:[#allocation28_spill] sm:$0xff] %v3793_v23 }
  0xf7   :  { %1096 = vmatpush.bf16.msrb.mxu0 %v3779_v53  ;;  %4634 = vst [vmem:[#allocation29_spill] sm:$0xff] %v3797_v62  ;;  %v3151_v53 = vld [vmem:[#allocation5 + $0x114] sm:$0xf0]  ;;  %1136 = vmatpush.bf16.msrb.mxu3 %v3799_v7 }
  0xf8   :  { %1122 = vmatpush.bf16.msrb.mxu2 %v3785_v1  ;;  %4637 = vst [vmem:[#allocation32_spill] sm:$0xff] %v3805_v56  ;;  %v3809_v47 = vor.u32 %v3151_v53, %v2870_v20 }
  0xf9   :  { %4639 = vst [vmem:[#allocation34_spill] sm:$0xff] %v3811_v48  ;;  %1111 = vmatpush.bf16.msrb.mxu1 %v3805_v56 }
  0xfa   :  { %4638 = vst [vmem:[#allocation33_spill] sm:$0xff] %v3809_v47 }
  0xfb   :  { %1097 = vmatpush.bf16.msrb.mxu0 %v3791_v11  ;;  %1137 = vmatpush.bf16.msrb.mxu3 %v3811_v48 }
  0xfc   :  { %1123 = vmatpush.bf16.msrb.mxu2 %v3797_v62 }
  0xff   :  { %1098 = vmatpush.bf16.msrb.mxu0 %v3803_v0 }
 0x100   :  { %1124 = vmatpush.bf16.msrb.mxu2 %v3809_v47 }
 0x101   :  { %2719 = vmatmul.msk.bf16.gmra.mxu0 %vm328_vm2, %v3615_v28  ;;  %2723 = vmatmul.msk.bf16.gmra.mxu1 %vm328_vm2, %v3615_v28 }
 0x102   :  { %2727 = vmatmul.msk.bf16.gmra.mxu2 %vm328_vm2, %v3615_v28  ;;  %2731 = vmatmul.msk.bf16.gmra.mxu3 %vm328_vm2, %v3615_v28 }
 0x10e   :  { %v3825_v17 = vpop.f32.mrf.mxu0  ;;  %v3827_v25 = vpop.f32.mrf.mxu1 }
 0x111   :  { %883 = vmatmul.bf16.vlgmr.msra.gmra.mxu0 %v4640_v27  ;;  %896 = vmatmul.bf16.vlgmr.msra.gmra.mxu1 %v4640_v27 }
 0x112   :  { %909 = vmatmul.bf16.vlgmr.msra.gmra.mxu2 %v4640_v27  ;;  %922 = vmatmul.bf16.vlgmr.msra.gmra.mxu3 %v4640_v27 }
 0x113   :  { %1198 = vmatpush.bf16.msra.mxu0 %v3587_v63  ;;  %1211 = vmatpush.bf16.msra.mxu1 %v3589_v4 }
 0x114   :  { %1224 = vmatpush.bf16.msra.mxu2 %v3591_v5  ;;  %1237 = vmatpush.bf16.msra.mxu3 %v3594_v9 }
 0x115   :  { %v3837_v28 = vpop.f32.mrf.mxu2  ;;  %v3839_v20 = vpop.f32.mrf.mxu3 }
 0x116   :  { %v3841_v53 = vpop.f32.mrf.mxu0  ;;  %v3843_v54 = vpop.f32.mrf.mxu1 }
 0x117   :  { %4641 = vst [vmem:[#allocation35_spill] sm:$0xff] %v3841_v53  ;;  %1199 = vmatpush.bf16.msra.mxu0 %v3598_v15  ;;  %1212 = vmatpush.bf16.msra.mxu1 %v3600_v16 }
 0x118   :  { %4642 = vst [vmem:[#allocation36_spill] sm:$0xff] %v3843_v54  ;;  %1225 = vmatpush.bf16.msra.mxu2 %v3603_v21  ;;  %1238 = vmatpush.bf16.msra.mxu3 %v3605_v24  ;;  %v4664_v54 = vld [vmem:[#allocation15_spill] sm:$0xff] }
 0x11b   :  { %1200 = vmatpush.bf16.msra.mxu0 %v3625_v31  ;;  %1213 = vmatpush.bf16.msra.mxu1 %v3627_v34 }
 0x11c   :  { %1226 = vmatpush.bf16.msra.mxu2 %v3629_v35  ;;  %1239 = vmatpush.bf16.msra.mxu3 %v3632_v39 }
 0x11d   :  { %v3853_v12 = vpop.f32.mrf.mxu2  ;;  %v3855_v13 = vpop.f32.mrf.mxu3 }
 0x11e   :  { %4643 = vst [vmem:[#allocation37_spill] sm:$0xff] %v3853_v12  ;;  %v3857_v38 = vpop.f32.mrf.mxu0  ;;  %v3859_v46 = vpop.f32.mrf.mxu1 }
 0x11f   :  { %4644 = vst [vmem:[#allocation38_spill] sm:$0xff] %v3855_v13  ;;  %1201 = vmatpush.bf16.msra.mxu0 %v3636_v44  ;;  %1214 = vmatpush.bf16.msra.mxu1 %v3638_v45  ;;  %v4660_v13 = vld [vmem:[#allocation13_spill] sm:$0xff] }
 0x120   :  { %4645 = vst [vmem:[#allocation39_spill] sm:$0xff] %v3857_v38  ;;  %1227 = vmatpush.bf16.msra.mxu2 %v3641_v49  ;;  %1240 = vmatpush.bf16.msra.mxu3 %v3643_v51 }
 0x121   :  { %4646 = vst [vmem:[#allocation40_spill] sm:$0xff] %v3859_v46  ;;  %1099 = vmatmul.bf16.vlgmr.msrb.gmra.mxu0 %v4640_v27  ;;  %1112 = vmatmul.bf16.vlgmr.msrb.gmra.mxu1 %v4640_v27 }
 0x122   :  { %1125 = vmatmul.bf16.vlgmr.msrb.gmra.mxu2 %v4640_v27  ;;  %1138 = vmatmul.bf16.vlgmr.msrb.gmra.mxu3 %v4640_v27 }
 0x123   :  { %1202 = vmatpush.bf16.msra.mxu0 %v3657_v55  ;;  %1215 = vmatpush.bf16.msra.mxu1 %v3659_v60 }
 0x124   :  { %1228 = vmatpush.bf16.msra.mxu2 %v3661_v61  ;;  %1241 = vmatpush.bf16.msra.mxu3 %v3664_v3 }
 0x125   :  { %v3873_v59 = vpop.f32.mrf.mxu2  ;;  %v3875_v32 = vpop.f32.mrf.mxu3 }
 0x126   :  { %4647 = vst [vmem:[#allocation41_spill] sm:$0xff] %v3873_v59  ;;  %v3877_v46 = vpop.f32.mrf.mxu0  ;;  %v3879_v38 = vpop.f32.mrf.mxu1  ;;  %v4659_v59 = vld [vmem:[#allocation12_spill] sm:$0xff] }
 0x127   :  { %4648 = vst [vmem:[#allocation42_spill] sm:$0xff] %v3875_v32  ;;  %1203 = vmatpush.bf16.msra.mxu0 %v3668_v8  ;;  %1216 = vmatpush.bf16.msra.mxu1 %v3670_v10 }
 0x128   :  { %4649 = vst [vmem:[#allocation43_spill] sm:$0xff] %v3877_v46  ;;  %1229 = vmatpush.bf16.msra.mxu2 %v3673_v14  ;;  %1242 = vmatpush.bf16.msra.mxu3 %v3675_v22 }
 0x129   :  { %4650 = vst [vmem:[#allocation44_spill] sm:$0xff] %v3879_v38 }
 0x12b   :  { %1204 = vmatpush.bf16.msra.mxu0 %v3678_v29  ;;  %1217 = vmatpush.bf16.msra.mxu1 %v3682_v33 }
 0x12c   :  { %1230 = vmatpush.bf16.msra.mxu2 %v3684_v36  ;;  %1243 = vmatpush.bf16.msra.mxu3 %v3687_v37 }
 0x12d   :  { %v3889_v27 = vpop.f32.mrf.mxu2  ;;  %v3891_v46 = vpop.f32.mrf.mxu3 }
 0x12e   :  { %4651 = vst [vmem:[#allocation45_spill] sm:$0xff] %v3889_v27  ;;  %v3893_v38 = vpop.f32.mrf.mxu0  ;;  %v3895_v32 = vpop.f32.mrf.mxu1 }
 0x12f   :  { %4652 = vst [vmem:[#allocation46_spill] sm:$0xff] %v3891_v46  ;;  %1205 = vmatpush.bf16.msra.mxu0 %v3693_v42  ;;  %1218 = vmatpush.bf16.msra.mxu1 %v3699_v50 }
 0x130   :  { %4653 = vst [vmem:[#allocation47_spill] sm:$0xff] %v3893_v38  ;;  %1231 = vmatpush.bf16.msra.mxu2 %v3701_v52  ;;  %1244 = vmatpush.bf16.msra.mxu3 %v3707_v57 }
 0x131   :  { %4654 = vst [vmem:[#allocation48_spill] sm:$0xff] %v3895_v32 }
 0x133   :  { %1255 = vmatpush.bf16.msrb.mxu0 %v3711_v2  ;;  %1268 = vmatpush.bf16.msrb.mxu1 %v3713_v26 }
 0x134   :  { %1281 = vmatpush.bf16.msrb.mxu2 %v3717_v43  ;;  %1294 = vmatpush.bf16.msrb.mxu3 %v3721_v18 }
 0x135   :  { %v3905_v46 = vpop.f32.mrf.mxu2  ;;  %v3907_v38 = vpop.f32.mrf.mxu3 }
 0x136   :  { %4655 = vst [vmem:[#allocation49_spill] sm:$0xff] %v3905_v46  ;;  %v3911_v32 = vpop.f32.mrf.mxu0  ;;  %v3913_v27 = vpop.f32.mrf.mxu1  ;;  %v4661_v46 = vld [vmem:[#allocation14_spill] sm:$0xff] }
 0x137   :  { %4656 = vst [vmem:[#allocation50_spill] sm:$0xff] %v3907_v38  ;;  %1256 = vmatpush.bf16.msrb.mxu0 %v3723_v19  ;;  %1269 = vmatpush.bf16.msrb.mxu1 %v3726_v30 }
 0x138   :  { %4657 = vst [vmem:[#allocation51_spill] sm:$0xff] %v3911_v32  ;;  %1282 = vmatpush.bf16.msrb.mxu2 %v3729_v40  ;;  %1295 = vmatpush.bf16.msrb.mxu3 %v3731_v41  ;;  %v4665_v32 = vld [vmem:[#allocation16_spill] sm:$0xff]  ;;  %v4668_v41 = vld [vmem:[#allocation17_spill] sm:$0xff] }
 0x139   :  { %4658 = vst [vmem:[#allocation52_spill] sm:$0xff] %v3913_v27 }
 0x13b   :  { %1257 = vmatpush.bf16.msrb.mxu0 %v3735_v58  ;;  %1270 = vmatpush.bf16.msrb.mxu1 %v4659_v59  ;;  %v4669_v58 = vld [vmem:[#allocation18_spill] sm:$0xff]  ;;  %v4670_v59 = vld [vmem:[#allocation19_spill] sm:$0xff] }
 0x13c   :  { %1283 = vmatpush.bf16.msrb.mxu2 %v4660_v13  ;;  %1296 = vmatpush.bf16.msrb.mxu3 %v4661_v46  ;;  %v4671_v13 = vld [vmem:[#allocation20_spill] sm:$0xff]  ;;  %v4672_v46 = vld [vmem:[#allocation21_spill] sm:$0xff] }
 0x13d   :  { %v3921_v38 = vpop.f32.mrf.mxu2  ;;  %v3923_v12 = vpop.f32.mrf.mxu3 }
 0x13e   :  { %4662 = vst [vmem:[#allocation53_spill] sm:$0xff] %v3921_v38  ;;  %v3927_v27 = vpop.f32.mrf.mxu0  ;;  %v3929_v53 = vpop.f32.mrf.mxu1  ;;  %v4673_v38 = vld [vmem:[#allocation22_spill] sm:$0xff] }
 0x13f   :  { %4663 = vst [vmem:[#allocation54_spill] sm:$0xff] %v3923_v12  ;;  %1258 = vmatpush.bf16.msrb.mxu0 %v4664_v54  ;;  %1271 = vmatpush.bf16.msrb.mxu1 %v4665_v32  ;;  %v4676_v32 = vld [vmem:[#allocation23_spill] sm:$0xff] }
 0x140   :  { %4666 = vst [vmem:[#allocation55_spill] sm:$0xff] %v3927_v27  ;;  %1284 = vmatpush.bf16.msrb.mxu2 %v4668_v41  ;;  %1297 = vmatpush.bf16.msrb.mxu3 %v4669_v58  ;;  %v4677_v27 = vld [vmem:[#allocation24_spill] sm:$0xff] }
 0x141   :  { %4667 = vst [vmem:[#allocation56_spill] sm:$0xff] %v3929_v53 }
 0x143   :  { %1259 = vmatpush.bf16.msrb.mxu0 %v4670_v59  ;;  %1272 = vmatpush.bf16.msrb.mxu1 %v4671_v13 }
 0x144   :  { %1285 = vmatpush.bf16.msrb.mxu2 %v4672_v46  ;;  %1298 = vmatpush.bf16.msrb.mxu3 %v4673_v38 }
 0x145   :  { %v3937_v12 = vpop.f32.mrf.mxu2  ;;  %v3939_v54 = vpop.f32.mrf.mxu3 }
 0x146   :  { %4674 = vst [vmem:[#allocation57_spill] sm:$0xff] %v3937_v12  ;;  %v3943_v53 = vpop.f32.mrf.mxu0  ;;  %v3945_v41 = vpop.f32.mrf.mxu1 }
 0x147   :  { %4675 = vst [vmem:[#allocation58_spill] sm:$0xff] %v3939_v54  ;;  %1260 = vmatpush.bf16.msrb.mxu0 %v4676_v32  ;;  %1273 = vmatpush.bf16.msrb.mxu1 %v4677_v27 }
 0x148   :  { %4678 = vst [vmem:[#allocation59_spill] sm:$0xff] %v3943_v53  ;;  %1286 = vmatpush.bf16.msrb.mxu2 %v3785_v1  ;;  %1299 = vmatpush.bf16.msrb.mxu3 %v3787_v6 }
 0x149   :  { %4679 = vst [vmem:[#allocation60_spill] sm:$0xff] %v3945_v41 }
 0x14b   :  { %1261 = vmatpush.bf16.msrb.mxu0 %v3791_v11  ;;  %1274 = vmatpush.bf16.msrb.mxu1 %v3793_v23 }
 0x14c   :  { %1287 = vmatpush.bf16.msrb.mxu2 %v3797_v62  ;;  %1300 = vmatpush.bf16.msrb.mxu3 %v3799_v7 }
 0x14d   :  { %v3953_v54 = vpop.f32.mrf.mxu2  ;;  %v3955_v12 = vpop.f32.mrf.mxu3 }
 0x14e   :  { %4680 = vst [vmem:[#allocation61_spill] sm:$0xff] %v3953_v54  ;;  %v3959_v41 = vpop.f32.mrf.mxu0  ;;  %v3961_v53 = vpop.f32.mrf.mxu1 }
 0x14f   :  { %4681 = vst [vmem:[#allocation62_spill] sm:$0xff] %v3955_v12  ;;  %1262 = vmatpush.bf16.msrb.mxu0 %v3803_v0  ;;  %1275 = vmatpush.bf16.msrb.mxu1 %v3805_v56 }
 0x150   :  { %4682 = vst [vmem:[#allocation63_spill] sm:$0xff] %v3959_v41  ;;  %1288 = vmatpush.bf16.msrb.mxu2 %v3809_v47  ;;  %1301 = vmatpush.bf16.msrb.mxu3 %v3811_v48 }
 0x151   :  { %4683 = vst [vmem:[#allocation64_spill] sm:$0xff] %v3961_v53 }
 0x155   :  { %v3965_v23 = vpop.f32.mrf.mxu2  ;;  %v3967_v62 = vpop.f32.mrf.mxu3 }
 0x156   :  { %4684 = vst [vmem:[#allocation65_spill] sm:$0xff] %v3965_v23  ;;  %v3969_v7 = vpop.f32.mrf.mxu0  ;;  %v3971_v54 = vpop.f32.mrf.mxu1 }
 0x157   :  { %4685 = vst [vmem:[#allocation66_spill] sm:$0xff] %v3967_v62 }
 0x158   :  { %4686 = vst [vmem:[#allocation67_spill] sm:$0xff] %v3969_v7 }
 0x159   :  { %4687 = vst [vmem:[#allocation68_spill] sm:$0xff] %v3971_v54 }
 0x15d   :  { %v3973_v12 = vpop.f32.mrf.mxu2  ;;  %v3975_v0 = vpop.f32.mrf.mxu3 }
 0x15e   :  { %4688 = vst [vmem:[#allocation69_spill] sm:$0xff] %v3973_v12  ;;  %v3977_v56 = vpop.f32.mrf.mxu0  ;;  %v3979_v41 = vpop.f32.mrf.mxu1 }
 0x15f   :  { %4689 = vst [vmem:[#allocation70_spill] sm:$0xff] %v3975_v0 }
 0x160   :  { %4690 = vst [vmem:[#allocation71_spill] sm:$0xff] %v3977_v56 }
 0x161   :  { %4691 = vst [vmem:[#allocation72_spill] sm:$0xff] %v3979_v41 }
 0x165   :  { %v3981_v53 = vpop.f32.mrf.mxu2  ;;  %v3983_v47 = vpop.f32.mrf.mxu3 }
 0x166   :  { %4692 = vst [vmem:[#allocation73_spill] sm:$0xff] %v3981_v53  ;;  %v3985_v48 = vpop.f32.mrf.mxu0  ;;  %v3987_v23 = vpop.f32.mrf.mxu1 }
 0x167   :  { %4693 = vst [vmem:[#allocation74_spill] sm:$0xff] %v3983_v47 }
 0x168   :  { %4694 = vst [vmem:[#allocation75_spill] sm:$0xff] %v3985_v48 }
 0x169   :  { %4695 = vst [vmem:[#allocation76_spill] sm:$0xff] %v3987_v23 }
 0x16d   :  { %v3989_v62 = vpop.f32.mrf.mxu2  ;;  %v3991_v7 = vpop.f32.mrf.mxu3 }
 0x16e   :  { %4696 = vst [vmem:[#allocation77_spill] sm:$0xff] %v3989_v62  ;;  %v3993_v54 = vpop.f32.mrf.mxu0  ;;  %v3995_v12 = vpop.f32.mrf.mxu1 }
 0x16f   :  { %4697 = vst [vmem:[#allocation78_spill] sm:$0xff] %v3991_v7 }
 0x170   :  { %4698 = vst [vmem:[#allocation79_spill] sm:$0xff] %v3993_v54 }
 0x171   :  { %4699 = vst [vmem:[#allocation80_spill] sm:$0xff] %v3995_v12 }
 0x175   :  { %v3997_v0 = vpop.f32.mrf.mxu2  ;;  %v3999_v56 = vpop.f32.mrf.mxu3 }
 0x176   :  { %4700 = vst [vmem:[#allocation81_spill] sm:$0xff] %v3997_v0  ;;  %v4001_v41 = vpop.f32.mrf.mxu0  ;;  %v4003_v53 = vpop.f32.mrf.mxu1 }
 0x177   :  { %4701 = vst [vmem:[#allocation82_spill] sm:$0xff] %v3999_v56 }
 0x178   :  { %4702 = vst [vmem:[#allocation83_spill] sm:$0xff] %v4001_v41 }
 0x179   :  { %4703 = vst [vmem:[#allocation84_spill] sm:$0xff] %v4003_v53 }
 0x17d   :  { %v4005_v47 = vpop.f32.mrf.mxu2  ;;  %v4007_v48 = vpop.f32.mrf.mxu3 }
 0x17e   :  { %4704 = vst [vmem:[#allocation85_spill] sm:$0xff] %v4005_v47  ;;  %v4009_v23 = vpop.f32.mrf.mxu0  ;;  %v4011_v62 = vpop.f32.mrf.mxu1 }
 0x17f   :  { %4705 = vst [vmem:[#allocation86_spill] sm:$0xff] %v4007_v48 }
 0x180   :  { %4706 = vst [vmem:[#allocation87_spill] sm:$0xff] %v4009_v23 }
 0x181   :  { %4707 = vst [vmem:[#allocation88_spill] sm:$0xff] %v4011_v62 }
 0x185   :  { %v4013_v7 = vpop.f32.mrf.mxu2  ;;  %v4015_v54 = vpop.f32.mrf.mxu3 }
 0x186   :  { %4708 = vst [vmem:[#allocation89_spill] sm:$0xff] %v4013_v7  ;;  %v483_v12 = vpop.f32.mrf.mxu0  ;;  %v512_v0 = vpop.f32.mrf.mxu1 }
 0x187   :  { %4709 = vst [vmem:[#allocation90_spill] sm:$0xff] %v4015_v54 }
 0x18d   :  { %v541_v11 = vpop.f32.mrf.mxu2  ;;  %v570_v56 = vpop.f32.mrf.mxu3 }
 0x18e   :  { %v884_v6 = vpop.f32.mrf.mxu0  ;;  %v897_v41 = vpop.f32.mrf.mxu1 }
 0x18f   :  { %v927_v53 = vadd.f32 %v884_v6, %v3825_v17  ;;  %v928_v47 = vadd.f32 %v897_v41, %v3827_v25 }
 0x191   :  { %v1147_v1 = vmul.f32 0.5, %v927_v53  ;;  %v1151_v48 = vmul.f32 0.5, %v928_v47 }
 0x193   :  { %3220 = vtanh.f32 %v1147_v1 }
 0x194   :  { %3222 = vtanh.f32 %v1151_v48 }
 0x195   :  { %v910_v23 = vpop.f32.mrf.mxu2  ;;  %v923_v62 = vpop.f32.mrf.mxu3 }
 0x196   :  { %v929_v7 = vadd.f32 %v910_v23, %v3837_v28  ;;  %v930_v54 = vadd.f32 %v923_v62, %v3839_v20  ;;  %v886_v27 = vpop.f32.mrf.mxu0  ;;  %v899_v32 = vpop.f32.mrf.mxu1 }
 0x198   :  { %3224 = vtanh.f32 %v929_v7  ;;  %v1156_v38 = vmul.f32 0.5, %v930_v54 }
 0x199   :  { %v3221_v46 = vpop.eup %3220 }
 0x19a   :  { %v3223_v13 = vpop.eup %3222  ;;  %v1149_v59 = vmul.f32 0.5, %v3221_v46  ;;  %3226 = vtanh.f32 %v1156_v38 }
 0x19b   :  { %v1153_v6 = vmul.f32 0.5, %v3223_v13 }
 0x19c   :  { %v1150_v41 = vadd.f32 0.5, %v1149_v59 }
 0x19d   :  { %v1154_v17 = vadd.f32 0.5, %v1153_v6  ;;  %v912_v47 = vpop.f32.mrf.mxu2  ;;  %v925_v1 = vpop.f32.mrf.mxu3 }
 0x19e   :  { %v3225_v48 = vpop.eup %3224  ;;  %v1100_v25 = vpop.f32.mrf.mxu0 }
 0x19f   :  { %v1113_v53 = vpop.f32.mrf.mxu1  ;;  %v1160_v58 = vmul.f32 0.0, %v1154_v17  ;;  %v1161_v23 = vmul.f32 %v3225_v48, %v1150_v41  ;;  %v1143_v28 = vadd.f32 %v1100_v25, %v483_v12 }
 0x1a0   :  { %v1144_v62 = vadd.f32 %v1113_v53, %v512_v0  ;;  %v3227_v20 = vpop.eup %3226 }
 0x1a1   :  { %v4021_v32 = vadd.f32 %v1161_v23, %v1160_v58  ;;  %v1165_v7 = vmul.f32 0.5, %v1143_v28  ;;  %v1158_v13 = vmul.f32 0.5, %v3227_v20 }
 0x1a2   :  { %v1169_v54 = vmul.f32 0.5, %v1144_v62 }
 0x1a3   :  { %3228 = vtanh.f32 %v4021_v32  ;;  %v1159_v17 = vadd.f32 0.5, %v1158_v13 }
 0x1a4   :  { %3230 = vtanh.f32 %v1165_v7 }
 0x1a5   :  { %3232 = vtanh.f32 %v1169_v54  ;;  %v1126_v38 = vpop.f32.mrf.mxu2  ;;  %v1139_v46 = vpop.f32.mrf.mxu3 }
 0x1a6   :  { %v1145_v59 = vadd.f32 %v1126_v38, %v541_v11  ;;  %v1146_v27 = vadd.f32 %v1139_v46, %v570_v56  ;;  %v1102_v6 = vpop.f32.mrf.mxu0 }
 0x1a7   :  { %v1115_v47 = vpop.f32.mrf.mxu1 }
 0x1a8   :  { %3234 = vtanh.f32 %v1145_v59  ;;  %v1174_v12 = vmul.f32 0.5, %v1146_v27  ;;  %v4710_v47 = vld [vmem:[#allocation10_spill] sm:$0xff] }
 0x1a9   :  { %v3229_v0 = vpop.eup %3228 }
 0x1aa   :  { %v3231_v41 = vpop.eup %3230  ;;  %v1164_v58 = vmul.f32 %v3229_v0, %v1159_v17  ;;  %3236 = vtanh.f32 %v1174_v12  ;;  %v4711_v17 = vld [vmem:[#allocation11_spill] sm:$0xff]  ;;  %v4712_v12 = vld [vmem:[#allocation12_spill] sm:$0xff]  ;;  %v4713_v0 = vld [vmem:[#allocation13_spill] sm:$0xff] }
 0x1ab   :  { %v3233_v1 = vpop.eup %3232  ;;  %v1167_v48 = vmul.f32 0.5, %v3231_v41  ;;  %v4714_v41 = vld [vmem:[#allocation14_spill] sm:$0xff] }
 0x1ac   :  { %v1197_v25 = vpack.c.bf16 %v1164_v58, %v1164_v58  ;;  %v1171_v53 = vmul.f32 0.5, %v3233_v1  ;;  %v4715_v58 = vld [vmem:[#allocation15_spill] sm:$0xff]  ;;  %v4716_v1 = vld [vmem:[#allocation16_spill] sm:$0xff] }
 0x1ad   :  { %v1168_v23 = vadd.f32 0.5, %v1167_v48  ;;  %v1128_v28 = vpop.f32.mrf.mxu2  ;;  %v1141_v62 = vpop.f32.mrf.mxu3  ;;  %v4717_v48 = vld [vmem:[#allocation17_spill] sm:$0xff] }
 0x1ae   :  { %v3235_v20 = vpop.eup %3234  ;;  %v1172_v7 = vadd.f32 0.5, %v1171_v53  ;;  %1206 = vmatmul.bf16.vlgmr.msra.gmra.mxu0 %v1197_v25  ;;  %1219 = vmatmul.bf16.vlgmr.msra.gmra.mxu1 %v1197_v25  ;;  %v4719_v53 = vld [vmem:[#allocation19_spill] sm:$0xff]  ;;  %v4721_v28 = vld [vmem:[#allocation21_spill] sm:$0xff]  ;;  %v4722_v62 = vld [vmem:[#allocation22_spill] sm:$0xff] }
 0x1af   :  { %v1179_v11 = vmul.f32 %v3235_v20, %v1168_v23  ;;  %1232 = vmatmul.bf16.vlgmr.msra.gmra.mxu2 %v1197_v25  ;;  %1245 = vmatmul.bf16.vlgmr.msra.gmra.mxu3 %v1197_v25  ;;  %v4718_v25 = vld [vmem:[#allocation18_spill] sm:$0xff]  ;;  %v4720_v23 = vld [vmem:[#allocation20_spill] sm:$0xff]  ;;  %v4723_v20 = vld [vmem:[#allocation23_spill] sm:$0xff] }
 0x1b0   :  { %v1178_v56 = vmul.f32 0.0, %v1172_v7  ;;  %1362 = vmatpush.bf16.msra.mxu0 %v3587_v63  ;;  %1375 = vmatpush.bf16.msra.mxu1 %v3589_v4  ;;  %v3237_v54 = vpop.eup %3236  ;;  %v4724_v7 = vld [vmem:[#allocation24_spill] sm:$0xff] }
 0x1b1   :  { %1388 = vmatpush.bf16.msra.mxu2 %v3591_v5  ;;  %1401 = vmatpush.bf16.msra.mxu3 %v3594_v9  ;;  %v1176_v38 = vmul.f32 0.5, %v3237_v54  ;;  %v4727_v54 = vld [vmem:[#allocation27_spill] sm:$0xff] }
 0x1b2   :  { %v4028_v13 = vadd.f32 %v1179_v11, %v1178_v56  ;;  %v4725_v11 = vld [vmem:[#allocation25_spill] sm:$0xff]  ;;  %v4726_v56 = vld [vmem:[#allocation26_spill] sm:$0xff] }
 0x1b3   :  { %v1177_v46 = vadd.f32 0.5, %v1176_v38  ;;  %v4728_v38 = vld [vmem:[#allocation28_spill] sm:$0xff] }
 0x1b4   :  { %3238 = vtanh.f32 %v4028_v13  ;;  %1363 = vmatpush.bf16.msra.mxu0 %v3598_v15  ;;  %1376 = vmatpush.bf16.msra.mxu1 %v3600_v16 }
 0x1b5   :  { %1389 = vmatpush.bf16.msra.mxu2 %v3603_v21  ;;  %1402 = vmatpush.bf16.msra.mxu3 %v3605_v24 }
 0x1b8   :  { %1364 = vmatpush.bf16.msra.mxu0 %v3625_v31  ;;  %1377 = vmatpush.bf16.msra.mxu1 %v3627_v34 }
 0x1b9   :  { %1390 = vmatpush.bf16.msra.mxu2 %v3629_v35  ;;  %1403 = vmatpush.bf16.msra.mxu3 %v3632_v39 }
 0x1ba   :  { %v3239_v59 = vpop.eup %3238 }
 0x1bb   :  { %v1182_v27 = vmul.f32 %v3239_v59, %v1177_v46  ;;  %v4729_v46 = vld [vmem:[#allocation29_spill] sm:$0xff]  ;;  %v4730_v59 = vld [vmem:[#allocation30_spill] sm:$0xff] }
 0x1bc   :  { %1365 = vmatpush.bf16.msra.mxu0 %v3636_v44  ;;  %1378 = vmatpush.bf16.msra.mxu1 %v3638_v45 }
 0x1bd   :  { %v1254_v6 = vpack.c.bf16 %v1182_v27, %v1182_v27  ;;  %1391 = vmatpush.bf16.msra.mxu2 %v3641_v49  ;;  %1404 = vmatpush.bf16.msra.mxu3 %v3643_v51  ;;  %v4731_v27 = vld [vmem:[#allocation31_spill] sm:$0xff] }
 0x1bf   :  { %1263 = vmatmul.bf16.vlgmr.msrb.gmra.mxu0 %v1254_v6  ;;  %1276 = vmatmul.bf16.vlgmr.msrb.gmra.mxu1 %v1254_v6 }
 0x1c0   :  { %1289 = vmatmul.bf16.vlgmr.msrb.gmra.mxu2 %v1254_v6  ;;  %1302 = vmatmul.bf16.vlgmr.msrb.gmra.mxu3 %v1254_v6  ;;  %v4732_v6 = vld [vmem:[#allocation32_spill] sm:$0xff] }
 0x1c1   :  { %1366 = vmatpush.bf16.msra.mxu0 %v3657_v55  ;;  %1379 = vmatpush.bf16.msra.mxu1 %v3659_v60 }
 0x1c2   :  { %1392 = vmatpush.bf16.msra.mxu2 %v3661_v61  ;;  %1405 = vmatpush.bf16.msra.mxu3 %v3664_v3 }
 0x1c5   :  { %1367 = vmatpush.bf16.msra.mxu0 %v3668_v8  ;;  %1380 = vmatpush.bf16.msra.mxu1 %v3670_v10 }
 0x1c6   :  { %1393 = vmatpush.bf16.msra.mxu2 %v3673_v14  ;;  %1406 = vmatpush.bf16.msra.mxu3 %v3675_v22 }
 0x1c9   :  { %1368 = vmatpush.bf16.msra.mxu0 %v3678_v29  ;;  %1381 = vmatpush.bf16.msra.mxu1 %v3682_v33 }
 0x1ca   :  { %1394 = vmatpush.bf16.msra.mxu2 %v3684_v36  ;;  %1407 = vmatpush.bf16.msra.mxu3 %v3687_v37 }
 0x1cd   :  { %1369 = vmatpush.bf16.msra.mxu0 %v3693_v42  ;;  %1382 = vmatpush.bf16.msra.mxu1 %v3699_v50 }
 0x1ce   :  { %1395 = vmatpush.bf16.msra.mxu2 %v3701_v52  ;;  %1408 = vmatpush.bf16.msra.mxu3 %v3707_v57 }
 0x1d1   :  { %1419 = vmatpush.bf16.msrb.mxu0 %v3711_v2  ;;  %1432 = vmatpush.bf16.msrb.mxu1 %v3713_v26 }
 0x1d2   :  { %1445 = vmatpush.bf16.msrb.mxu2 %v3717_v43  ;;  %1458 = vmatpush.bf16.msrb.mxu3 %v3721_v18 }
 0x1d5   :  { %1420 = vmatpush.bf16.msrb.mxu0 %v3723_v19  ;;  %1433 = vmatpush.bf16.msrb.mxu1 %v3726_v30 }
 0x1d6   :  { %1446 = vmatpush.bf16.msrb.mxu2 %v3729_v40  ;;  %1459 = vmatpush.bf16.msrb.mxu3 %v4710_v47 }
 0x1d9   :  { %1421 = vmatpush.bf16.msrb.mxu0 %v4711_v17  ;;  %1434 = vmatpush.bf16.msrb.mxu1 %v4712_v12 }
 0x1da   :  { %1447 = vmatpush.bf16.msrb.mxu2 %v4713_v0  ;;  %1460 = vmatpush.bf16.msrb.mxu3 %v4714_v41 }
 0x1dd   :  { %1422 = vmatpush.bf16.msrb.mxu0 %v4715_v58  ;;  %1435 = vmatpush.bf16.msrb.mxu1 %v4716_v1 }
 0x1de   :  { %1448 = vmatpush.bf16.msrb.mxu2 %v4717_v48  ;;  %1461 = vmatpush.bf16.msrb.mxu3 %v4718_v25  ;;  %v4737_v25 = vld [vmem:[#allocation37_spill] sm:$0xff]  ;;  %v4738_v48 = vld [vmem:[#allocation38_spill] sm:$0xff] }
 0x1e1   :  { %1423 = vmatpush.bf16.msrb.mxu0 %v4719_v53  ;;  %1436 = vmatpush.bf16.msrb.mxu1 %v4720_v23  ;;  %v4736_v23 = vld [vmem:[#allocation36_spill] sm:$0xff] }
 0x1e2   :  { %1449 = vmatpush.bf16.msrb.mxu2 %v4721_v28  ;;  %1462 = vmatpush.bf16.msrb.mxu3 %v4722_v62  ;;  %v4733_v62 = vld [vmem:[#allocation33_spill] sm:$0xff]  ;;  %v4735_v28 = vld [vmem:[#allocation35_spill] sm:$0xff] }
 0x1e5   :  { %1424 = vmatpush.bf16.msrb.mxu0 %v4723_v20  ;;  %1437 = vmatpush.bf16.msrb.mxu1 %v4724_v7  ;;  %v4734_v20 = vld [vmem:[#allocation34_spill] sm:$0xff] }
 0x1e6   :  { %1450 = vmatpush.bf16.msrb.mxu2 %v4725_v11  ;;  %1463 = vmatpush.bf16.msrb.mxu3 %v4726_v56 }
 0x1e9   :  { %1425 = vmatpush.bf16.msrb.mxu0 %v4727_v54  ;;  %1438 = vmatpush.bf16.msrb.mxu1 %v4728_v38 }
 0x1ea   :  { %1451 = vmatpush.bf16.msrb.mxu2 %v4729_v46  ;;  %1464 = vmatpush.bf16.msrb.mxu3 %v4730_v59 }
 0x1ed   :  { %1426 = vmatpush.bf16.msrb.mxu0 %v4731_v27  ;;  %1439 = vmatpush.bf16.msrb.mxu1 %v4732_v6 }
 0x1ee   :  { %1452 = vmatpush.bf16.msrb.mxu2 %v4733_v62  ;;  %1465 = vmatpush.bf16.msrb.mxu3 %v4734_v20 }
 0x22b   :  { %v1207_v7 = vpop.f32.mrf.mxu0  ;;  %v1220_v11 = vpop.f32.mrf.mxu1 }
 0x22c   :  { %v1250_v56 = vadd.f32 %v1207_v7, %v4735_v28  ;;  %v1251_v54 = vadd.f32 %v1220_v11, %v4736_v23 }
 0x22e   :  { %v1311_v53 = vmul.f32 0.5, %v1250_v56  ;;  %v1315_v38 = vmul.f32 0.5, %v1251_v54 }
 0x230   :  { %3240 = vtanh.f32 %v1311_v53 }
 0x231   :  { %3242 = vtanh.f32 %v1315_v38 }
 0x232   :  { %v1233_v46 = vpop.f32.mrf.mxu2  ;;  %v1246_v59 = vpop.f32.mrf.mxu3 }
 0x233   :  { %v1252_v27 = vadd.f32 %v1233_v46, %v4737_v25  ;;  %v1253_v6 = vadd.f32 %v1246_v59, %v4738_v48  ;;  %v1209_v1 = vpop.f32.mrf.mxu0  ;;  %v1222_v62 = vpop.f32.mrf.mxu1  ;;  %v4739_v48 = vld [vmem:[#allocation87_spill] sm:$0xff] }
 0x234   :  { %v4740_v62 = vld [vmem:[#allocation88_spill] sm:$0xff] }
 0x235   :  { %3244 = vtanh.f32 %v1252_v27  ;;  %v1320_v20 = vmul.f32 0.5, %v1253_v6 }
 0x236   :  { %v3241_v58 = vpop.eup %3240 }
 0x237   :  { %v3243_v41 = vpop.eup %3242  ;;  %v1313_v0 = vmul.f32 0.5, %v3241_v58  ;;  %3246 = vtanh.f32 %v1320_v20 }
 0x238   :  { %v1317_v28 = vmul.f32 0.5, %v3243_v41 }
 0x239   :  { %v1314_v23 = vadd.f32 0.5, %v1313_v0 }
 0x23a   :  { %v1318_v7 = vadd.f32 0.5, %v1317_v28  ;;  %v1235_v11 = vpop.f32.mrf.mxu2  ;;  %v1248_v53 = vpop.f32.mrf.mxu3 }
 0x23b   :  { %v3245_v56 = vpop.eup %3244 }
 0x23c   :  { %v1324_v54 = vmul.f32 %v1318_v7, %v4021_v32  ;;  %v1325_v38 = vmul.f32 %v3245_v56, %v1314_v23  ;;  %v1264_v25 = vpop.f32.mrf.mxu0  ;;  %v1277_v46 = vpop.f32.mrf.mxu1  ;;  %v4742_v32 = vld [vmem:[#allocation89_spill] sm:$0xff]  ;;  %v4743_v7 = vld [vmem:[#allocation90_spill] sm:$0xff] }
 0x23d   :  { %v1307_v1 = vadd.f32 %v1264_v25, %v4739_v48  ;;  %v1308_v59 = vadd.f32 %v1277_v46, %v4740_v62  ;;  %v3247_v27 = vpop.eup %3246 }
 0x23e   :  { %v4098_v6 = vadd.f32 %v1325_v38, %v1324_v54  ;;  %v1322_v0 = vmul.f32 0.5, %v3247_v27 }
 0x23f   :  { %v1329_v58 = vmul.f32 0.5, %v1307_v1  ;;  %v1333_v41 = vmul.f32 0.5, %v1308_v59 }
 0x240   :  { %4741 = vst [vmem:[#allocation10_spill] sm:$0xff] %v4098_v6  ;;  %3248 = vtanh.f32 %v4098_v6  ;;  %v1323_v25 = vadd.f32 0.5, %v1322_v0 }
 0x241   :  { %3250 = vtanh.f32 %v1329_v58 }
 0x242   :  { %3252 = vtanh.f32 %v1333_v41 }
 0x243   :  { %v1290_v20 = vpop.f32.mrf.mxu2  ;;  %v1303_v28 = vpop.f32.mrf.mxu3 }
 0x244   :  { %v1309_v23 = vadd.f32 %v1290_v20, %v4742_v32  ;;  %v1310_v11 = vadd.f32 %v1303_v28, %v4743_v7  ;;  %v1266_v53 = vpop.f32.mrf.mxu0  ;;  %v1279_v56 = vpop.f32.mrf.mxu1 }
 0x245   :  { %v4744_v53 = vld [vmem:[#allocation12_spill] sm:$0xff]  ;;  %v4745_v56 = vld [vmem:[#allocation13_spill] sm:$0xff] }
 0x246   :  { %v3249_v46 = vpop.eup %3248  ;;  %3254 = vtanh.f32 %v1309_v23  ;;  %v1338_v54 = vmul.f32 0.5, %v1310_v11 }
 0x247   :  { %v3251_v38 = vpop.eup %3250  ;;  %v1328_v48 = vmul.f32 %v3249_v46, %v1323_v25  ;;  %v4746_v25 = vld [vmem:[#allocation14_spill] sm:$0xff]  ;;  %v4747_v46 = vld [vmem:[#allocation15_spill] sm:$0xff] }
 0x248   :  { %v3253_v1 = vpop.eup %3252  ;;  %v1331_v62 = vmul.f32 0.5, %v3251_v38  ;;  %3256 = vtanh.f32 %v1338_v54  ;;  %v4748_v54 = vld [vmem:[#allocation16_spill] sm:$0xff]  ;;  %v4749_v38 = vld [vmem:[#allocation17_spill] sm:$0xff] }
 0x249   :  { %v1361_v59 = vpack.c.bf16 %v1328_v48, %v1328_v48  ;;  %v1335_v27 = vmul.f32 0.5, %v3253_v1  ;;  %v4750_v48 = vld [vmem:[#allocation18_spill] sm:$0xff]  ;;  %v4751_v1 = vld [vmem:[#allocation19_spill] sm:$0xff] }
 0x24a   :  { %v1332_v58 = vadd.f32 0.5, %v1331_v62  ;;  %v4752_v62 = vld [vmem:[#allocation20_spill] sm:$0xff] }
 0x24b   :  { %v1336_v41 = vadd.f32 0.5, %v1335_v27  ;;  %v1292_v6 = vpop.f32.mrf.mxu2  ;;  %v1305_v12 = vpop.f32.mrf.mxu3  ;;  %1370 = vmatmul.bf16.vlgmr.msra.gmra.mxu0 %v1361_v59  ;;  %1383 = vmatmul.bf16.vlgmr.msra.gmra.mxu1 %v1361_v59  ;;  %v4754_v27 = vld [vmem:[#allocation22_spill] sm:$0xff] }
 0x24c   :  { %v3255_v20 = vpop.eup %3254  ;;  %1396 = vmatmul.bf16.vlgmr.msra.gmra.mxu2 %v1361_v59  ;;  %1409 = vmatmul.bf16.vlgmr.msra.gmra.mxu3 %v1361_v59  ;;  %v4753_v59 = vld [vmem:[#allocation21_spill] sm:$0xff] }
 0x24d   :  { %v1342_v0 = vmul.f32 %v1336_v41, %v4028_v13  ;;  %v1343_v28 = vmul.f32 %v3255_v20, %v1332_v58  ;;  %1526 = vmatpush.bf16.msra.mxu0 %v3587_v63  ;;  %1539 = vmatpush.bf16.msra.mxu1 %v3589_v4  ;;  %v4755_v58 = vld [vmem:[#allocation23_spill] sm:$0xff]  ;;  %v4756_v41 = vld [vmem:[#allocation24_spill] sm:$0xff]  ;;  %v4757_v20 = vld [vmem:[#allocation25_spill] sm:$0xff] }
 0x24e   :  { %1552 = vmatpush.bf16.msra.mxu2 %v3591_v5  ;;  %1565 = vmatpush.bf16.msra.mxu3 %v3594_v9  ;;  %v3257_v32 = vpop.eup %3256 }
 0x24f   :  { %v4108_v23 = vadd.f32 %v1343_v28, %v1342_v0  ;;  %v1340_v12 = vmul.f32 0.5, %v3257_v32  ;;  %v4758_v0 = vld [vmem:[#allocation26_spill] sm:$0xff]  ;;  %v4759_v28 = vld [vmem:[#allocation27_spill] sm:$0xff]  ;;  %v4760_v32 = vld [vmem:[#allocation28_spill] sm:$0xff] }
 0x251   :  { %3258 = vtanh.f32 %v4108_v23  ;;  %1527 = vmatpush.bf16.msra.mxu0 %v3598_v15  ;;  %1540 = vmatpush.bf16.msra.mxu1 %v3600_v16  ;;  %v1341_v13 = vadd.f32 0.5, %v1340_v12  ;;  %v4761_v12 = vld [vmem:[#allocation29_spill] sm:$0xff] }
 0x252   :  { %1553 = vmatpush.bf16.msra.mxu2 %v3603_v21  ;;  %1566 = vmatpush.bf16.msra.mxu3 %v3605_v24 }
 0x255   :  { %1528 = vmatpush.bf16.msra.mxu0 %v3625_v31  ;;  %1541 = vmatpush.bf16.msra.mxu1 %v3627_v34 }
 0x256   :  { %1554 = vmatpush.bf16.msra.mxu2 %v3629_v35  ;;  %1567 = vmatpush.bf16.msra.mxu3 %v3632_v39 }
 0x257   :  { %v3259_v6 = vpop.eup %3258 }
 0x258   :  { %v1346_v7 = vmul.f32 %v3259_v6, %v1341_v13  ;;  %v4762_v13 = vld [vmem:[#allocation30_spill] sm:$0xff]  ;;  %v4763_v6 = vld [vmem:[#allocation31_spill] sm:$0xff] }
 0x259   :  { %1529 = vmatpush.bf16.msra.mxu0 %v3636_v44  ;;  %1542 = vmatpush.bf16.msra.mxu1 %v3638_v45 }
 0x25a   :  { %v1418_v11 = vpack.c.bf16 %v1346_v7, %v1346_v7  ;;  %1555 = vmatpush.bf16.msra.mxu2 %v3641_v49  ;;  %1568 = vmatpush.bf16.msra.mxu3 %v3643_v51  ;;  %v4764_v7 = vld [vmem:[#allocation32_spill] sm:$0xff] }
 0x25c   :  { %1427 = vmatmul.bf16.vlgmr.msrb.gmra.mxu0 %v1418_v11  ;;  %1440 = vmatmul.bf16.vlgmr.msrb.gmra.mxu1 %v1418_v11 }
 0x25d   :  { %1453 = vmatmul.bf16.vlgmr.msrb.gmra.mxu2 %v1418_v11  ;;  %1466 = vmatmul.bf16.vlgmr.msrb.gmra.mxu3 %v1418_v11  ;;  %v4765_v11 = vld [vmem:[#allocation33_spill] sm:$0xff] }
 0x25e   :  { %1530 = vmatpush.bf16.msra.mxu0 %v3657_v55  ;;  %1543 = vmatpush.bf16.msra.mxu1 %v3659_v60 }
 0x25f   :  { %1556 = vmatpush.bf16.msra.mxu2 %v3661_v61  ;;  %1569 = vmatpush.bf16.msra.mxu3 %v3664_v3 }
 0x262   :  { %1531 = vmatpush.bf16.msra.mxu0 %v3668_v8  ;;  %1544 = vmatpush.bf16.msra.mxu1 %v3670_v10 }
 0x263   :  { %1557 = vmatpush.bf16.msra.mxu2 %v3673_v14  ;;  %1570 = vmatpush.bf16.msra.mxu3 %v3675_v22 }
 0x266   :  { %1532 = vmatpush.bf16.msra.mxu0 %v3678_v29  ;;  %1545 = vmatpush.bf16.msra.mxu1 %v3682_v33 }
 0x267   :  { %1558 = vmatpush.bf16.msra.mxu2 %v3684_v36  ;;  %1571 = vmatpush.bf16.msra.mxu3 %v3687_v37 }
 0x26a   :  { %1533 = vmatpush.bf16.msra.mxu0 %v3693_v42  ;;  %1546 = vmatpush.bf16.msra.mxu1 %v3699_v50 }
 0x26b   :  { %1559 = vmatpush.bf16.msra.mxu2 %v3701_v52  ;;  %1572 = vmatpush.bf16.msra.mxu3 %v3707_v57 }
 0x26e   :  { %1583 = vmatpush.bf16.msrb.mxu0 %v3711_v2  ;;  %1596 = vmatpush.bf16.msrb.mxu1 %v3713_v26 }
 0x26f   :  { %1609 = vmatpush.bf16.msrb.mxu2 %v3717_v43  ;;  %1622 = vmatpush.bf16.msrb.mxu3 %v3721_v18 }
 0x272   :  { %1584 = vmatpush.bf16.msrb.mxu0 %v3723_v19  ;;  %1597 = vmatpush.bf16.msrb.mxu1 %v3726_v30 }
 0x273   :  { %1610 = vmatpush.bf16.msrb.mxu2 %v3729_v40  ;;  %1623 = vmatpush.bf16.msrb.mxu3 %v4710_v47 }
 0x276   :  { %1585 = vmatpush.bf16.msrb.mxu0 %v4711_v17  ;;  %1598 = vmatpush.bf16.msrb.mxu1 %v4744_v53 }
 0x277   :  { %1611 = vmatpush.bf16.msrb.mxu2 %v4745_v56  ;;  %1624 = vmatpush.bf16.msrb.mxu3 %v4746_v25 }
 0x27a   :  { %1586 = vmatpush.bf16.msrb.mxu0 %v4747_v46  ;;  %1599 = vmatpush.bf16.msrb.mxu1 %v4748_v54 }
 0x27b   :  { %1612 = vmatpush.bf16.msrb.mxu2 %v4749_v38  ;;  %1625 = vmatpush.bf16.msrb.mxu3 %v4750_v48  ;;  %v4770_v48 = vld [vmem:[#allocation42_spill] sm:$0xff] }
 0x27e   :  { %1587 = vmatpush.bf16.msrb.mxu0 %v4751_v1  ;;  %1600 = vmatpush.bf16.msrb.mxu1 %v4752_v62  ;;  %v4769_v1 = vld [vmem:[#allocation41_spill] sm:$0xff] }
 0x27f   :  { %1613 = vmatpush.bf16.msrb.mxu2 %v4753_v59  ;;  %1626 = vmatpush.bf16.msrb.mxu3 %v4754_v27  ;;  %v4767_v27 = vld [vmem:[#allocation39_spill] sm:$0xff]  ;;  %v4768_v59 = vld [vmem:[#allocation40_spill] sm:$0xff] }
 0x282   :  { %1588 = vmatpush.bf16.msrb.mxu0 %v4755_v58  ;;  %1601 = vmatpush.bf16.msrb.mxu1 %v4756_v41  ;;  %v4766_v58 = vld [vmem:[#allocation34_spill] sm:$0xff] }
 0x283   :  { %1614 = vmatpush.bf16.msrb.mxu2 %v4757_v20  ;;  %1627 = vmatpush.bf16.msrb.mxu3 %v4758_v0 }
 0x286   :  { %1589 = vmatpush.bf16.msrb.mxu0 %v4759_v28  ;;  %1602 = vmatpush.bf16.msrb.mxu1 %v4760_v32 }
 0x287   :  { %1615 = vmatpush.bf16.msrb.mxu2 %v4761_v12  ;;  %1628 = vmatpush.bf16.msrb.mxu3 %v4762_v13 }
 0x28a   :  { %1590 = vmatpush.bf16.msrb.mxu0 %v4763_v6  ;;  %1603 = vmatpush.bf16.msrb.mxu1 %v4764_v7 }
 0x28b   :  { %1616 = vmatpush.bf16.msrb.mxu2 %v4765_v11  ;;  %1629 = vmatpush.bf16.msrb.mxu3 %v4766_v58 }
 0x2c8   :  { %v1371_v41 = vpop.f32.mrf.mxu0  ;;  %v1384_v20 = vpop.f32.mrf.mxu1 }
 0x2c9   :  { %v1414_v0 = vadd.f32 %v1371_v41, %v4767_v27  ;;  %v1415_v28 = vadd.f32 %v1384_v20, %v4768_v59 }
 0x2cb   :  { %v1475_v62 = vmul.f32 0.5, %v1414_v0  ;;  %v1479_v32 = vmul.f32 0.5, %v1415_v28  ;;  %v4771_v28 = vld [vmem:[#allocation10_spill] sm:$0xff] }
 0x2cd   :  { %3260 = vtanh.f32 %v1475_v62 }
 0x2ce   :  { %3262 = vtanh.f32 %v1479_v32 }
 0x2cf   :  { %v1397_v12 = vpop.f32.mrf.mxu2  ;;  %v1410_v13 = vpop.f32.mrf.mxu3 }
 0x2d0   :  { %v1416_v6 = vadd.f32 %v1397_v12, %v4769_v1  ;;  %v1417_v7 = vadd.f32 %v1410_v13, %v4770_v48  ;;  %v1373_v38 = vpop.f32.mrf.mxu0  ;;  %v1386_v11 = vpop.f32.mrf.mxu1  ;;  %v4772_v48 = vld [vmem:[#allocation83_spill] sm:$0xff]  ;;  %v4773_v13 = vld [vmem:[#allocation84_spill] sm:$0xff] }
 0x2d2   :  { %3264 = vtanh.f32 %v1416_v6  ;;  %v1484_v58 = vmul.f32 0.5, %v1417_v7 }
 0x2d3   :  { %v3261_v54 = vpop.eup %3260 }
 0x2d4   :  { %v3263_v46 = vpop.eup %3262  ;;  %v1477_v25 = vmul.f32 0.5, %v3261_v54  ;;  %3266 = vtanh.f32 %v1484_v58 }
 0x2d5   :  { %v1481_v27 = vmul.f32 0.5, %v3263_v46 }
 0x2d6   :  { %v1478_v59 = vadd.f32 0.5, %v1477_v25 }
 0x2d7   :  { %v1482_v41 = vadd.f32 0.5, %v1481_v27  ;;  %v1399_v20 = vpop.f32.mrf.mxu2  ;;  %v1412_v62 = vpop.f32.mrf.mxu3 }
 0x2d8   :  { %v3265_v0 = vpop.eup %3264  ;;  %v4776_v20 = vld [vmem:[#allocation86_spill] sm:$0xff] }
 0x2d9   :  { %v1488_v32 = vmul.f32 %v1482_v41, %v4771_v28  ;;  %v1489_v56 = vmul.f32 %v3265_v0, %v1478_v59  ;;  %v1428_v1 = vpop.f32.mrf.mxu0  ;;  %v1441_v12 = vpop.f32.mrf.mxu1  ;;  %v4775_v41 = vld [vmem:[#allocation85_spill] sm:$0xff] }
 0x2da   :  { %v1471_v38 = vadd.f32 %v1428_v1, %v4772_v48  ;;  %v1472_v6 = vadd.f32 %v1441_v12, %v4773_v13  ;;  %v3267_v7 = vpop.eup %3266 }
 0x2db   :  { %v4178_v11 = vadd.f32 %v1489_v56, %v1488_v32  ;;  %v1486_v25 = vmul.f32 0.5, %v3267_v7 }
 0x2dc   :  { %v1493_v54 = vmul.f32 0.5, %v1471_v38  ;;  %v1497_v46 = vmul.f32 0.5, %v1472_v6 }
 0x2dd   :  { %4774 = vst [vmem:[#allocation11_spill] sm:$0xff] %v4178_v11  ;;  %3268 = vtanh.f32 %v4178_v11  ;;  %v1487_v1 = vadd.f32 0.5, %v1486_v25 }
 0x2de   :  { %3270 = vtanh.f32 %v1493_v54 }
 0x2df   :  { %3272 = vtanh.f32 %v1497_v46 }
 0x2e0   :  { %v1454_v58 = vpop.f32.mrf.mxu2  ;;  %v1467_v27 = vpop.f32.mrf.mxu3 }
 0x2e1   :  { %v1473_v59 = vadd.f32 %v1454_v58, %v4775_v41  ;;  %v1474_v62 = vadd.f32 %v1467_v27, %v4776_v20  ;;  %v1430_v0 = vpop.f32.mrf.mxu0  ;;  %v1443_v28 = vpop.f32.mrf.mxu1 }
 0x2e2   :  { %v4777_v0 = vld [vmem:[#allocation12_spill] sm:$0xff]  ;;  %v4778_v28 = vld [vmem:[#allocation13_spill] sm:$0xff] }
 0x2e3   :  { %v3269_v12 = vpop.eup %3268  ;;  %3274 = vtanh.f32 %v1473_v59  ;;  %v1502_v56 = vmul.f32 0.5, %v1474_v62 }
 0x2e4   :  { %v3271_v32 = vpop.eup %3270  ;;  %v1492_v48 = vmul.f32 %v3269_v12, %v1487_v1  ;;  %v4779_v1 = vld [vmem:[#allocation14_spill] sm:$0xff]  ;;  %v4780_v12 = vld [vmem:[#allocation15_spill] sm:$0xff] }
 0x2e5   :  { %v3273_v38 = vpop.eup %3272  ;;  %v1495_v13 = vmul.f32 0.5, %v3271_v32  ;;  %3276 = vtanh.f32 %v1502_v56  ;;  %v4781_v56 = vld [vmem:[#allocation16_spill] sm:$0xff]  ;;  %v4782_v32 = vld [vmem:[#allocation17_spill] sm:$0xff] }
 0x2e6   :  { %v1525_v6 = vpack.c.bf16 %v1492_v48, %v1492_v48  ;;  %v1499_v7 = vmul.f32 0.5, %v3273_v38  ;;  %v4783_v48 = vld [vmem:[#allocation18_spill] sm:$0xff]  ;;  %v4784_v38 = vld [vmem:[#allocation19_spill] sm:$0xff] }
 0x2e7   :  { %v1496_v54 = vadd.f32 0.5, %v1495_v13  ;;  %v4785_v13 = vld [vmem:[#allocation20_spill] sm:$0xff] }
 0x2e8   :  { %v1500_v46 = vadd.f32 0.5, %v1499_v7  ;;  %v1456_v11 = vpop.f32.mrf.mxu2  ;;  %v1469_v53 = vpop.f32.mrf.mxu3  ;;  %1534 = vmatmul.bf16.vlgmr.msra.gmra.mxu0 %v1525_v6  ;;  %1547 = vmatmul.bf16.vlgmr.msra.gmra.mxu1 %v1525_v6  ;;  %v4787_v7 = vld [vmem:[#allocation22_spill] sm:$0xff] }
 0x2e9   :  { %v3275_v58 = vpop.eup %3274  ;;  %1560 = vmatmul.bf16.vlgmr.msra.gmra.mxu2 %v1525_v6  ;;  %1573 = vmatmul.bf16.vlgmr.msra.gmra.mxu3 %v1525_v6  ;;  %v4786_v6 = vld [vmem:[#allocation21_spill] sm:$0xff] }
 0x2ea   :  { %v1506_v25 = vmul.f32 %v1500_v46, %v4108_v23  ;;  %v1507_v27 = vmul.f32 %v3275_v58, %v1496_v54  ;;  %1684 = vmatpush.bf16.msra.mxu0 %v3587_v63  ;;  %1697 = vmatpush.bf16.msra.mxu1 %v3589_v4  ;;  %v4788_v54 = vld [vmem:[#allocation23_spill] sm:$0xff]  ;;  %v4789_v46 = vld [vmem:[#allocation24_spill] sm:$0xff]  ;;  %v4790_v58 = vld [vmem:[#allocation25_spill] sm:$0xff] }
 0x2eb   :  { %1710 = vmatpush.bf16.msra.mxu2 %v3591_v5  ;;  %1723 = vmatpush.bf16.msra.mxu3 %v3594_v9  ;;  %v3277_v41 = vpop.eup %3276 }
 0x2ec   :  { %v4188_v59 = vadd.f32 %v1507_v27, %v1506_v25  ;;  %v1504_v53 = vmul.f32 0.5, %v3277_v41  ;;  %v4791_v25 = vld [vmem:[#allocation26_spill] sm:$0xff]  ;;  %v4792_v27 = vld [vmem:[#allocation27_spill] sm:$0xff]  ;;  %v4793_v41 = vld [vmem:[#allocation28_spill] sm:$0xff] }
 0x2ee   :  { %3278 = vtanh.f32 %v4188_v59  ;;  %1685 = vmatpush.bf16.msra.mxu0 %v3598_v15  ;;  %1698 = vmatpush.bf16.msra.mxu1 %v3600_v16  ;;  %v1505_v23 = vadd.f32 0.5, %v1504_v53  ;;  %v4794_v53 = vld [vmem:[#allocation29_spill] sm:$0xff] }
 0x2ef   :  { %1711 = vmatpush.bf16.msra.mxu2 %v3603_v21  ;;  %1724 = vmatpush.bf16.msra.mxu3 %v3605_v24 }
 0x2f2   :  { %1686 = vmatpush.bf16.msra.mxu0 %v3625_v31  ;;  %1699 = vmatpush.bf16.msra.mxu1 %v3627_v34 }
 0x2f3   :  { %1712 = vmatpush.bf16.msra.mxu2 %v3629_v35  ;;  %1725 = vmatpush.bf16.msra.mxu3 %v3632_v39 }
 0x2f4   :  { %v3279_v11 = vpop.eup %3278 }
 0x2f5   :  { %v1510_v20 = vmul.f32 %v3279_v11, %v1505_v23  ;;  %v4795_v23 = vld [vmem:[#allocation30_spill] sm:$0xff]  ;;  %v4796_v11 = vld [vmem:[#allocation31_spill] sm:$0xff] }
 0x2f6   :  { %1687 = vmatpush.bf16.msra.mxu0 %v3636_v44  ;;  %1700 = vmatpush.bf16.msra.mxu1 %v3638_v45 }
 0x2f7   :  { %v1582_v62 = vpack.c.bf16 %v1510_v20, %v1510_v20  ;;  %1713 = vmatpush.bf16.msra.mxu2 %v3641_v49  ;;  %1726 = vmatpush.bf16.msra.mxu3 %v3643_v51  ;;  %v4797_v20 = vld [vmem:[#allocation32_spill] sm:$0xff] }
 0x2f9   :  { %1591 = vmatmul.bf16.vlgmr.msrb.gmra.mxu0 %v1582_v62  ;;  %1604 = vmatmul.bf16.vlgmr.msrb.gmra.mxu1 %v1582_v62 }
 0x2fa   :  { %1617 = vmatmul.bf16.vlgmr.msrb.gmra.mxu2 %v1582_v62  ;;  %1630 = vmatmul.bf16.vlgmr.msrb.gmra.mxu3 %v1582_v62  ;;  %v4798_v62 = vld [vmem:[#allocation33_spill] sm:$0xff] }
 0x2fb   :  { %1688 = vmatpush.bf16.msra.mxu0 %v3657_v55  ;;  %1701 = vmatpush.bf16.msra.mxu1 %v3659_v60 }
 0x2fc   :  { %1714 = vmatpush.bf16.msra.mxu2 %v3661_v61  ;;  %1727 = vmatpush.bf16.msra.mxu3 %v3664_v3 }
 0x2ff   :  { %1689 = vmatpush.bf16.msra.mxu0 %v3668_v8  ;;  %1702 = vmatpush.bf16.msra.mxu1 %v3670_v10 }
 0x300   :  { %1715 = vmatpush.bf16.msra.mxu2 %v3673_v14  ;;  %1728 = vmatpush.bf16.msra.mxu3 %v3675_v22 }
 0x303   :  { %1690 = vmatpush.bf16.msra.mxu0 %v3678_v29  ;;  %1703 = vmatpush.bf16.msra.mxu1 %v3682_v33 }
 0x304   :  { %1716 = vmatpush.bf16.msra.mxu2 %v3684_v36  ;;  %1729 = vmatpush.bf16.msra.mxu3 %v3687_v37 }
 0x307   :  { %1691 = vmatpush.bf16.msra.mxu0 %v3693_v42  ;;  %1704 = vmatpush.bf16.msra.mxu1 %v3699_v50 }
 0x308   :  { %1717 = vmatpush.bf16.msra.mxu2 %v3701_v52  ;;  %1730 = vmatpush.bf16.msra.mxu3 %v3707_v57 }
 0x30b   :  { %1741 = vmatpush.bf16.msrb.mxu0 %v3711_v2  ;;  %1754 = vmatpush.bf16.msrb.mxu1 %v3713_v26 }
 0x30c   :  { %1767 = vmatpush.bf16.msrb.mxu2 %v3717_v43  ;;  %1780 = vmatpush.bf16.msrb.mxu3 %v3721_v18 }
 0x30f   :  { %1742 = vmatpush.bf16.msrb.mxu0 %v3723_v19  ;;  %1755 = vmatpush.bf16.msrb.mxu1 %v3726_v30 }
 0x310   :  { %1768 = vmatpush.bf16.msrb.mxu2 %v3729_v40  ;;  %1781 = vmatpush.bf16.msrb.mxu3 %v4710_v47 }
 0x313   :  { %1743 = vmatpush.bf16.msrb.mxu0 %v4711_v17  ;;  %1756 = vmatpush.bf16.msrb.mxu1 %v4777_v0 }
 0x314   :  { %1769 = vmatpush.bf16.msrb.mxu2 %v4778_v28  ;;  %1782 = vmatpush.bf16.msrb.mxu3 %v4779_v1 }
 0x317   :  { %1744 = vmatpush.bf16.msrb.mxu0 %v4780_v12  ;;  %1757 = vmatpush.bf16.msrb.mxu1 %v4781_v56 }
 0x318   :  { %1770 = vmatpush.bf16.msrb.mxu2 %v4782_v32  ;;  %1783 = vmatpush.bf16.msrb.mxu3 %v4783_v48  ;;  %v4803_v48 = vld [vmem:[#allocation46_spill] sm:$0xff] }
 0x31b   :  { %1745 = vmatpush.bf16.msrb.mxu0 %v4784_v38  ;;  %1758 = vmatpush.bf16.msrb.mxu1 %v4785_v13  ;;  %v4802_v38 = vld [vmem:[#allocation45_spill] sm:$0xff] }
 0x31c   :  { %1771 = vmatpush.bf16.msrb.mxu2 %v4786_v6  ;;  %1784 = vmatpush.bf16.msrb.mxu3 %v4787_v7  ;;  %v4800_v7 = vld [vmem:[#allocation43_spill] sm:$0xff]  ;;  %v4801_v6 = vld [vmem:[#allocation44_spill] sm:$0xff] }
 0x31f   :  { %1746 = vmatpush.bf16.msrb.mxu0 %v4788_v54  ;;  %1759 = vmatpush.bf16.msrb.mxu1 %v4789_v46  ;;  %v4799_v54 = vld [vmem:[#allocation34_spill] sm:$0xff] }
 0x320   :  { %1772 = vmatpush.bf16.msrb.mxu2 %v4790_v58  ;;  %1785 = vmatpush.bf16.msrb.mxu3 %v4791_v25 }
 0x323   :  { %1747 = vmatpush.bf16.msrb.mxu0 %v4792_v27  ;;  %1760 = vmatpush.bf16.msrb.mxu1 %v4793_v41 }
 0x324   :  { %1773 = vmatpush.bf16.msrb.mxu2 %v4794_v53  ;;  %1786 = vmatpush.bf16.msrb.mxu3 %v4795_v23 }
 0x327   :  { %1748 = vmatpush.bf16.msrb.mxu0 %v4796_v11  ;;  %1761 = vmatpush.bf16.msrb.mxu1 %v4797_v20 }
 0x328   :  { %1774 = vmatpush.bf16.msrb.mxu2 %v4798_v62  ;;  %1787 = vmatpush.bf16.msrb.mxu3 %v4799_v54 }
 0x365   :  { %v1535_v46 = vpop.f32.mrf.mxu0  ;;  %v1548_v58 = vpop.f32.mrf.mxu1 }
 0x366   :  { %v1578_v25 = vadd.f32 %v1535_v46, %v4800_v7  ;;  %v1579_v27 = vadd.f32 %v1548_v58, %v4801_v6 }
 0x368   :  { %v1639_v13 = vmul.f32 0.5, %v1578_v25  ;;  %v1643_v41 = vmul.f32 0.5, %v1579_v27  ;;  %v4804_v27 = vld [vmem:[#allocation11_spill] sm:$0xff] }
 0x36a   :  { %3280 = vtanh.f32 %v1639_v13 }
 0x36b   :  { %3282 = vtanh.f32 %v1643_v41 }
 0x36c   :  { %v1561_v53 = vpop.f32.mrf.mxu2  ;;  %v1574_v23 = vpop.f32.mrf.mxu3 }
 0x36d   :  { %v1580_v11 = vadd.f32 %v1561_v53, %v4802_v38  ;;  %v1581_v20 = vadd.f32 %v1574_v23, %v4803_v48  ;;  %v1537_v32 = vpop.f32.mrf.mxu0  ;;  %v1550_v62 = vpop.f32.mrf.mxu1  ;;  %v4805_v48 = vld [vmem:[#allocation79_spill] sm:$0xff]  ;;  %v4806_v23 = vld [vmem:[#allocation80_spill] sm:$0xff] }
 0x36f   :  { %3284 = vtanh.f32 %v1580_v11  ;;  %v1648_v54 = vmul.f32 0.5, %v1581_v20 }
 0x370   :  { %v3281_v56 = vpop.eup %3280 }
 0x371   :  { %v3283_v12 = vpop.eup %3282  ;;  %v1641_v1 = vmul.f32 0.5, %v3281_v56  ;;  %3286 = vtanh.f32 %v1648_v54 }
 0x372   :  { %v1645_v7 = vmul.f32 0.5, %v3283_v12 }
 0x373   :  { %v1642_v6 = vadd.f32 0.5, %v1641_v1 }
 0x374   :  { %v1646_v46 = vadd.f32 0.5, %v1645_v7  ;;  %v1563_v58 = vpop.f32.mrf.mxu2  ;;  %v1576_v13 = vpop.f32.mrf.mxu3 }
 0x375   :  { %v3285_v25 = vpop.eup %3284  ;;  %v4809_v58 = vld [vmem:[#allocation82_spill] sm:$0xff] }
 0x376   :  { %v1652_v41 = vmul.f32 %v1646_v46, %v4804_v27  ;;  %v1653_v28 = vmul.f32 %v3285_v25, %v1642_v6  ;;  %v1592_v38 = vpop.f32.mrf.mxu0  ;;  %v1605_v53 = vpop.f32.mrf.mxu1  ;;  %v4808_v46 = vld [vmem:[#allocation81_spill] sm:$0xff] }
 0x377   :  { %v1635_v32 = vadd.f32 %v1592_v38, %v4805_v48  ;;  %v1636_v11 = vadd.f32 %v1605_v53, %v4806_v23  ;;  %v3287_v20 = vpop.eup %3286 }
 0x378   :  { %v4258_v62 = vadd.f32 %v1653_v28, %v1652_v41  ;;  %v1650_v1 = vmul.f32 0.5, %v3287_v20 }
 0x379   :  { %v1657_v56 = vmul.f32 0.5, %v1635_v32  ;;  %v1661_v12 = vmul.f32 0.5, %v1636_v11 }
 0x37a   :  { %4807 = vst [vmem:[#allocation35_spill] sm:$0xff] %v4258_v62  ;;  %3288 = vtanh.f32 %v4258_v62  ;;  %v1651_v38 = vadd.f32 0.5, %v1650_v1 }
 0x37b   :  { %3290 = vtanh.f32 %v1657_v56 }
 0x37c   :  { %3292 = vtanh.f32 %v1661_v12 }
 0x37d   :  { %v1618_v54 = vpop.f32.mrf.mxu2  ;;  %v1631_v7 = vpop.f32.mrf.mxu3 }
 0x37e   :  { %v1637_v6 = vadd.f32 %v1618_v54, %v4808_v46  ;;  %v1638_v13 = vadd.f32 %v1631_v7, %v4809_v58  ;;  %v1594_v25 = vpop.f32.mrf.mxu0  ;;  %v1607_v27 = vpop.f32.mrf.mxu1 }
 0x37f   :  { %v4810_v25 = vld [vmem:[#allocation12_spill] sm:$0xff]  ;;  %v4811_v27 = vld [vmem:[#allocation13_spill] sm:$0xff] }
 0x380   :  { %v3289_v53 = vpop.eup %3288  ;;  %3294 = vtanh.f32 %v1637_v6  ;;  %v1666_v28 = vmul.f32 0.5, %v1638_v13 }
 0x381   :  { %v3291_v41 = vpop.eup %3290  ;;  %v1656_v48 = vmul.f32 %v3289_v53, %v1651_v38  ;;  %v4812_v38 = vld [vmem:[#allocation14_spill] sm:$0xff]  ;;  %v4813_v53 = vld [vmem:[#allocation15_spill] sm:$0xff] }
 0x382   :  { %v3293_v32 = vpop.eup %3292  ;;  %v1659_v23 = vmul.f32 0.5, %v3291_v41  ;;  %3296 = vtanh.f32 %v1666_v28  ;;  %v4814_v28 = vld [vmem:[#allocation16_spill] sm:$0xff]  ;;  %v4815_v41 = vld [vmem:[#allocation17_spill] sm:$0xff] }
 0x383   :  { %v1683_v11 = vpack.c.bf16 %v1656_v48, %v1656_v48  ;;  %v1663_v20 = vmul.f32 0.5, %v3293_v32  ;;  %v4816_v48 = vld [vmem:[#allocation18_spill] sm:$0xff]  ;;  %v4817_v32 = vld [vmem:[#allocation19_spill] sm:$0xff] }
 0x384   :  { %v1660_v56 = vadd.f32 0.5, %v1659_v23  ;;  %v4818_v23 = vld [vmem:[#allocation20_spill] sm:$0xff] }
 0x385   :  { %v1664_v12 = vadd.f32 0.5, %v1663_v20  ;;  %v1620_v62 = vpop.f32.mrf.mxu2  ;;  %v1633_v0 = vpop.f32.mrf.mxu3  ;;  %1692 = vmatmul.bf16.vlgmr.msra.gmra.mxu0 %v1683_v11  ;;  %1705 = vmatmul.bf16.vlgmr.msra.gmra.mxu1 %v1683_v11  ;;  %v4820_v20 = vld [vmem:[#allocation22_spill] sm:$0xff] }
 0x386   :  { %v3295_v54 = vpop.eup %3294  ;;  %1718 = vmatmul.bf16.vlgmr.msra.gmra.mxu2 %v1683_v11  ;;  %1731 = vmatmul.bf16.vlgmr.msra.gmra.mxu3 %v1683_v11  ;;  %v4819_v11 = vld [vmem:[#allocation21_spill] sm:$0xff] }
 0x387   :  { %v1670_v1 = vmul.f32 %v1664_v12, %v4188_v59  ;;  %v1671_v7 = vmul.f32 %v3295_v54, %v1660_v56  ;;  %1842 = vmatpush.bf16.msra.mxu0 %v3587_v63  ;;  %1855 = vmatpush.bf16.msra.mxu1 %v3589_v4  ;;  %v4821_v56 = vld [vmem:[#allocation23_spill] sm:$0xff]  ;;  %v4822_v12 = vld [vmem:[#allocation24_spill] sm:$0xff]  ;;  %v4823_v54 = vld [vmem:[#allocation25_spill] sm:$0xff] }
 0x388   :  { %1868 = vmatpush.bf16.msra.mxu2 %v3591_v5  ;;  %1881 = vmatpush.bf16.msra.mxu3 %v3594_v9  ;;  %v3297_v46 = vpop.eup %3296 }
 0x389   :  { %v4268_v6 = vadd.f32 %v1671_v7, %v1670_v1  ;;  %v1668_v0 = vmul.f32 0.5, %v3297_v46  ;;  %v4824_v1 = vld [vmem:[#allocation26_spill] sm:$0xff]  ;;  %v4825_v7 = vld [vmem:[#allocation27_spill] sm:$0xff]  ;;  %v4826_v46 = vld [vmem:[#allocation28_spill] sm:$0xff] }
 0x38b   :  { %3298 = vtanh.f32 %v4268_v6  ;;  %1843 = vmatpush.bf16.msra.mxu0 %v3598_v15  ;;  %1856 = vmatpush.bf16.msra.mxu1 %v3600_v16  ;;  %v1669_v59 = vadd.f32 0.5, %v1668_v0  ;;  %v4827_v0 = vld [vmem:[#allocation29_spill] sm:$0xff] }
 0x38c   :  { %1869 = vmatpush.bf16.msra.mxu2 %v3603_v21  ;;  %1882 = vmatpush.bf16.msra.mxu3 %v3605_v24 }
 0x38f   :  { %1844 = vmatpush.bf16.msra.mxu0 %v3625_v31  ;;  %1857 = vmatpush.bf16.msra.mxu1 %v3627_v34 }
 0x390   :  { %1870 = vmatpush.bf16.msra.mxu2 %v3629_v35  ;;  %1883 = vmatpush.bf16.msra.mxu3 %v3632_v39 }
 0x391   :  { %v3299_v62 = vpop.eup %3298 }
 0x392   :  { %v1674_v58 = vmul.f32 %v3299_v62, %v1669_v59  ;;  %v4828_v59 = vld [vmem:[#allocation30_spill] sm:$0xff]  ;;  %v4829_v62 = vld [vmem:[#allocation31_spill] sm:$0xff] }
 0x393   :  { %1845 = vmatpush.bf16.msra.mxu0 %v3636_v44  ;;  %1858 = vmatpush.bf16.msra.mxu1 %v3638_v45 }
 0x394   :  { %v1740_v13 = vpack.c.bf16 %v1674_v58, %v1674_v58  ;;  %1871 = vmatpush.bf16.msra.mxu2 %v3641_v49  ;;  %1884 = vmatpush.bf16.msra.mxu3 %v3643_v51  ;;  %v4830_v58 = vld [vmem:[#allocation32_spill] sm:$0xff] }
 0x396   :  { %1749 = vmatmul.bf16.vlgmr.msrb.gmra.mxu0 %v1740_v13  ;;  %1762 = vmatmul.bf16.vlgmr.msrb.gmra.mxu1 %v1740_v13 }
 0x397   :  { %1775 = vmatmul.bf16.vlgmr.msrb.gmra.mxu2 %v1740_v13  ;;  %1788 = vmatmul.bf16.vlgmr.msrb.gmra.mxu3 %v1740_v13  ;;  %v4831_v13 = vld [vmem:[#allocation33_spill] sm:$0xff] }
 0x398   :  { %1846 = vmatpush.bf16.msra.mxu0 %v3657_v55  ;;  %1859 = vmatpush.bf16.msra.mxu1 %v3659_v60 }
 0x399   :  { %1872 = vmatpush.bf16.msra.mxu2 %v3661_v61  ;;  %1885 = vmatpush.bf16.msra.mxu3 %v3664_v3 }
 0x39c   :  { %1847 = vmatpush.bf16.msra.mxu0 %v3668_v8  ;;  %1860 = vmatpush.bf16.msra.mxu1 %v3670_v10 }
 0x39d   :  { %1873 = vmatpush.bf16.msra.mxu2 %v3673_v14  ;;  %1886 = vmatpush.bf16.msra.mxu3 %v3675_v22 }
 0x3a0   :  { %1848 = vmatpush.bf16.msra.mxu0 %v3678_v29  ;;  %1861 = vmatpush.bf16.msra.mxu1 %v3682_v33 }
 0x3a1   :  { %1874 = vmatpush.bf16.msra.mxu2 %v3684_v36  ;;  %1887 = vmatpush.bf16.msra.mxu3 %v3687_v37 }
 0x3a4   :  { %1849 = vmatpush.bf16.msra.mxu0 %v3693_v42  ;;  %1862 = vmatpush.bf16.msra.mxu1 %v3699_v50 }
 0x3a5   :  { %1875 = vmatpush.bf16.msra.mxu2 %v3701_v52  ;;  %1888 = vmatpush.bf16.msra.mxu3 %v3707_v57 }
 0x3a8   :  { %1899 = vmatpush.bf16.msrb.mxu0 %v3711_v2  ;;  %1912 = vmatpush.bf16.msrb.mxu1 %v3713_v26 }
 0x3a9   :  { %1925 = vmatpush.bf16.msrb.mxu2 %v3717_v43  ;;  %1938 = vmatpush.bf16.msrb.mxu3 %v3721_v18 }
 0x3ac   :  { %1900 = vmatpush.bf16.msrb.mxu0 %v3723_v19  ;;  %1913 = vmatpush.bf16.msrb.mxu1 %v3726_v30 }
 0x3ad   :  { %1926 = vmatpush.bf16.msrb.mxu2 %v3729_v40  ;;  %1939 = vmatpush.bf16.msrb.mxu3 %v4710_v47 }
 0x3b0   :  { %1901 = vmatpush.bf16.msrb.mxu0 %v4711_v17  ;;  %1914 = vmatpush.bf16.msrb.mxu1 %v4810_v25 }
 0x3b1   :  { %1927 = vmatpush.bf16.msrb.mxu2 %v4811_v27  ;;  %1940 = vmatpush.bf16.msrb.mxu3 %v4812_v38 }
 0x3b4   :  { %1902 = vmatpush.bf16.msrb.mxu0 %v4813_v53  ;;  %1915 = vmatpush.bf16.msrb.mxu1 %v4814_v28 }
 0x3b5   :  { %1928 = vmatpush.bf16.msrb.mxu2 %v4815_v41  ;;  %1941 = vmatpush.bf16.msrb.mxu3 %v4816_v48  ;;  %v4836_v48 = vld [vmem:[#allocation50_spill] sm:$0xff] }
 0x3b8   :  { %1903 = vmatpush.bf16.msrb.mxu0 %v4817_v32  ;;  %1916 = vmatpush.bf16.msrb.mxu1 %v4818_v23  ;;  %v4835_v32 = vld [vmem:[#allocation49_spill] sm:$0xff] }
 0x3b9   :  { %1929 = vmatpush.bf16.msrb.mxu2 %v4819_v11  ;;  %1942 = vmatpush.bf16.msrb.mxu3 %v4820_v20  ;;  %v4833_v20 = vld [vmem:[#allocation47_spill] sm:$0xff]  ;;  %v4834_v11 = vld [vmem:[#allocation48_spill] sm:$0xff] }
 0x3bc   :  { %1904 = vmatpush.bf16.msrb.mxu0 %v4821_v56  ;;  %1917 = vmatpush.bf16.msrb.mxu1 %v4822_v12  ;;  %v4832_v56 = vld [vmem:[#allocation34_spill] sm:$0xff] }
 0x3bd   :  { %1930 = vmatpush.bf16.msrb.mxu2 %v4823_v54  ;;  %1943 = vmatpush.bf16.msrb.mxu3 %v4824_v1 }
 0x3c0   :  { %1905 = vmatpush.bf16.msrb.mxu0 %v4825_v7  ;;  %1918 = vmatpush.bf16.msrb.mxu1 %v4826_v46 }
 0x3c1   :  { %1931 = vmatpush.bf16.msrb.mxu2 %v4827_v0  ;;  %1944 = vmatpush.bf16.msrb.mxu3 %v4828_v59 }
 0x3c4   :  { %1906 = vmatpush.bf16.msrb.mxu0 %v4829_v62  ;;  %1919 = vmatpush.bf16.msrb.mxu1 %v4830_v58 }
 0x3c5   :  { %1932 = vmatpush.bf16.msrb.mxu2 %v4831_v13  ;;  %1945 = vmatpush.bf16.msrb.mxu3 %v4832_v56 }
 0x402   :  { %v1693_v12 = vpop.f32.mrf.mxu0  ;;  %v1706_v54 = vpop.f32.mrf.mxu1 }
 0x403   :  { %v1736_v1 = vadd.f32 %v1693_v12, %v4833_v20  ;;  %v1737_v7 = vadd.f32 %v1706_v54, %v4834_v11 }
 0x405   :  { %v1797_v23 = vmul.f32 0.5, %v1736_v1  ;;  %v1801_v46 = vmul.f32 0.5, %v1737_v7  ;;  %v4837_v7 = vld [vmem:[#allocation35_spill] sm:$0xff] }
 0x407   :  { %3300 = vtanh.f32 %v1797_v23 }
 0x408   :  { %3302 = vtanh.f32 %v1801_v46 }
 0x409   :  { %v1719_v0 = vpop.f32.mrf.mxu2  ;;  %v1732_v59 = vpop.f32.mrf.mxu3 }
 0x40a   :  { %v1738_v62 = vadd.f32 %v1719_v0, %v4835_v32  ;;  %v1739_v58 = vadd.f32 %v1732_v59, %v4836_v48  ;;  %v1695_v41 = vpop.f32.mrf.mxu0  ;;  %v1708_v13 = vpop.f32.mrf.mxu1  ;;  %v4838_v48 = vld [vmem:[#allocation75_spill] sm:$0xff]  ;;  %v4839_v59 = vld [vmem:[#allocation76_spill] sm:$0xff] }
 0x40c   :  { %3304 = vtanh.f32 %v1738_v62  ;;  %v1806_v56 = vmul.f32 0.5, %v1739_v58 }
 0x40d   :  { %v3301_v28 = vpop.eup %3300 }
 0x40e   :  { %v3303_v53 = vpop.eup %3302  ;;  %v1799_v38 = vmul.f32 0.5, %v3301_v28  ;;  %3306 = vtanh.f32 %v1806_v56 }
 0x40f   :  { %v1803_v20 = vmul.f32 0.5, %v3303_v53 }
 0x410   :  { %v1800_v11 = vadd.f32 0.5, %v1799_v38 }
 0x411   :  { %v1804_v12 = vadd.f32 0.5, %v1803_v20  ;;  %v1721_v54 = vpop.f32.mrf.mxu2  ;;  %v1734_v23 = vpop.f32.mrf.mxu3 }
 0x412   :  { %v3305_v1 = vpop.eup %3304  ;;  %v4842_v54 = vld [vmem:[#allocation78_spill] sm:$0xff] }
 0x413   :  { %v1810_v46 = vmul.f32 %v1804_v12, %v4837_v7  ;;  %v1811_v27 = vmul.f32 %v3305_v1, %v1800_v11  ;;  %v1750_v32 = vpop.f32.mrf.mxu0  ;;  %v1763_v0 = vpop.f32.mrf.mxu1  ;;  %v4841_v12 = vld [vmem:[#allocation77_spill] sm:$0xff] }
 0x414   :  { %v1793_v41 = vadd.f32 %v1750_v32, %v4838_v48  ;;  %v1794_v62 = vadd.f32 %v1763_v0, %v4839_v59  ;;  %v3307_v58 = vpop.eup %3306 }
 0x415   :  { %v4338_v13 = vadd.f32 %v1811_v27, %v1810_v46  ;;  %v1808_v38 = vmul.f32 0.5, %v3307_v58 }
 0x416   :  { %v1815_v28 = vmul.f32 0.5, %v1793_v41  ;;  %v1819_v53 = vmul.f32 0.5, %v1794_v62 }
 0x417   :  { %4840 = vst [vmem:[#allocation36_spill] sm:$0xff] %v4338_v13  ;;  %3308 = vtanh.f32 %v4338_v13  ;;  %v1809_v32 = vadd.f32 0.5, %v1808_v38 }
 0x418   :  { %3310 = vtanh.f32 %v1815_v28 }
 0x419   :  { %3312 = vtanh.f32 %v1819_v53 }
 0x41a   :  { %v1776_v56 = vpop.f32.mrf.mxu2  ;;  %v1789_v20 = vpop.f32.mrf.mxu3 }
 0x41b   :  { %v1795_v11 = vadd.f32 %v1776_v56, %v4841_v12  ;;  %v1796_v23 = vadd.f32 %v1789_v20, %v4842_v54  ;;  %v1752_v1 = vpop.f32.mrf.mxu0  ;;  %v1765_v7 = vpop.f32.mrf.mxu1 }
 0x41c   :  { %v4843_v1 = vld [vmem:[#allocation12_spill] sm:$0xff]  ;;  %v4844_v7 = vld [vmem:[#allocation13_spill] sm:$0xff] }
 0x41d   :  { %v3309_v0 = vpop.eup %3308  ;;  %3314 = vtanh.f32 %v1795_v11  ;;  %v1824_v27 = vmul.f32 0.5, %v1796_v23 }
 0x41e   :  { %v3311_v46 = vpop.eup %3310  ;;  %v1814_v48 = vmul.f32 %v3309_v0, %v1809_v32  ;;  %v4845_v32 = vld [vmem:[#allocation14_spill] sm:$0xff]  ;;  %v4846_v0 = vld [vmem:[#allocation15_spill] sm:$0xff] }
 0x41f   :  { %v3313_v41 = vpop.eup %3312  ;;  %v1817_v59 = vmul.f32 0.5, %v3311_v46  ;;  %3316 = vtanh.f32 %v1824_v27  ;;  %v4847_v27 = vld [vmem:[#allocation16_spill] sm:$0xff]  ;;  %v4848_v46 = vld [vmem:[#allocation17_spill] sm:$0xff] }
 0x420   :  { %v1841_v62 = vpack.c.bf16 %v1814_v48, %v1814_v48  ;;  %v1821_v58 = vmul.f32 0.5, %v3313_v41  ;;  %v4849_v48 = vld [vmem:[#allocation18_spill] sm:$0xff]  ;;  %v4850_v41 = vld [vmem:[#allocation19_spill] sm:$0xff] }
 0x421   :  { %v1818_v28 = vadd.f32 0.5, %v1817_v59  ;;  %v4851_v59 = vld [vmem:[#allocation20_spill] sm:$0xff] }
 0x422   :  { %v1822_v53 = vadd.f32 0.5, %v1821_v58  ;;  %v1778_v13 = vpop.f32.mrf.mxu2  ;;  %v1791_v25 = vpop.f32.mrf.mxu3  ;;  %1850 = vmatmul.bf16.vlgmr.msra.gmra.mxu0 %v1841_v62  ;;  %1863 = vmatmul.bf16.vlgmr.msra.gmra.mxu1 %v1841_v62  ;;  %v4853_v58 = vld [vmem:[#allocation22_spill] sm:$0xff] }
 0x423   :  { %v3315_v56 = vpop.eup %3314  ;;  %1876 = vmatmul.bf16.vlgmr.msra.gmra.mxu2 %v1841_v62  ;;  %1889 = vmatmul.bf16.vlgmr.msra.gmra.mxu3 %v1841_v62  ;;  %v4852_v62 = vld [vmem:[#allocation21_spill] sm:$0xff] }
 0x424   :  { %v1828_v38 = vmul.f32 %v1822_v53, %v4268_v6  ;;  %v1829_v20 = vmul.f32 %v3315_v56, %v1818_v28  ;;  %2000 = vmatpush.bf16.msra.mxu0 %v3587_v63  ;;  %2013 = vmatpush.bf16.msra.mxu1 %v3589_v4  ;;  %v4854_v28 = vld [vmem:[#allocation23_spill] sm:$0xff]  ;;  %v4855_v53 = vld [vmem:[#allocation24_spill] sm:$0xff]  ;;  %v4856_v56 = vld [vmem:[#allocation25_spill] sm:$0xff] }
 0x425   :  { %2026 = vmatpush.bf16.msra.mxu2 %v3591_v5  ;;  %2039 = vmatpush.bf16.msra.mxu3 %v3594_v9  ;;  %v3317_v12 = vpop.eup %3316 }
 0x426   :  { %v4348_v11 = vadd.f32 %v1829_v20, %v1828_v38  ;;  %v1826_v25 = vmul.f32 0.5, %v3317_v12  ;;  %v4857_v38 = vld [vmem:[#allocation26_spill] sm:$0xff]  ;;  %v4858_v20 = vld [vmem:[#allocation27_spill] sm:$0xff]  ;;  %v4859_v12 = vld [vmem:[#allocation28_spill] sm:$0xff] }
 0x428   :  { %3318 = vtanh.f32 %v4348_v11  ;;  %2001 = vmatpush.bf16.msra.mxu0 %v3598_v15  ;;  %2014 = vmatpush.bf16.msra.mxu1 %v3600_v16  ;;  %v1827_v6 = vadd.f32 0.5, %v1826_v25  ;;  %v4860_v25 = vld [vmem:[#allocation29_spill] sm:$0xff] }
 0x429   :  { %2027 = vmatpush.bf16.msra.mxu2 %v3603_v21  ;;  %2040 = vmatpush.bf16.msra.mxu3 %v3605_v24 }
 0x42c   :  { %2002 = vmatpush.bf16.msra.mxu0 %v3625_v31  ;;  %2015 = vmatpush.bf16.msra.mxu1 %v3627_v34 }
 0x42d   :  { %2028 = vmatpush.bf16.msra.mxu2 %v3629_v35  ;;  %2041 = vmatpush.bf16.msra.mxu3 %v3632_v39 }
 0x42e   :  { %v3319_v13 = vpop.eup %3318 }
 0x42f   :  { %v1832_v54 = vmul.f32 %v3319_v13, %v1827_v6  ;;  %v4861_v6 = vld [vmem:[#allocation30_spill] sm:$0xff]  ;;  %v4862_v13 = vld [vmem:[#allocation31_spill] sm:$0xff] }
 0x430   :  { %2003 = vmatpush.bf16.msra.mxu0 %v3636_v44  ;;  %2016 = vmatpush.bf16.msra.mxu1 %v3638_v45 }
 0x431   :  { %v1898_v23 = vpack.c.bf16 %v1832_v54, %v1832_v54  ;;  %2029 = vmatpush.bf16.msra.mxu2 %v3641_v49  ;;  %2042 = vmatpush.bf16.msra.mxu3 %v3643_v51  ;;  %v4863_v54 = vld [vmem:[#allocation32_spill] sm:$0xff] }
 0x433   :  { %1907 = vmatmul.bf16.vlgmr.msrb.gmra.mxu0 %v1898_v23  ;;  %1920 = vmatmul.bf16.vlgmr.msrb.gmra.mxu1 %v1898_v23 }
 0x434   :  { %1933 = vmatmul.bf16.vlgmr.msrb.gmra.mxu2 %v1898_v23  ;;  %1946 = vmatmul.bf16.vlgmr.msrb.gmra.mxu3 %v1898_v23  ;;  %v4864_v23 = vld [vmem:[#allocation33_spill] sm:$0xff] }
 0x435   :  { %2004 = vmatpush.bf16.msra.mxu0 %v3657_v55  ;;  %2017 = vmatpush.bf16.msra.mxu1 %v3659_v60 }
 0x436   :  { %2030 = vmatpush.bf16.msra.mxu2 %v3661_v61  ;;  %2043 = vmatpush.bf16.msra.mxu3 %v3664_v3 }
 0x439   :  { %2005 = vmatpush.bf16.msra.mxu0 %v3668_v8  ;;  %2018 = vmatpush.bf16.msra.mxu1 %v3670_v10 }
 0x43a   :  { %2031 = vmatpush.bf16.msra.mxu2 %v3673_v14  ;;  %2044 = vmatpush.bf16.msra.mxu3 %v3675_v22 }
 0x43d   :  { %2006 = vmatpush.bf16.msra.mxu0 %v3678_v29  ;;  %2019 = vmatpush.bf16.msra.mxu1 %v3682_v33 }
 0x43e   :  { %2032 = vmatpush.bf16.msra.mxu2 %v3684_v36  ;;  %2045 = vmatpush.bf16.msra.mxu3 %v3687_v37 }
 0x441   :  { %2007 = vmatpush.bf16.msra.mxu0 %v3693_v42  ;;  %2020 = vmatpush.bf16.msra.mxu1 %v3699_v50 }
 0x442   :  { %2033 = vmatpush.bf16.msra.mxu2 %v3701_v52  ;;  %2046 = vmatpush.bf16.msra.mxu3 %v3707_v57 }
 0x445   :  { %2057 = vmatpush.bf16.msrb.mxu0 %v3711_v2  ;;  %2070 = vmatpush.bf16.msrb.mxu1 %v3713_v26 }
 0x446   :  { %2083 = vmatpush.bf16.msrb.mxu2 %v3717_v43  ;;  %2096 = vmatpush.bf16.msrb.mxu3 %v3721_v18 }
 0x449   :  { %2058 = vmatpush.bf16.msrb.mxu0 %v3723_v19  ;;  %2071 = vmatpush.bf16.msrb.mxu1 %v3726_v30 }
 0x44a   :  { %2084 = vmatpush.bf16.msrb.mxu2 %v3729_v40  ;;  %2097 = vmatpush.bf16.msrb.mxu3 %v4710_v47 }
 0x44d   :  { %2059 = vmatpush.bf16.msrb.mxu0 %v4711_v17  ;;  %2072 = vmatpush.bf16.msrb.mxu1 %v4843_v1 }
 0x44e   :  { %2085 = vmatpush.bf16.msrb.mxu2 %v4844_v7  ;;  %2098 = vmatpush.bf16.msrb.mxu3 %v4845_v32 }
 0x451   :  { %2060 = vmatpush.bf16.msrb.mxu0 %v4846_v0  ;;  %2073 = vmatpush.bf16.msrb.mxu1 %v4847_v27 }
 0x452   :  { %2086 = vmatpush.bf16.msrb.mxu2 %v4848_v46  ;;  %2099 = vmatpush.bf16.msrb.mxu3 %v4849_v48  ;;  %v4869_v48 = vld [vmem:[#allocation54_spill] sm:$0xff] }
 0x455   :  { %2061 = vmatpush.bf16.msrb.mxu0 %v4850_v41  ;;  %2074 = vmatpush.bf16.msrb.mxu1 %v4851_v59  ;;  %v4868_v41 = vld [vmem:[#allocation53_spill] sm:$0xff] }
 0x456   :  { %2087 = vmatpush.bf16.msrb.mxu2 %v4852_v62  ;;  %2100 = vmatpush.bf16.msrb.mxu3 %v4853_v58  ;;  %v4866_v58 = vld [vmem:[#allocation51_spill] sm:$0xff]  ;;  %v4867_v62 = vld [vmem:[#allocation52_spill] sm:$0xff] }
 0x459   :  { %2062 = vmatpush.bf16.msrb.mxu0 %v4854_v28  ;;  %2075 = vmatpush.bf16.msrb.mxu1 %v4855_v53  ;;  %v4865_v28 = vld [vmem:[#allocation34_spill] sm:$0xff] }
 0x45a   :  { %2088 = vmatpush.bf16.msrb.mxu2 %v4856_v56  ;;  %2101 = vmatpush.bf16.msrb.mxu3 %v4857_v38 }
 0x45d   :  { %2063 = vmatpush.bf16.msrb.mxu0 %v4858_v20  ;;  %2076 = vmatpush.bf16.msrb.mxu1 %v4859_v12 }
 0x45e   :  { %2089 = vmatpush.bf16.msrb.mxu2 %v4860_v25  ;;  %2102 = vmatpush.bf16.msrb.mxu3 %v4861_v6 }
 0x461   :  { %2064 = vmatpush.bf16.msrb.mxu0 %v4862_v13  ;;  %2077 = vmatpush.bf16.msrb.mxu1 %v4863_v54 }
 0x462   :  { %2090 = vmatpush.bf16.msrb.mxu2 %v4864_v23  ;;  %2103 = vmatpush.bf16.msrb.mxu3 %v4865_v28 }
 0x49f   :  { %v1851_v53 = vpop.f32.mrf.mxu0  ;;  %v1864_v56 = vpop.f32.mrf.mxu1 }
 0x4a0   :  { %v1894_v38 = vadd.f32 %v1851_v53, %v4866_v58  ;;  %v1895_v20 = vadd.f32 %v1864_v56, %v4867_v62 }
 0x4a2   :  { %v1955_v59 = vmul.f32 0.5, %v1894_v38  ;;  %v1959_v12 = vmul.f32 0.5, %v1895_v20  ;;  %v4870_v20 = vld [vmem:[#allocation36_spill] sm:$0xff] }
 0x4a4   :  { %3320 = vtanh.f32 %v1955_v59 }
 0x4a5   :  { %3322 = vtanh.f32 %v1959_v12 }
 0x4a6   :  { %v1877_v25 = vpop.f32.mrf.mxu2  ;;  %v1890_v6 = vpop.f32.mrf.mxu3 }
 0x4a7   :  { %v1896_v13 = vadd.f32 %v1877_v25, %v4868_v41  ;;  %v1897_v54 = vadd.f32 %v1890_v6, %v4869_v48  ;;  %v1853_v46 = vpop.f32.mrf.mxu0  ;;  %v1866_v23 = vpop.f32.mrf.mxu1  ;;  %v4871_v48 = vld [vmem:[#allocation71_spill] sm:$0xff]  ;;  %v4872_v6 = vld [vmem:[#allocation72_spill] sm:$0xff] }
 0x4a9   :  { %3324 = vtanh.f32 %v1896_v13  ;;  %v1964_v28 = vmul.f32 0.5, %v1897_v54 }
 0x4aa   :  { %v3321_v27 = vpop.eup %3320 }
 0x4ab   :  { %v3323_v0 = vpop.eup %3322  ;;  %v1957_v32 = vmul.f32 0.5, %v3321_v27  ;;  %3326 = vtanh.f32 %v1964_v28 }
 0x4ac   :  { %v1961_v58 = vmul.f32 0.5, %v3323_v0 }
 0x4ad   :  { %v1958_v62 = vadd.f32 0.5, %v1957_v32 }
 0x4ae   :  { %v1962_v53 = vadd.f32 0.5, %v1961_v58  ;;  %v1879_v56 = vpop.f32.mrf.mxu2  ;;  %v1892_v59 = vpop.f32.mrf.mxu3 }
 0x4af   :  { %v3325_v38 = vpop.eup %3324  ;;  %v4875_v56 = vld [vmem:[#allocation74_spill] sm:$0xff] }
 0x4b0   :  { %v1968_v12 = vmul.f32 %v1962_v53, %v4870_v20  ;;  %v1969_v7 = vmul.f32 %v3325_v38, %v1958_v62  ;;  %v1908_v41 = vpop.f32.mrf.mxu0  ;;  %v1921_v25 = vpop.f32.mrf.mxu1  ;;  %v4874_v53 = vld [vmem:[#allocation73_spill] sm:$0xff] }
 0x4b1   :  { %v1951_v46 = vadd.f32 %v1908_v41, %v4871_v48  ;;  %v1952_v13 = vadd.f32 %v1921_v25, %v4872_v6  ;;  %v3327_v54 = vpop.eup %3326 }
 0x4b2   :  { %v4418_v23 = vadd.f32 %v1969_v7, %v1968_v12  ;;  %v1966_v32 = vmul.f32 0.5, %v3327_v54 }
 0x4b3   :  { %v1973_v27 = vmul.f32 0.5, %v1951_v46  ;;  %v1977_v0 = vmul.f32 0.5, %v1952_v13 }
 0x4b4   :  { %4873 = vst [vmem:[#allocation37_spill] sm:$0xff] %v4418_v23  ;;  %3328 = vtanh.f32 %v4418_v23  ;;  %v1967_v41 = vadd.f32 0.5, %v1966_v32 }
 0x4b5   :  { %3330 = vtanh.f32 %v1973_v27 }
 0x4b6   :  { %3332 = vtanh.f32 %v1977_v0 }
 0x4b7   :  { %v1934_v28 = vpop.f32.mrf.mxu2  ;;  %v1947_v58 = vpop.f32.mrf.mxu3 }
 0x4b8   :  { %v1953_v62 = vadd.f32 %v1934_v28, %v4874_v53  ;;  %v1954_v59 = vadd.f32 %v1947_v58, %v4875_v56  ;;  %v1910_v38 = vpop.f32.mrf.mxu0  ;;  %v1923_v20 = vpop.f32.mrf.mxu1 }
 0x4ba   :  { %v3329_v25 = vpop.eup %3328  ;;  %3334 = vtanh.f32 %v1953_v62  ;;  %v1982_v7 = vmul.f32 0.5, %v1954_v59 }
 0x4bb   :  { %v3331_v12 = vpop.eup %3330  ;;  %v1972_v48 = vmul.f32 %v3329_v25, %v1967_v41 }
 0x4bc   :  { %v3333_v46 = vpop.eup %3332  ;;  %v1975_v6 = vmul.f32 0.5, %v3331_v12  ;;  %3336 = vtanh.f32 %v1982_v7 }
 0x4bd   :  { %v1999_v13 = vpack.c.bf16 %v1972_v48, %v1972_v48  ;;  %v1979_v54 = vmul.f32 0.5, %v3333_v46 }
 0x4be   :  { %v1976_v27 = vadd.f32 0.5, %v1975_v6  ;;  %v4903_v6 = vld [vmem:[#allocation37_spill] sm:$0xff] }
 0x4bf   :  { %v1980_v0 = vadd.f32 0.5, %v1979_v54  ;;  %v1936_v23 = vpop.f32.mrf.mxu2  ;;  %v1949_v1 = vpop.f32.mrf.mxu3  ;;  %2008 = vmatmul.bf16.vlgmr.msra.gmra.mxu0 %v1999_v13  ;;  %2021 = vmatmul.bf16.vlgmr.msra.gmra.mxu1 %v1999_v13 }
 0x4c0   :  { %v3335_v28 = vpop.eup %3334  ;;  %2034 = vmatmul.bf16.vlgmr.msra.gmra.mxu2 %v1999_v13  ;;  %2047 = vmatmul.bf16.vlgmr.msra.gmra.mxu3 %v1999_v13 }
 0x4c1   :  { %v1986_v32 = vmul.f32 %v1980_v0, %v4348_v11  ;;  %v1987_v58 = vmul.f32 %v3335_v28, %v1976_v27  ;;  %2158 = vmatpush.bf16.msra.mxu0 %v3587_v63  ;;  %2171 = vmatpush.bf16.msra.mxu1 %v3589_v4  ;;  %v4904_v28 = vld [vmem:[#allocation67_spill] sm:$0xff] }
 0x4c2   :  { %2184 = vmatpush.bf16.msra.mxu2 %v3591_v5  ;;  %2197 = vmatpush.bf16.msra.mxu3 %v3594_v9  ;;  %v3337_v53 = vpop.eup %3336 }
 0x4c3   :  { %v4428_v62 = vadd.f32 %v1987_v58, %v1986_v32  ;;  %v1984_v1 = vmul.f32 0.5, %v3337_v53  ;;  %v4905_v58 = vld [vmem:[#allocation68_spill] sm:$0xff] }
 0x4c5   :  { %3338 = vtanh.f32 %v4428_v62  ;;  %2159 = vmatpush.bf16.msra.mxu0 %v3598_v15  ;;  %2172 = vmatpush.bf16.msra.mxu1 %v3600_v16  ;;  %v1985_v63 = vadd.f32 0.5, %v1984_v1  ;;  %v4876_v15 = vld [vmem:[#allocation12_spill] sm:$0xff]  ;;  %v4877_v16 = vld [vmem:[#allocation13_spill] sm:$0xff] }
 0x4c6   :  { %2185 = vmatpush.bf16.msra.mxu2 %v3603_v21  ;;  %2198 = vmatpush.bf16.msra.mxu3 %v3605_v24  ;;  %v4878_v21 = vld [vmem:[#allocation14_spill] sm:$0xff]  ;;  %v4879_v24 = vld [vmem:[#allocation15_spill] sm:$0xff] }
 0x4c9   :  { %2160 = vmatpush.bf16.msra.mxu0 %v3625_v31  ;;  %2173 = vmatpush.bf16.msra.mxu1 %v3627_v34  ;;  %v4880_v31 = vld [vmem:[#allocation16_spill] sm:$0xff]  ;;  %v4881_v34 = vld [vmem:[#allocation17_spill] sm:$0xff] }
 0x4ca   :  { %2186 = vmatpush.bf16.msra.mxu2 %v3629_v35  ;;  %2199 = vmatpush.bf16.msra.mxu3 %v3632_v39  ;;  %v4882_v35 = vld [vmem:[#allocation18_spill] sm:$0xff]  ;;  %v4883_v39 = vld [vmem:[#allocation19_spill] sm:$0xff] }
 0x4cb   :  { %v3339_v4 = vpop.eup %3338 }
 0x4cc   :  { %v1990_v5 = vmul.f32 %v3339_v4, %v1985_v63 }
 0x4cd   :  { %2161 = vmatpush.bf16.msra.mxu0 %v3636_v44  ;;  %2174 = vmatpush.bf16.msra.mxu1 %v3638_v45  ;;  %v4884_v44 = vld [vmem:[#allocation20_spill] sm:$0xff]  ;;  %v4885_v45 = vld [vmem:[#allocation21_spill] sm:$0xff] }
 0x4ce   :  { %v2056_v9 = vpack.c.bf16 %v1990_v5, %v1990_v5  ;;  %2187 = vmatpush.bf16.msra.mxu2 %v3641_v49  ;;  %2200 = vmatpush.bf16.msra.mxu3 %v3643_v51  ;;  %v4886_v49 = vld [vmem:[#allocation22_spill] sm:$0xff]  ;;  %v4887_v51 = vld [vmem:[#allocation23_spill] sm:$0xff] }
 0x4d0   :  { %2065 = vmatmul.bf16.vlgmr.msrb.gmra.mxu0 %v2056_v9  ;;  %2078 = vmatmul.bf16.vlgmr.msrb.gmra.mxu1 %v2056_v9 }
 0x4d1   :  { %2091 = vmatmul.bf16.vlgmr.msrb.gmra.mxu2 %v2056_v9  ;;  %2104 = vmatmul.bf16.vlgmr.msrb.gmra.mxu3 %v2056_v9 }
 0x4d2   :  { %2162 = vmatpush.bf16.msra.mxu0 %v3657_v55  ;;  %2175 = vmatpush.bf16.msra.mxu1 %v3659_v60  ;;  %v4888_v55 = vld [vmem:[#allocation24_spill] sm:$0xff]  ;;  %v4889_v60 = vld [vmem:[#allocation25_spill] sm:$0xff] }
 0x4d3   :  { %2188 = vmatpush.bf16.msra.mxu2 %v3661_v61  ;;  %2201 = vmatpush.bf16.msra.mxu3 %v3664_v3  ;;  %v4890_v61 = vld [vmem:[#allocation26_spill] sm:$0xff]  ;;  %v4891_v3 = vld [vmem:[#allocation27_spill] sm:$0xff] }
 0x4d6   :  { %2163 = vmatpush.bf16.msra.mxu0 %v3668_v8  ;;  %2176 = vmatpush.bf16.msra.mxu1 %v3670_v10  ;;  %v4892_v8 = vld [vmem:[#allocation28_spill] sm:$0xff]  ;;  %v4893_v10 = vld [vmem:[#allocation29_spill] sm:$0xff] }
 0x4d7   :  { %2189 = vmatpush.bf16.msra.mxu2 %v3673_v14  ;;  %2202 = vmatpush.bf16.msra.mxu3 %v3675_v22  ;;  %v4894_v14 = vld [vmem:[#allocation30_spill] sm:$0xff]  ;;  %v4895_v22 = vld [vmem:[#allocation31_spill] sm:$0xff] }
 0x4da   :  { %2164 = vmatpush.bf16.msra.mxu0 %v3678_v29  ;;  %2177 = vmatpush.bf16.msra.mxu1 %v3682_v33  ;;  %v4896_v29 = vld [vmem:[#allocation32_spill] sm:$0xff]  ;;  %v4897_v33 = vld [vmem:[#allocation33_spill] sm:$0xff] }
 0x4db   :  { %2190 = vmatpush.bf16.msra.mxu2 %v3684_v36  ;;  %2203 = vmatpush.bf16.msra.mxu3 %v3687_v37  ;;  %v4898_v36 = vld [vmem:[#allocation34_spill] sm:$0xff] }
 0x4de   :  { %2165 = vmatpush.bf16.msra.mxu0 %v3693_v42  ;;  %2178 = vmatpush.bf16.msra.mxu1 %v3699_v50  ;;  %v4899_v50 = vld [vmem:[#allocation55_spill] sm:$0xff] }
 0x4df   :  { %2191 = vmatpush.bf16.msra.mxu2 %v3701_v52  ;;  %2204 = vmatpush.bf16.msra.mxu3 %v3707_v57  ;;  %v4900_v57 = vld [vmem:[#allocation56_spill] sm:$0xff] }
 0x4e2   :  { %2215 = vmatpush.bf16.msrb.mxu0 %v3711_v2  ;;  %2228 = vmatpush.bf16.msrb.mxu1 %v3713_v26 }
 0x4e3   :  { %2241 = vmatpush.bf16.msrb.mxu2 %v3717_v43  ;;  %2254 = vmatpush.bf16.msrb.mxu3 %v3721_v18 }
 0x4e6   :  { %2216 = vmatpush.bf16.msrb.mxu0 %v3723_v19  ;;  %2229 = vmatpush.bf16.msrb.mxu1 %v3726_v30  ;;  %v4901_v30 = vld [vmem:[#allocation57_spill] sm:$0xff] }
 0x4e7   :  { %2242 = vmatpush.bf16.msrb.mxu2 %v3729_v40  ;;  %2255 = vmatpush.bf16.msrb.mxu3 %v4710_v47  ;;  %v4902_v47 = vld [vmem:[#allocation58_spill] sm:$0xff] }
 0x4ea   :  { %2217 = vmatpush.bf16.msrb.mxu0 %v4711_v17  ;;  %2230 = vmatpush.bf16.msrb.mxu1 %v4876_v15 }
 0x4eb   :  { %2243 = vmatpush.bf16.msrb.mxu2 %v4877_v16  ;;  %2256 = vmatpush.bf16.msrb.mxu3 %v4878_v21  ;;  %v4906_v21 = vld [vmem:[#allocation69_spill] sm:$0xff] }
 0x4ee   :  { %2218 = vmatpush.bf16.msrb.mxu0 %v4879_v24  ;;  %2231 = vmatpush.bf16.msrb.mxu1 %v4880_v31  ;;  %v4907_v31 = vld [vmem:[#allocation70_spill] sm:$0xff] }
 0x4ef   :  { %2244 = vmatpush.bf16.msrb.mxu2 %v4881_v34  ;;  %2257 = vmatpush.bf16.msrb.mxu3 %v4882_v35 }
 0x4f2   :  { %2219 = vmatpush.bf16.msrb.mxu0 %v4883_v39  ;;  %2232 = vmatpush.bf16.msrb.mxu1 %v4884_v44 }
 0x4f3   :  { %2245 = vmatpush.bf16.msrb.mxu2 %v4885_v45  ;;  %2258 = vmatpush.bf16.msrb.mxu3 %v4886_v49 }
 0x4f6   :  { %2220 = vmatpush.bf16.msrb.mxu0 %v4887_v51  ;;  %2233 = vmatpush.bf16.msrb.mxu1 %v4888_v55 }
 0x4f7   :  { %2246 = vmatpush.bf16.msrb.mxu2 %v4889_v60  ;;  %2259 = vmatpush.bf16.msrb.mxu3 %v4890_v61 }
 0x4fa   :  { %2221 = vmatpush.bf16.msrb.mxu0 %v4891_v3  ;;  %2234 = vmatpush.bf16.msrb.mxu1 %v4892_v8 }
 0x4fb   :  { %2247 = vmatpush.bf16.msrb.mxu2 %v4893_v10  ;;  %2260 = vmatpush.bf16.msrb.mxu3 %v4894_v14 }
 0x4fe   :  { %2222 = vmatpush.bf16.msrb.mxu0 %v4895_v22  ;;  %2235 = vmatpush.bf16.msrb.mxu1 %v4896_v29 }
 0x4ff   :  { %2248 = vmatpush.bf16.msrb.mxu2 %v4897_v33  ;;  %2261 = vmatpush.bf16.msrb.mxu3 %v4898_v36 }
 0x53c   :  { %v2009_v37 = vpop.f32.mrf.mxu0  ;;  %v2022_v42 = vpop.f32.mrf.mxu1 }
 0x53d   :  { %v2052_v52 = vadd.f32 %v2009_v37, %v4899_v50  ;;  %v2053_v2 = vadd.f32 %v2022_v42, %v4900_v57 }
 0x53f   :  { %v2113_v26 = vmul.f32 0.5, %v2052_v52  ;;  %v2117_v43 = vmul.f32 0.5, %v2053_v2 }
 0x541   :  { %3340 = vtanh.f32 %v2113_v26 }
 0x542   :  { %3342 = vtanh.f32 %v2117_v43 }
 0x543   :  { %v2035_v18 = vpop.f32.mrf.mxu2  ;;  %v2048_v19 = vpop.f32.mrf.mxu3 }
 0x544   :  { %v2054_v40 = vadd.f32 %v2035_v18, %v4901_v30  ;;  %v2055_v17 = vadd.f32 %v2048_v19, %v4902_v47  ;;  %v2011_v11 = vpop.f32.mrf.mxu0  ;;  %v2024_v23 = vpop.f32.mrf.mxu1  ;;  %v3187_v18 = vld [vmem:[#allocation7 + $0x38] sm:$0xff]  ;;  %v3186_v19 = vld [vmem:[#allocation7 + $0x30] sm:$0xff]  ;;  %v3184_v30 = vld [vmem:[#allocation7 + $0x20] sm:$0xff] }
 0x545   :  { %v3195_v47 = vld [vmem:[#allocation7 + $0x78] sm:$0xff]  ;;  %v3194_v11 = vld [vmem:[#allocation7 + $0x70] sm:$0xff]  ;;  %v3181_v23 = vld [vmem:[#allocation7 + $0x8] sm:$0xff] }
 0x546   :  { %3344 = vtanh.f32 %v2054_v40  ;;  %v2122_v56 = vmul.f32 0.5, %v2055_v17  ;;  %v3183_v40 = vld [vmem:[#allocation7 + $0x18] sm:$0xff]  ;;  %v3182_v17 = vld [vmem:[#allocation7 + $0x10] sm:$0xff] }
 0x547   :  { %v3341_v59 = vpop.eup %3340 }
 0x548   :  { %v3343_v38 = vpop.eup %3342  ;;  %v2115_v20 = vmul.f32 0.5, %v3341_v59  ;;  %3346 = vtanh.f32 %v2122_v56  ;;  %v3193_v56 = vld [vmem:[#allocation7 + $0x68] sm:$0xff]  ;;  %v3180_v59 = vld [vmem:[#allocation7] sm:$0xff] }
 0x549   :  { %v2119_v41 = vmul.f32 0.5, %v3343_v38  ;;  %v3192_v38 = vld [vmem:[#allocation7 + $0x60] sm:$0xff] }
 0x54a   :  { %v2116_v25 = vadd.f32 0.5, %v2115_v20 }
 0x54b   :  { %v2120_v7 = vadd.f32 0.5, %v2119_v41  ;;  %v2037_v12 = vpop.f32.mrf.mxu2  ;;  %v2050_v48 = vpop.f32.mrf.mxu3 }
 0x54c   :  { %v3345_v46 = vpop.eup %3344  ;;  %v4909_v48 = vld [vmem:[#allocation60_spill] sm:$0xff] }
 0x54d   :  { %v2126_v13 = vmul.f32 %v2120_v7, %v4903_v6  ;;  %v2127_v54 = vmul.f32 %v3345_v46, %v2116_v25  ;;  %v2066_v27 = vpop.f32.mrf.mxu0  ;;  %v2079_v0 = vpop.f32.mrf.mxu1  ;;  %v3191_v25 = vld [vmem:[#allocation7 + $0x58] sm:$0xff]  ;;  %v4908_v7 = vld [vmem:[#allocation59_spill] sm:$0xff] }
 0x54e   :  { %v2109_v32 = vadd.f32 %v2066_v27, %v4904_v28  ;;  %v2110_v53 = vadd.f32 %v2079_v0, %v4905_v58  ;;  %v3347_v1 = vpop.eup %3346  ;;  %v4910_v28 = vld [vmem:[#allocation61_spill] sm:$0xff]  ;;  %v4911_v58 = vld [vmem:[#allocation62_spill] sm:$0xff] }
 0x54f   :  { %v4498_v63 = vadd.f32 %v2127_v54, %v2126_v13  ;;  %v2124_v9 = vmul.f32 0.5, %v3347_v1  ;;  %v3190_v54 = vld [vmem:[#allocation7 + $0x50] sm:$0xff] }
 0x550   :  { %v2131_v4 = vmul.f32 0.5, %v2109_v32  ;;  %v2135_v5 = vmul.f32 0.5, %v2110_v53 }
 0x551   :  { %3348 = vtanh.f32 %v4498_v63  ;;  %v2125_v44 = vadd.f32 0.5, %v2124_v9 }
 0x552   :  { %3350 = vtanh.f32 %v2131_v4 }
 0x553   :  { %3352 = vtanh.f32 %v2135_v5  ;;  %v3189_v5 = vld [vmem:[#allocation7 + $0x48] sm:$0xff] }
 0x554   :  { %v2092_v15 = vpop.f32.mrf.mxu2  ;;  %v2105_v16 = vpop.f32.mrf.mxu3 }
 0x555   :  { %v2111_v24 = vadd.f32 %v2092_v15, %v4906_v21  ;;  %v2112_v34 = vadd.f32 %v2105_v16, %v4907_v31  ;;  %v2068_v35 = vpop.f32.mrf.mxu0  ;;  %v2081_v39 = vpop.f32.mrf.mxu1 }
 0x557   :  { %v3349_v45 = vpop.eup %3348  ;;  %3354 = vtanh.f32 %v2111_v24  ;;  %v2140_v49 = vmul.f32 0.5, %v2112_v34  ;;  %v3188_v24 = vld [vmem:[#allocation7 + $0x40] sm:$0xff] }
 0x558   :  { %v3351_v51 = vpop.eup %3350  ;;  %v2130_v55 = vmul.f32 %v3349_v45, %v2125_v44 }
 0x559   :  { %v3353_v60 = vpop.eup %3352  ;;  %v2133_v61 = vmul.f32 0.5, %v3351_v51  ;;  %3356 = vtanh.f32 %v2140_v49 }
 0x55a   :  { %v2157_v3 = vpack.c.bf16 %v2130_v55, %v2130_v55  ;;  %v2137_v8 = vmul.f32 0.5, %v3353_v60 }
 0x55b   :  { %v2134_v10 = vadd.f32 0.5, %v2133_v61  ;;  %v3203_v61 = vld [vmem:[%s4555_s5 + $0x38] sm:$0xff] }
 0x55c   :  { %v2138_v14 = vadd.f32 0.5, %v2137_v8  ;;  %v2094_v22 = vpop.f32.mrf.mxu2  ;;  %v2107_v29 = vpop.f32.mrf.mxu3  ;;  %2166 = vmatmul.bf16.vlgmr.msra.gmra.mxu0 %v2157_v3  ;;  %2179 = vmatmul.bf16.vlgmr.msra.gmra.mxu1 %v2157_v3 }
 0x55d   :  { %v3355_v33 = vpop.eup %3354  ;;  %2192 = vmatmul.bf16.vlgmr.msra.gmra.mxu2 %v2157_v3  ;;  %2205 = vmatmul.bf16.vlgmr.msra.gmra.mxu3 %v2157_v3  ;;  %v4912_v3 = vld [vmem:[#allocation63_spill] sm:$0xff] }
 0x55e   :  { %v2144_v36 = vmul.f32 %v2138_v14, %v4428_v62  ;;  %v2145_v37 = vmul.f32 %v3355_v33, %v2134_v10  ;;  %2441 = vmatpush.bf16.msra.mxu0 %v3187_v18  ;;  %v3185_v62 = vld [vmem:[#allocation7 + $0x28] sm:$0xff]  ;;  %2454 = vmatpush.bf16.msra.mxu1 %v3195_v47  ;;  %v4913_v10 = vld [vmem:[#allocation64_spill] sm:$0xff] }
 0x55f   :  { %v3357_v42 = vpop.eup %3356  ;;  %2537 = vmatpush.bf16.msra.mxu2 %v3203_v61  ;;  %v3202_v33 = vld [vmem:[%s4555_s5 + $0x30] sm:$0xff] }
 0x560   :  { %v4504_v50 = vadd.f32 %v2145_v37, %v2144_v36  ;;  %v2142_v52 = vmul.f32 0.5, %v3357_v42 }
 0x562   :  { %3358 = vtanh.f32 %v4504_v50  ;;  %v2143_v57 = vadd.f32 0.5, %v2142_v52  ;;  %2442 = vmatpush.bf16.msra.mxu0 %v3186_v19  ;;  %2455 = vmatpush.bf16.msra.mxu1 %v3194_v11 }
 0x563   :  { %2538 = vmatpush.bf16.msra.mxu2 %v3202_v33 }
 0x566   :  { %2443 = vmatpush.bf16.msra.mxu0 %v3185_v62  ;;  %2456 = vmatpush.bf16.msra.mxu1 %v3193_v56 }
 0x568   :  { %v3359_v2 = vpop.eup %3358 }
 0x569   :  { %v2148_v26 = vmul.f32 %v3359_v2, %v2143_v57  ;;  %v4914_v57 = vld [vmem:[#allocation65_spill] sm:$0xff] }
 0x56a   :  { %2444 = vmatpush.bf16.msra.mxu0 %v3184_v30  ;;  %2457 = vmatpush.bf16.msra.mxu1 %v3192_v38 }
 0x56b   :  { %v2214_v43 = vpack.c.bf16 %v2148_v26, %v2148_v26  ;;  %v4915_v26 = vld [vmem:[#allocation66_spill] sm:$0xff] }
 0x56d   :  { %2223 = vmatmul.bf16.vlgmr.msrb.gmra.mxu0 %v2214_v43  ;;  %2236 = vmatmul.bf16.vlgmr.msrb.gmra.mxu1 %v2214_v43 }
 0x56e   :  { %2249 = vmatmul.bf16.vlgmr.msrb.gmra.mxu2 %v2214_v43  ;;  %2262 = vmatmul.bf16.vlgmr.msrb.gmra.mxu3 %v2214_v43 }
 0x56f   :  { %2445 = vmatpush.bf16.msra.mxu0 %v3183_v40  ;;  %2458 = vmatpush.bf16.msra.mxu1 %v3191_v25 }
 0x573   :  { %2446 = vmatpush.bf16.msra.mxu0 %v3182_v17  ;;  %2459 = vmatpush.bf16.msra.mxu1 %v3190_v54 }
 0x577   :  { %2447 = vmatpush.bf16.msra.mxu0 %v3181_v23  ;;  %2460 = vmatpush.bf16.msra.mxu1 %v3189_v5 }
 0x57b   :  { %2448 = vmatpush.bf16.msra.mxu0 %v3180_v59  ;;  %2461 = vmatpush.bf16.msra.mxu1 %v3188_v24 }
 0x5d9   :  { %v2167_v20 = vpop.f32.mrf.mxu0  ;;  %v2180_v41 = vpop.f32.mrf.mxu1 }
 0x5da   :  { %v2210_v12 = vadd.f32 %v2167_v20, %v4908_v7  ;;  %v2211_v46 = vadd.f32 %v2180_v41, %v4909_v48 }
 0x5dc   :  { %v2271_v6 = vmul.f32 0.5, %v2210_v12  ;;  %v2275_v13 = vmul.f32 0.5, %v2211_v46 }
 0x5de   :  { %3360 = vtanh.f32 %v2271_v6 }
 0x5df   :  { %3362 = vtanh.f32 %v2275_v13 }
 0x5e0   :  { %v2193_v27 = vpop.f32.mrf.mxu2  ;;  %v2206_v0 = vpop.f32.mrf.mxu3 }
 0x5e1   :  { %v2212_v32 = vadd.f32 %v2193_v27, %v4910_v28  ;;  %v2213_v53 = vadd.f32 %v2206_v0, %v4911_v58  ;;  %v2169_v1 = vpop.f32.mrf.mxu0  ;;  %v2182_v4 = vpop.f32.mrf.mxu1  ;;  %v3200_v58 = vld [vmem:[%s4555_s5 + $0x20] sm:$0xff] }
 0x5e2   :  { %v3197_v1 = vld [vmem:[%s4555_s5 + $0x8] sm:$0xff]  ;;  %v3196_v4 = vld [vmem:[%s4555_s5] sm:$0xff] }
 0x5e3   :  { %3364 = vtanh.f32 %v2212_v32  ;;  %v2280_v9 = vmul.f32 0.5, %v2213_v53  ;;  %v3201_v32 = vld [vmem:[%s4555_s5 + $0x28] sm:$0xff]  ;;  %v3198_v53 = vld [vmem:[%s4555_s5 + $0x10] sm:$0xff] }
 0x5e4   :  { %v3361_v15 = vpop.eup %3360  ;;  %2539 = vmatpush.bf16.msra.mxu2 %v3201_v32 }
 0x5e5   :  { %v3363_v16 = vpop.eup %3362  ;;  %v2273_v21 = vmul.f32 0.5, %v3361_v15  ;;  %3366 = vtanh.f32 %v2280_v9  ;;  %v3218_v15 = vld [vmem:[%s4554_s4] ss:$0 sm:$0xff] }
 0x5e6   :  { %v2277_v31 = vmul.f32 0.5, %v3363_v16 }
 0x5e7   :  { %v2274_v34 = vadd.f32 0.5, %v2273_v21 }
 0x5e8   :  { %v2278_v35 = vadd.f32 0.5, %v2277_v31  ;;  %v2195_v39 = vpop.f32.mrf.mxu2  ;;  %v2208_v44 = vpop.f32.mrf.mxu3  ;;  %2540 = vmatpush.bf16.msra.mxu2 %v3200_v58 }
 0x5e9   :  { %v3365_v45 = vpop.eup %3364  ;;  %v3219_v39 = vld [vmem:[%s4556_s6] ss:$0 sm:$0xff] }
 0x5ea   :  { %v2284_v49 = vmul.f32 %v2278_v35, %v4498_v63  ;;  %v2285_v51 = vmul.f32 %v3365_v45, %v2274_v34  ;;  %v2224_v55 = vpop.f32.mrf.mxu0  ;;  %v2237_v60 = vpop.f32.mrf.mxu1 }
 0x5eb   :  { %v2267_v8 = vadd.f32 %v2224_v55, %v4912_v3  ;;  %v2268_v14 = vadd.f32 %v2237_v60, %v4913_v10  ;;  %v3367_v22 = vpop.eup %3366 }
 0x5ec   :  { %v2286_v29 = vadd.f32 %v2285_v51, %v2284_v49  ;;  %v2282_v37 = vmul.f32 0.5, %v3367_v22 }
 0x5ed   :  { %v2289_v36 = vmul.f32 0.5, %v2267_v8  ;;  %v2293_v63 = vmul.f32 0.5, %v2268_v14 }
 0x5ee   :  { %3368 = vtanh.f32 %v2286_v29  ;;  %v2283_v62 = vadd.f32 0.5, %v2282_v37 }
 0x5ef   :  { %3370 = vtanh.f32 %v2289_v36 }
 0x5f0   :  { %3372 = vtanh.f32 %v2293_v63 }
 0x5f1   :  { %v2250_v42 = vpop.f32.mrf.mxu2  ;;  %v2263_v52 = vpop.f32.mrf.mxu3 }
 0x5f2   :  { %v2269_v2 = vadd.f32 %v2250_v42, %v4914_v57  ;;  %v2270_v43 = vadd.f32 %v2263_v52, %v4915_v26  ;;  %v2226_v18 = vpop.f32.mrf.mxu0  ;;  %v2239_v19 = vpop.f32.mrf.mxu1 }
 0x5f4   :  { %v3369_v30 = vpop.eup %3368  ;;  %3374 = vtanh.f32 %v2269_v2  ;;  %v2298_v40 = vmul.f32 0.5, %v2270_v43 }
 0x5f5   :  { %v3371_v47 = vpop.eup %3370  ;;  %v2288_v17 = vmul.f32 %v3369_v30, %v2283_v62 }
 0x5f6   :  { %v3373_v11 = vpop.eup %3372  ;;  %v2291_v23 = vmul.f32 0.5, %v3371_v47  ;;  %3376 = vtanh.f32 %v2298_v40 }
 0x5f7   :  { %v2307_v56 = vpack.c.bf16 %v2288_v17, %v2288_v17  ;;  %v2295_v59 = vmul.f32 0.5, %v3373_v11 }
 0x5f8   :  { %v2292_v38 = vadd.f32 0.5, %v2291_v23 }
 0x5f9   :  { %v2296_v20 = vadd.f32 0.5, %v2295_v59  ;;  %v2252_v41 = vpop.f32.mrf.mxu2  ;;  %v2265_v25 = vpop.f32.mrf.mxu3  ;;  %2449 = vmatmul.bf16.vlgmr.msra.gmra.mxu0 %v2307_v56 }
 0x5fa   :  { %v3375_v7 = vpop.eup %3374 }
 0x5fb   :  { %v2302_v12 = vmul.f32 %v2296_v20, %v4504_v50  ;;  %v2303_v48 = vmul.f32 %v3375_v7, %v2292_v38  ;;  %v3199_v50 = vld [vmem:[%s4555_s5 + $0x18] sm:$0xff] }
 0x5fc   :  { %v3377_v46 = vpop.eup %3376  ;;  %2541 = vmatpush.bf16.msra.mxu2 %v3199_v50 }
 0x5fd   :  { %v2304_v6 = vadd.f32 %v2303_v48, %v2302_v12  ;;  %v2300_v13 = vmul.f32 0.5, %v3377_v46 }
 0x5ff   :  { %3378 = vtanh.f32 %v2304_v6  ;;  %v2301_v54 = vadd.f32 0.5, %v2300_v13 }
 0x600   :  { %2542 = vmatpush.bf16.msra.mxu2 %v3198_v53 }
 0x604   :  { %2543 = vmatpush.bf16.msra.mxu2 %v3197_v1 }
 0x605   :  { %v3379_v27 = vpop.eup %3378 }
 0x606   :  { %v2306_v0 = vmul.f32 %v3379_v27, %v2301_v54 }
 0x608   :  { %v2308_v28 = vpack.c.bf16 %v2306_v0, %v2306_v0  ;;  %2544 = vmatpush.bf16.msra.mxu2 %v3196_v4 }
 0x60a   :  { %2462 = vmatmul.bf16.vlgmr.msra.gmra.mxu1 %v2308_v28 }
 0x676   :  { %v2450_v5 = vpop.f32.mrf.mxu0 }
 0x677   :  { %v2451_v16 = vadd.f32 %v3218_v15, %v2450_v5 }
 0x67e   :  { %v2452_v9 = vpop.f32.mrf.mxu0 }
 0x687   :  { %v2463_v21 = vpop.f32.mrf.mxu1 }
 0x688   :  { %v2464_v24 = vadd.f32 %v2463_v21, %v2451_v16 }
 0x68a   :  { %v2467_v31 = vmax.f32 %v2464_v24, 0.0 }
 0x68c   :  { %v2468_v34 = vpack.c.bf16 %v2467_v31, %v2467_v31 }
 0x68e   :  { %2545 = vmatmul.bf16.vlgmr.msra.gmra.mxu2 %v2468_v34 }
 0x68f   :  { %v2465_v35 = vpop.f32.mrf.mxu1 }
 0x711   :  { %v2546_v44 = vpop.f32.mrf.mxu2 }
 0x712   :  { %v2547_v45 = vadd.f32 %v3219_v39, %v2546_v44 }
 0x714   :  { %2550 = vst [vmem:[%s4557_s7] sm:$0xff] %v2547_v45 }
 0x719   :  { %v2548_v49 = vpop.f32.mrf.mxu2 }
 0x71a   :  { %2555 = vsyncpa [#allocation4], 1 }
 0x71b   :  { %2556 = vsyncpa [#allocation6], 1 }

</bundles_post_ra>
